<compile_context>
chip_gen: v5e
topology: v5e:2x2
jax: 0.10.0
libtpu: 0.0.40
codegen_flags: <defaults>
</compile_context>

<pallas_src>
import functools

import jax
import jax.numpy as jnp
from jax import lax
from jax.experimental import pallas as pl
from jax.experimental.pallas import tpu as pltpu


MXU_DTYPE = jnp.bfloat16   # matmul operand dtype (accumulation stays f32)


def _mm(a, w):
    """MXU matmul: bf16 operands, f32 accumulate."""
    return jnp.dot(a.astype(MXU_DTYPE), w.astype(MXU_DTYPE),
                   preferred_element_type=jnp.float32)


def _layer_norm(z, g, b, eps=1e-5):
    mean = jnp.mean(z, axis=-1, keepdims=True)
    zc = z - mean
    var = jnp.mean(zc * zc, axis=-1, keepdims=True)
    return zc * lax.rsqrt(var + eps) * g + b


# -----------------------------------------------------------------------------
# Fused decoder-layer kernel: one grid step per batch element.
# -----------------------------------------------------------------------------
def _decoder_layer_kernel(
        q_ref, aug_ref, kbias_ref, perq_ref, bev_ref,
        wqk_ref, bqk_ref, wvsa_ref, bvsa_ref, wosa_ref, bosa_ref,
        ln_ref,
        wvda_ref, bvda_ref, woffa_ref, boffa_ref, woda_ref, boda_ref,
        w1_ref, bm1_ref, w2_ref, bm2_ref,
        out_ref,
        *, num_heads, num_points, h_bev, w_bev, offset_scale):
    q_in = q_ref[0]        # (L, D)  original queries (value path of self-attn)
    aug = aug_ref[0]       # (L, D)  zeros / orig_det_queries additive augmentation
    kbias = kbias_ref[0]   # (1, L)  additive key-padding bias (0 or -1e9)
    perq = perq_ref[0]     # (L, 4)  [query-mask, deform-mask, ref_x, ref_y]
    bev = bev_ref[0]       # (HW, D)

    L, D = q_in.shape
    HW = bev.shape[0]
    dh = D // num_heads
    HP = num_heads * num_points

    qmask = perq[:, 0:1]
    dmask = perq[:, 1:2]
    ref_x = perq[:, 2:3]
    ref_y = perq[:, 3:4]

    ln = ln_ref[...]       # (6, D): [g1; b1; g2; b2; g3; b3]

    # ---------------- self-attention (q = k = queries + aug, v = queries) -----
    x_qk = q_in + aug
    qk = _mm(x_qk, wqk_ref[...]) + bqk_ref[...]       # (L, 2D); wq pre-scaled
    v_sa = _mm(q_in, wvsa_ref[...]) + bvsa_ref[...]   # (L, D)

    out1 = jnp.zeros((L, D), jnp.float32)
    for h in range(num_heads):
        qh = qk[:, h * dh:(h + 1) * dh].astype(MXU_DTYPE)
        kh = qk[:, D + h * dh:D + (h + 1) * dh].astype(MXU_DTYPE)
        vh = v_sa[:, h * dh:(h + 1) * dh].astype(MXU_DTYPE)
        s = lax.dot_general(qh, kh, (((1,), (1,)), ((), ())),
                            preferred_element_type=jnp.float32)
        s = s + kbias
        s = s - jnp.max(s, axis=-1, keepdims=True)
        e = jnp.exp(s)
        p = e * pl.reciprocal(jnp.sum(e, axis=-1, keepdims=True), approx=True)
        pv = jnp.dot(p.astype(MXU_DTYPE), vh, preferred_element_type=jnp.float32)
        # fold the output projection per head instead of concatenating heads:
        #   concat(heads) @ Wo == sum_h head_h @ Wo[h*dh:(h+1)*dh, :]
        out1 = out1 + jnp.dot(pv.astype(MXU_DTYPE), wosa_ref[h * dh:(h + 1) * dh, :],
                              preferred_element_type=jnp.float32)
    out1 = out1 + bosa_ref[...]

    # ---------------- addnorm1 ------------------------------------------------
    out2 = _layer_norm(q_in * qmask + out1, ln[0:1], ln[1:2])

    # ---------------- deformable attention over BEV ---------------------------
    aug_out2 = out2 + aug
    value = _mm(bev, wvda_ref[...]) + bvda_ref[...]           # (HW, D)
    offa = _mm(aug_out2, woffa_ref[...]) + boffa_ref[...]     # (L, 3*HP)

    off_x = offa[:, 0:HP]              # (L, HP)
    off_y = offa[:, HP:2 * HP]         # (L, HP)
    logits = offa[:, 2 * HP:3 * HP]    # (L, HP)

    # grid_sample-style zeros padding, align_corners=False convention.
    px = (ref_x + off_x * (offset_scale / float(w_bev))) * float(w_bev) - 0.5
    py = (ref_y + off_y * (offset_scale / float(h_bev))) * float(h_bev) - 0.5
    x0f = jnp.floor(px)
    y0f = jnp.floor(py)
    fx = px - x0f
    fy = py - y0f
    x0 = x0f.astype(jnp.int32)
    y0 = y0f.astype(jnp.int32)

    vx0 = (x0 >= 0) & (x0 <= w_bev - 1)
    vx1 = (x0 >= -1) & (x0 <= w_bev - 2)
    vy0 = (y0 >= 0) & (y0 <= h_bev - 1)
    vy1 = (y0 >= -1) & (y0 <= h_bev - 2)

    w00 = jnp.where(vx0 & vy0, (1.0 - fx) * (1.0 - fy), 0.0)   # (L, HP)
    w10 = jnp.where(vx1 & vy0, fx * (1.0 - fy), 0.0)
    w01 = jnp.where(vx0 & vy1, (1.0 - fx) * fy, 0.0)
    w11 = jnp.where(vx1 & vy1, fx * fy, 0.0)
    flat00 = y0 * w_bev + x0                                   # (L, HP)

    hw_iota = lax.broadcasted_iota(jnp.int32, (L, HW), 1)      # hoisted once

    out3 = jnp.zeros((L, D), jnp.float32)
    for h in range(num_heads):
        lh = logits[:, h * num_points:(h + 1) * num_points]
        lh = lh - jnp.max(lh, axis=-1, keepdims=True)
        eh = jnp.exp(lh)
        attn = eh * pl.reciprocal(jnp.sum(eh, axis=-1, keepdims=True), approx=True)

        agg = jnp.zeros((L, HW), jnp.float32)
        for pt in range(num_points):
            c = h * num_points + pt
            a = attn[:, pt:pt + 1]
            cw00 = w00[:, c:c + 1] * a                         # (L, 1) scalars:
            cw10 = w10[:, c:c + 1] * a                         # validity + bilinear
            cw01 = w01[:, c:c + 1] * a                         # + attention weight
            cw11 = w11[:, c:c + 1] * a
            d = hw_iota - flat00[:, c:c + 1]
            # corner offsets {0, 1, W, W+1} are disjoint per sample, so one
            # select chain builds the combined weighted one-hot in one pass.
            sel = jnp.where(d == 0, cw00,
                  jnp.where(d == 1, cw10,
                  jnp.where(d == w_bev, cw01,
                  jnp.where(d == w_bev + 1, cw11, 0.0))))
            agg = agg + sel
        sampled = jnp.dot(agg.astype(MXU_DTYPE),
                          value[:, h * dh:(h + 1) * dh].astype(MXU_DTYPE),
                          preferred_element_type=jnp.float32)          # (L, dh)
        out3 = out3 + jnp.dot(sampled.astype(MXU_DTYPE),
                              woda_ref[h * dh:(h + 1) * dh, :],
                              preferred_element_type=jnp.float32)
    out3 = (out3 + boda_ref[...]) * dmask

    # ---------------- addnorm2 -> MLP -> addnorm3 -----------------------------
    out4 = _layer_norm(out2 + out3, ln[2:3], ln[3:4])
    hmid = jnp.maximum(_mm(out4, w1_ref[...]) + bm1_ref[...], 0.0)
    out5 = _mm(hmid, w2_ref[...]) + bm2_ref[...]
    out6 = _layer_norm(out4 + out5, ln[4:5], ln[5:6])
    out_ref[0] = out6.astype(out_ref.dtype)


# -----------------------------------------------------------------------------
# Wrapper: glue (mask / concat prep) in plain JAX, one pallas_call for the layer.
# -----------------------------------------------------------------------------
def trackformer_decoder_layer(packed, queries, bev_features, ref_points,
                              orig_det_queries=None, padding_mask=None, *,
                              num_heads=4, num_ref_points=4,
                              bev_feature_hw=(16, 16), offset_scale=1.0):
    N, L, D = queries.shape
    HB, WB = bev_feature_hw
    HW = HB * WB
    assert bev_features.shape[1] == HW and bev_features.shape[2] == D
    HP = num_heads * num_ref_points
    DFF = packed["w1"].shape[1]

    use_orig = orig_det_queries is not None and padding_mask is not None
    if use_orig:
        num_det = orig_det_queries.shape[1]
        num_tracks = L - num_det
        use_orig = num_tracks > 0

    if use_orig:
        aug = jnp.concatenate(
            [jnp.zeros((N, num_tracks, D), jnp.float32),
             orig_det_queries.astype(jnp.float32)], axis=1)
    else:
        aug = jnp.zeros((N, L, D), jnp.float32)

    if padding_mask is not None:
        kbias = jnp.where(padding_mask, 0.0, -1e9).astype(jnp.float32)[:, None, :]
        qmask = padding_mask.astype(jnp.float32)[..., None]
    else:
        kbias = jnp.zeros((N, 1, L), jnp.float32)
        qmask = jnp.ones((N, L, 1), jnp.float32)

    if use_orig:
        dmask = padding_mask.astype(jnp.float32)[..., None]
    else:
        dmask = jnp.ones((N, L, 1), jnp.float32)

    ref2 = ref_points[:, :, 0, :].astype(jnp.float32)        # single fmap level
    perq = jnp.concatenate([qmask, dmask, ref2], axis=-1)    # (N, L, 4)

    kernel = functools.partial(
        _decoder_layer_kernel, num_heads=num_heads, num_points=num_ref_points,
        h_bev=HB, w_bev=WB, offset_scale=offset_scale)

    bspec = lambda shape: pl.BlockSpec(
        shape, lambda b, _n=len(shape): (b,) + (0,) * (_n - 1))
    wspec = lambda shape: pl.BlockSpec(
        shape, lambda b, _n=len(shape): (0,) * _n)   # constant -> loaded once

    return pl.pallas_call(
        kernel,
        out_shape=jax.ShapeDtypeStruct((N, L, D), jnp.float32),
        grid=(N,),
        in_specs=[
            bspec((1, L, D)),       # queries
            bspec((1, L, D)),       # aug (orig det queries additive)
            bspec((1, 1, L)),       # key-padding bias
            bspec((1, L, 4)),       # per-query scalars [qmask, dmask, ref_x, ref_y]
            bspec((1, HW, D)),      # bev features
            wspec((D, 2 * D)), wspec((1, 2 * D)),     # fused [wq|wk], [bq|bk]
            wspec((D, D)), wspec((1, D)),             # wv, bv   (self-attn)
            wspec((D, D)), wspec((1, D)),             # wo, bo   (self-attn)
            wspec((6, D)),                            # layernorm g/b x3
            wspec((D, D)), wspec((1, D)),             # wv, bv   (deform)
            wspec((D, 3 * HP)), wspec((1, 3 * HP)),   # fused [woff|wa], [boff|ba]
            wspec((D, D)), wspec((1, D)),             # wo, bo   (deform)
            wspec((D, DFF)), wspec((1, DFF)),         # MLP w1, b1
            wspec((DFF, D)), wspec((1, D)),           # MLP w2, b2
        ],
        out_specs=bspec((1, L, D)),
        compiler_params=pltpu.CompilerParams(
            dimension_semantics=("parallel",),        # v7x: shard batch over 2 TCs
            vmem_limit_bytes=32 * 1024 * 1024),
    )(queries.astype(jnp.float32), aug, kbias, perq, bev_features.astype(jnp.float32),
      packed["wqk"], packed["bqk"], packed["wvsa"], packed["bvsa"],
      packed["wosa"], packed["bosa"], packed["ln"],
      packed["wvda"], packed["bvda"], packed["woffa"], packed["boffa"],
      packed["woda"], packed["boda"],
      packed["w1"], packed["bm1"], packed["w2"], packed["bm2"])


# -----------------------------------------------------------------------------
# Deterministic parameter init (same structure as before) + packing for the kernel
# -----------------------------------------------------------------------------
def init_params(key, D, DFF, num_heads, num_points):
    HP = num_heads * num_points
    ks = iter(jax.random.split(key, 16))

    def lin(k, din, dout, scale=0.05):
        return jax.random.normal(k, (din, dout), jnp.float32) * scale

    def zb(d):
        return jnp.zeros((1, d), jnp.float32)

    def norm_params():
        return {"g": jnp.ones((1, D), jnp.float32), "b": jnp.zeros((1, D), jnp.float32)}

    return {
        "sa": {"wq": lin(next(ks), D, D), "bq": zb(D),
               "wk": lin(next(ks), D, D), "bk": zb(D),
               "wv": lin(next(ks), D, D), "bv": zb(D),
               "wo": lin(next(ks), D, D), "bo": zb(D)},
        "an1": norm_params(),
        "da": {"wv": lin(next(ks), D, D), "bv": zb(D),
               "woff": lin(next(ks), D, 2 * HP, 0.02),
               "boff": jax.random.normal(next(ks), (1, 2 * HP), jnp.float32) * 0.1,
               "wa": lin(next(ks), D, HP), "ba": zb(HP),
               "wo": lin(next(ks), D, D), "bo": zb(D)},
        "an2": norm_params(),
        "mlp": {"w1": lin(next(ks), D, DFF), "b1": zb(DFF),
                "w2": lin(next(ks), DFF, D), "b2": zb(D)},
        "an3": norm_params(),
    }


def pack_params(params, num_heads):
    """Fuse/pre-scale weights for the fused kernel; store matmul weights in bf16."""
    sa, da, mp = params["sa"], params["da"], params["mlp"]
    D = sa["wq"].shape[0]
    dh = D // num_heads
    scale = 1.0 / float(dh) ** 0.5
    w = lambda x: x.astype(MXU_DTYPE)
    return {
        # 1/sqrt(dh) folded into the query projection (weight AND bias).
        "wqk": w(jnp.concatenate([sa["wq"] * scale, sa["wk"]], axis=1)),
        "bqk": jnp.concatenate([sa["bq"] * scale, sa["bk"]], axis=1),
        "wvsa": w(sa["wv"]), "bvsa": sa["bv"],
        "wosa": w(sa["wo"]), "bosa": sa["bo"],
        "ln": jnp.concatenate([params["an1"]["g"], params["an1"]["b"],
                               params["an2"]["g"], params["an2"]["b"],
                               params["an3"]["g"], params["an3"]["b"]], axis=0),
        "wvda": w(da["wv"]), "bvda": da["bv"],
        "woffa": w(jnp.concatenate([da["woff"], da["wa"]], axis=1)),
        "boffa": jnp.concatenate([da["boff"], da["ba"]], axis=1),
        "woda": w(da["wo"]), "boda": da["bo"],
        "w1": w(mp["w1"]), "bm1": mp["b1"],
        "w2": w(mp["w2"]), "bm2": mp["b2"],
    }


# TODO(synk): dropout layers are identity (inference mode); SimpleMLP activation
#             assumed ReLU and bilinear sampling assumed grid_sample zeros-padding
#             / align_corners=False since those submodule definitions were not given.

if __name__ == "__main__":
    N, L, D = 2, 8, 32
    NUM_HEADS, NUM_POINTS = 4, 4
    DFF = 64
    HB, WB = 16, 16
    NUM_DET = 6

    root = jax.random.PRNGKey(0)
    kp, kq, kb, kr, ko, km = jax.random.split(root, 6)

    params = init_params(kp, D, DFF, NUM_HEADS, NUM_POINTS)
    packed = pack_params(params, NUM_HEADS)

    queries = jax.random.normal(kq, (N, L, D), jnp.float32)
    bev_features = jax.random.normal(kb, (N, HB * WB, D), jnp.float32)
    ref_points = jax.random.uniform(kr, (N, L, 1, 2), jnp.float32)
    orig_det_queries = jax.random.normal(ko, (N, NUM_DET, D), jnp.float32)
    padding_mask = jax.random.uniform(km, (N, L)) > 0.2   # bool, True = keep

    fwd = jax.jit(functools.partial(
        trackformer_decoder_layer,
        num_heads=NUM_HEADS, num_ref_points=NUM_POINTS,
        bev_feature_hw=(HB, WB), offset_scale=1.0))

    out = fwd(packed, queries, bev_features, ref_points,
              orig_det_queries=orig_det_queries, padding_mask=padding_mask)

    jax.block_until_ready(out)
    assert out.shape == (N, L, D)
    assert bool(jnp.all(jnp.isfinite(out)))
    print("KERNEL_OK")
</pallas_src>

<mosaic_0001>
module attributes {stable_mosaic.version = 11 : i64} {
  func.func @_decoder_layer_kernel(%arg0: i32, %arg1: memref<1x8x32xf32, #tpu.memory_space<vmem>>, %arg2: memref<1x8x32xf32, #tpu.memory_space<vmem>>, %arg3: memref<1x1x8xf32, #tpu.memory_space<vmem>>, %arg4: memref<1x8x4xf32, #tpu.memory_space<vmem>>, %arg5: memref<1x256x32xf32, #tpu.memory_space<vmem>>, %arg6: memref<32x64xbf16, #tpu.memory_space<vmem>>, %arg7: memref<1x64xf32, #tpu.memory_space<vmem>>, %arg8: memref<32x32xbf16, #tpu.memory_space<vmem>>, %arg9: memref<1x32xf32, #tpu.memory_space<vmem>>, %arg10: memref<32x32xbf16, #tpu.memory_space<vmem>>, %arg11: memref<1x32xf32, #tpu.memory_space<vmem>>, %arg12: memref<6x32xf32, #tpu.memory_space<vmem>>, %arg13: memref<32x32xbf16, #tpu.memory_space<vmem>>, %arg14: memref<1x32xf32, #tpu.memory_space<vmem>>, %arg15: memref<32x48xbf16, #tpu.memory_space<vmem>>, %arg16: memref<1x48xf32, #tpu.memory_space<vmem>>, %arg17: memref<32x32xbf16, #tpu.memory_space<vmem>>, %arg18: memref<1x32xf32, #tpu.memory_space<vmem>>, %arg19: memref<32x64xbf16, #tpu.memory_space<vmem>>, %arg20: memref<1x64xf32, #tpu.memory_space<vmem>>, %arg21: memref<64x32xbf16, #tpu.memory_space<vmem>>, %arg22: memref<1x32xf32, #tpu.memory_space<vmem>>, %arg23: memref<1x8x32xf32, #tpu.memory_space<vmem>>) attributes {dimension_semantics = [#tpu.dimension_semantics<parallel>], iteration_bounds = array<i64: 2>, scalar_prefetch = 0 : i64, scratch_operands = 0 : i64, tpu.core_type = #tpu.core_type<tc>, window_params = [{transform_indices = @transform_0, window_bounds = array<i64: 1, 8, 32>}, {transform_indices = @transform_1, window_bounds = array<i64: 1, 8, 32>}, {transform_indices = @transform_2, window_bounds = array<i64: 1, 1, 8>}, {transform_indices = @transform_3, window_bounds = array<i64: 1, 8, 4>}, {transform_indices = @transform_4, window_bounds = array<i64: 1, 256, 32>}, {pipeline_mode = #tpu.pipeline_mode<synchronous>, transform_indices = @transform_5, window_bounds = array<i64: 32, 64>}, {pipeline_mode = #tpu.pipeline_mode<synchronous>, transform_indices = @transform_6, window_bounds = array<i64: 1, 64>}, {pipeline_mode = #tpu.pipeline_mode<synchronous>, transform_indices = @transform_7, window_bounds = array<i64: 32, 32>}, {pipeline_mode = #tpu.pipeline_mode<synchronous>, transform_indices = @transform_8, window_bounds = array<i64: 1, 32>}, {pipeline_mode = #tpu.pipeline_mode<synchronous>, transform_indices = @transform_9, window_bounds = array<i64: 32, 32>}, {pipeline_mode = #tpu.pipeline_mode<synchronous>, transform_indices = @transform_10, window_bounds = array<i64: 1, 32>}, {pipeline_mode = #tpu.pipeline_mode<synchronous>, transform_indices = @transform_11, window_bounds = array<i64: 6, 32>}, {pipeline_mode = #tpu.pipeline_mode<synchronous>, transform_indices = @transform_12, window_bounds = array<i64: 32, 32>}, {pipeline_mode = #tpu.pipeline_mode<synchronous>, transform_indices = @transform_13, window_bounds = array<i64: 1, 32>}, {pipeline_mode = #tpu.pipeline_mode<synchronous>, transform_indices = @transform_14, window_bounds = array<i64: 32, 48>}, {pipeline_mode = #tpu.pipeline_mode<synchronous>, transform_indices = @transform_15, window_bounds = array<i64: 1, 48>}, {pipeline_mode = #tpu.pipeline_mode<synchronous>, transform_indices = @transform_16, window_bounds = array<i64: 32, 32>}, {pipeline_mode = #tpu.pipeline_mode<synchronous>, transform_indices = @transform_17, window_bounds = array<i64: 1, 32>}, {pipeline_mode = #tpu.pipeline_mode<synchronous>, transform_indices = @transform_18, window_bounds = array<i64: 32, 64>}, {pipeline_mode = #tpu.pipeline_mode<synchronous>, transform_indices = @transform_19, window_bounds = array<i64: 1, 64>}, {pipeline_mode = #tpu.pipeline_mode<synchronous>, transform_indices = @transform_20, window_bounds = array<i64: 64, 32>}, {pipeline_mode = #tpu.pipeline_mode<synchronous>, transform_indices = @transform_21, window_bounds = array<i64: 1, 32>}, {transform_indices = @transform_22, window_bounds = array<i64: 1, 8, 32>}]} {
    %c0 = arith.constant 0 : index
    %c0_0 = arith.constant 0 : index
    %c0_1 = arith.constant 0 : index
    %0 = vector.load %arg1[%c0, %c0_0, %c0_1] : memref<1x8x32xf32, #tpu.memory_space<vmem>>, vector<1x8x32xf32>
    %1 = vector.shape_cast %0 : vector<1x8x32xf32> to vector<8x32xf32>
    %c0_2 = arith.constant 0 : index
    %c0_3 = arith.constant 0 : index
    %c0_4 = arith.constant 0 : index
    %2 = vector.load %arg2[%c0_2, %c0_3, %c0_4] : memref<1x8x32xf32, #tpu.memory_space<vmem>>, vector<1x8x32xf32>
    %3 = vector.shape_cast %2 : vector<1x8x32xf32> to vector<8x32xf32>
    %c0_5 = arith.constant 0 : index
    %c0_6 = arith.constant 0 : index
    %c0_7 = arith.constant 0 : index
    %4 = vector.load %arg3[%c0_5, %c0_6, %c0_7] : memref<1x1x8xf32, #tpu.memory_space<vmem>>, vector<1x1x8xf32>
    %5 = vector.shape_cast %4 : vector<1x1x8xf32> to vector<1x8xf32>
    %c0_8 = arith.constant 0 : index
    %c0_9 = arith.constant 0 : index
    %c0_10 = arith.constant 0 : index
    %6 = vector.load %arg4[%c0_8, %c0_9, %c0_10] : memref<1x8x4xf32, #tpu.memory_space<vmem>>, vector<1x8x4xf32>
    %7 = vector.shape_cast %6 : vector<1x8x4xf32> to vector<8x4xf32>
    %c0_11 = arith.constant 0 : index
    %c0_12 = arith.constant 0 : index
    %c0_13 = arith.constant 0 : index
    %8 = vector.load %arg5[%c0_11, %c0_12, %c0_13] : memref<1x256x32xf32, #tpu.memory_space<vmem>>, vector<1x256x32xf32>
    %9 = vector.shape_cast %8 : vector<1x256x32xf32> to vector<256x32xf32>
    %10 = vector.extract_strided_slice %7 {offsets = [0, 0], sizes = [8, 1], strides = [1, 1]} : vector<8x4xf32> to vector<8x1xf32>
    %11 = vector.extract_strided_slice %7 {offsets = [0, 1], sizes = [8, 1], strides = [1, 1]} : vector<8x4xf32> to vector<8x1xf32>
    %12 = vector.extract_strided_slice %7 {offsets = [0, 2], sizes = [8, 1], strides = [1, 1]} : vector<8x4xf32> to vector<8x1xf32>
    %13 = vector.extract_strided_slice %7 {offsets = [0, 3], sizes = [8, 1], strides = [1, 1]} : vector<8x4xf32> to vector<8x1xf32>
    %c0_14 = arith.constant 0 : index
    %c0_15 = arith.constant 0 : index
    %14 = vector.load %arg12[%c0_14, %c0_15] : memref<6x32xf32, #tpu.memory_space<vmem>>, vector<6x32xf32>
    %15 = arith.addf %1, %3 : vector<8x32xf32>
    %c0_16 = arith.constant 0 : index
    %c0_17 = arith.constant 0 : index
    %16 = vector.load %arg6[%c0_16, %c0_17] : memref<32x64xbf16, #tpu.memory_space<vmem>>, vector<32x64xbf16>
    %17 = arith.truncf %15 : vector<8x32xf32> to vector<8x32xbf16>
    %cst = arith.constant dense<0.000000e+00> : vector<8x64xf32>
    %18 = tpu.matmul %17, %16, %cst {dimension_numbers = #tpu.dot_dimension_numbers<[1], [0], [0], [1], [0, 0, 1, 1], [], []>} : vector<8x32xbf16>, vector<32x64xbf16>, vector<8x64xf32> -> vector<8x64xf32>
    %c0_18 = arith.constant 0 : index
    %c0_19 = arith.constant 0 : index
    %19 = vector.load %arg7[%c0_18, %c0_19] : memref<1x64xf32, #tpu.memory_space<vmem>>, vector<1x64xf32>
    %20 = vector.broadcast %19 : vector<1x64xf32> to vector<8x64xf32>
    %21 = arith.addf %18, %20 : vector<8x64xf32>
    %c0_20 = arith.constant 0 : index
    %c0_21 = arith.constant 0 : index
    %22 = vector.load %arg8[%c0_20, %c0_21] : memref<32x32xbf16, #tpu.memory_space<vmem>>, vector<32x32xbf16>
    %23 = arith.truncf %1 : vector<8x32xf32> to vector<8x32xbf16>
    %cst_22 = arith.constant dense<0.000000e+00> : vector<8x32xf32>
    %24 = tpu.matmul %23, %22, %cst_22 {dimension_numbers = #tpu.dot_dimension_numbers<[1], [0], [0], [1], [0, 0, 1, 1], [], []>} : vector<8x32xbf16>, vector<32x32xbf16>, vector<8x32xf32> -> vector<8x32xf32>
    %c0_23 = arith.constant 0 : index
    %c0_24 = arith.constant 0 : index
    %25 = vector.load %arg9[%c0_23, %c0_24] : memref<1x32xf32, #tpu.memory_space<vmem>>, vector<1x32xf32>
    %26 = vector.broadcast %25 : vector<1x32xf32> to vector<8x32xf32>
    %27 = arith.addf %24, %26 : vector<8x32xf32>
    %cst_25 = arith.constant 0.000000e+00 : f32
    %28 = vector.broadcast %cst_25 : f32 to vector<8x32xf32>
    %29 = vector.extract_strided_slice %21 {offsets = [0, 0], sizes = [8, 8], strides = [1, 1]} : vector<8x64xf32> to vector<8x8xf32>
    %30 = arith.truncf %29 : vector<8x8xf32> to vector<8x8xbf16>
    %31 = vector.extract_strided_slice %21 {offsets = [0, 32], sizes = [8, 8], strides = [1, 1]} : vector<8x64xf32> to vector<8x8xf32>
    %32 = arith.truncf %31 : vector<8x8xf32> to vector<8x8xbf16>
    %33 = vector.extract_strided_slice %27 {offsets = [0, 0], sizes = [8, 8], strides = [1, 1]} : vector<8x32xf32> to vector<8x8xf32>
    %34 = arith.truncf %33 : vector<8x8xf32> to vector<8x8xbf16>
    %cst_26 = arith.constant dense<0.000000e+00> : vector<8x8xf32>
    %35 = tpu.matmul %30, %32, %cst_26 {dimension_numbers = #tpu.dot_dimension_numbers<[1], [1], [0], [0], [0, 0, 1, 0], [], []>} : vector<8x8xbf16>, vector<8x8xbf16>, vector<8x8xf32> -> vector<8x8xf32>
    %36 = vector.broadcast %5 : vector<1x8xf32> to vector<8x8xf32>
    %37 = arith.addf %35, %36 : vector<8x8xf32>
    %cst_27 = arith.constant dense<0xFF800000> : vector<8xf32>
    %38 = vector.multi_reduction <maximumf>, %37, %cst_27 [1] : vector<8x8xf32> to vector<8xf32>
    %39 = vector.shape_cast %38 : vector<8xf32> to vector<8x1xf32>
    %40 = vector.broadcast %39 : vector<8x1xf32> to vector<8x8xf32>
    %41 = arith.subf %37, %40 : vector<8x8xf32>
    %42 = math.exp %41 : vector<8x8xf32>
    %cst_28 = arith.constant dense<0.000000e+00> : vector<8xf32>
    %43 = vector.multi_reduction <add>, %42, %cst_28 [1] : vector<8x8xf32> to vector<8xf32>
    %44 = vector.shape_cast %43 : vector<8xf32> to vector<8x1xf32>
    %45 = tpu.reciprocal %44 {approx = true} : vector<8x1xf32> -> vector<8x1xf32>
    %46 = vector.broadcast %45 : vector<8x1xf32> to vector<8x8xf32>
    %47 = arith.mulf %42, %46 : vector<8x8xf32>
    %48 = arith.truncf %47 : vector<8x8xf32> to vector<8x8xbf16>
    %cst_29 = arith.constant dense<0.000000e+00> : vector<8x8xf32>
    %49 = tpu.matmul %48, %34, %cst_29 {dimension_numbers = #tpu.dot_dimension_numbers<[1], [0], [0], [1], [0, 0, 1, 1], [], []>} : vector<8x8xbf16>, vector<8x8xbf16>, vector<8x8xf32> -> vector<8x8xf32>
    %50 = arith.truncf %49 : vector<8x8xf32> to vector<8x8xbf16>
    %c0_30 = arith.constant 0 : index
    %c0_31 = arith.constant 0 : index
    %51 = vector.load %arg10[%c0_30, %c0_31] : memref<32x32xbf16, #tpu.memory_space<vmem>>, vector<8x32xbf16>
    %cst_32 = arith.constant dense<0.000000e+00> : vector<8x32xf32>
    %52 = tpu.matmul %50, %51, %cst_32 {dimension_numbers = #tpu.dot_dimension_numbers<[1], [0], [0], [1], [0, 0, 1, 1], [], []>} : vector<8x8xbf16>, vector<8x32xbf16>, vector<8x32xf32> -> vector<8x32xf32>
    %53 = arith.addf %28, %52 : vector<8x32xf32>
    %54 = vector.extract_strided_slice %21 {offsets = [0, 8], sizes = [8, 8], strides = [1, 1]} : vector<8x64xf32> to vector<8x8xf32>
    %55 = arith.truncf %54 : vector<8x8xf32> to vector<8x8xbf16>
    %56 = vector.extract_strided_slice %21 {offsets = [0, 40], sizes = [8, 8], strides = [1, 1]} : vector<8x64xf32> to vector<8x8xf32>
    %57 = arith.truncf %56 : vector<8x8xf32> to vector<8x8xbf16>
    %58 = vector.extract_strided_slice %27 {offsets = [0, 8], sizes = [8, 8], strides = [1, 1]} : vector<8x32xf32> to vector<8x8xf32>
    %59 = arith.truncf %58 : vector<8x8xf32> to vector<8x8xbf16>
    %cst_33 = arith.constant dense<0.000000e+00> : vector<8x8xf32>
    %60 = tpu.matmul %55, %57, %cst_33 {dimension_numbers = #tpu.dot_dimension_numbers<[1], [1], [0], [0], [0, 0, 1, 0], [], []>} : vector<8x8xbf16>, vector<8x8xbf16>, vector<8x8xf32> -> vector<8x8xf32>
    %61 = vector.broadcast %5 : vector<1x8xf32> to vector<8x8xf32>
    %62 = arith.addf %60, %61 : vector<8x8xf32>
    %cst_34 = arith.constant dense<0xFF800000> : vector<8xf32>
    %63 = vector.multi_reduction <maximumf>, %62, %cst_34 [1] : vector<8x8xf32> to vector<8xf32>
    %64 = vector.shape_cast %63 : vector<8xf32> to vector<8x1xf32>
    %65 = vector.broadcast %64 : vector<8x1xf32> to vector<8x8xf32>
    %66 = arith.subf %62, %65 : vector<8x8xf32>
    %67 = math.exp %66 : vector<8x8xf32>
    %cst_35 = arith.constant dense<0.000000e+00> : vector<8xf32>
    %68 = vector.multi_reduction <add>, %67, %cst_35 [1] : vector<8x8xf32> to vector<8xf32>
    %69 = vector.shape_cast %68 : vector<8xf32> to vector<8x1xf32>
    %70 = tpu.reciprocal %69 {approx = true} : vector<8x1xf32> -> vector<8x1xf32>
    %71 = vector.broadcast %70 : vector<8x1xf32> to vector<8x8xf32>
    %72 = arith.mulf %67, %71 : vector<8x8xf32>
    %73 = arith.truncf %72 : vector<8x8xf32> to vector<8x8xbf16>
    %cst_36 = arith.constant dense<0.000000e+00> : vector<8x8xf32>
    %74 = tpu.matmul %73, %59, %cst_36 {dimension_numbers = #tpu.dot_dimension_numbers<[1], [0], [0], [1], [0, 0, 1, 1], [], []>} : vector<8x8xbf16>, vector<8x8xbf16>, vector<8x8xf32> -> vector<8x8xf32>
    %75 = arith.truncf %74 : vector<8x8xf32> to vector<8x8xbf16>
    %c8 = arith.constant 8 : index
    %c0_37 = arith.constant 0 : index
    %76 = vector.load %arg10[%c8, %c0_37] : memref<32x32xbf16, #tpu.memory_space<vmem>>, vector<8x32xbf16>
    %cst_38 = arith.constant dense<0.000000e+00> : vector<8x32xf32>
    %77 = tpu.matmul %75, %76, %cst_38 {dimension_numbers = #tpu.dot_dimension_numbers<[1], [0], [0], [1], [0, 0, 1, 1], [], []>} : vector<8x8xbf16>, vector<8x32xbf16>, vector<8x32xf32> -> vector<8x32xf32>
    %78 = arith.addf %53, %77 : vector<8x32xf32>
    %79 = vector.extract_strided_slice %21 {offsets = [0, 16], sizes = [8, 8], strides = [1, 1]} : vector<8x64xf32> to vector<8x8xf32>
    %80 = arith.truncf %79 : vector<8x8xf32> to vector<8x8xbf16>
    %81 = vector.extract_strided_slice %21 {offsets = [0, 48], sizes = [8, 8], strides = [1, 1]} : vector<8x64xf32> to vector<8x8xf32>
    %82 = arith.truncf %81 : vector<8x8xf32> to vector<8x8xbf16>
    %83 = vector.extract_strided_slice %27 {offsets = [0, 16], sizes = [8, 8], strides = [1, 1]} : vector<8x32xf32> to vector<8x8xf32>
    %84 = arith.truncf %83 : vector<8x8xf32> to vector<8x8xbf16>
    %cst_39 = arith.constant dense<0.000000e+00> : vector<8x8xf32>
    %85 = tpu.matmul %80, %82, %cst_39 {dimension_numbers = #tpu.dot_dimension_numbers<[1], [1], [0], [0], [0, 0, 1, 0], [], []>} : vector<8x8xbf16>, vector<8x8xbf16>, vector<8x8xf32> -> vector<8x8xf32>
    %86 = vector.broadcast %5 : vector<1x8xf32> to vector<8x8xf32>
    %87 = arith.addf %85, %86 : vector<8x8xf32>
    %cst_40 = arith.constant dense<0xFF800000> : vector<8xf32>
    %88 = vector.multi_reduction <maximumf>, %87, %cst_40 [1] : vector<8x8xf32> to vector<8xf32>
    %89 = vector.shape_cast %88 : vector<8xf32> to vector<8x1xf32>
    %90 = vector.broadcast %89 : vector<8x1xf32> to vector<8x8xf32>
    %91 = arith.subf %87, %90 : vector<8x8xf32>
    %92 = math.exp %91 : vector<8x8xf32>
    %cst_41 = arith.constant dense<0.000000e+00> : vector<8xf32>
    %93 = vector.multi_reduction <add>, %92, %cst_41 [1] : vector<8x8xf32> to vector<8xf32>
    %94 = vector.shape_cast %93 : vector<8xf32> to vector<8x1xf32>
    %95 = tpu.reciprocal %94 {approx = true} : vector<8x1xf32> -> vector<8x1xf32>
    %96 = vector.broadcast %95 : vector<8x1xf32> to vector<8x8xf32>
    %97 = arith.mulf %92, %96 : vector<8x8xf32>
    %98 = arith.truncf %97 : vector<8x8xf32> to vector<8x8xbf16>
    %cst_42 = arith.constant dense<0.000000e+00> : vector<8x8xf32>
    %99 = tpu.matmul %98, %84, %cst_42 {dimension_numbers = #tpu.dot_dimension_numbers<[1], [0], [0], [1], [0, 0, 1, 1], [], []>} : vector<8x8xbf16>, vector<8x8xbf16>, vector<8x8xf32> -> vector<8x8xf32>
    %100 = arith.truncf %99 : vector<8x8xf32> to vector<8x8xbf16>
    %c16 = arith.constant 16 : index
    %c0_43 = arith.constant 0 : index
    %101 = vector.load %arg10[%c16, %c0_43] : memref<32x32xbf16, #tpu.memory_space<vmem>>, vector<8x32xbf16>
    %cst_44 = arith.constant dense<0.000000e+00> : vector<8x32xf32>
    %102 = tpu.matmul %100, %101, %cst_44 {dimension_numbers = #tpu.dot_dimension_numbers<[1], [0], [0], [1], [0, 0, 1, 1], [], []>} : vector<8x8xbf16>, vector<8x32xbf16>, vector<8x32xf32> -> vector<8x32xf32>
    %103 = arith.addf %78, %102 : vector<8x32xf32>
    %104 = vector.extract_strided_slice %21 {offsets = [0, 24], sizes = [8, 8], strides = [1, 1]} : vector<8x64xf32> to vector<8x8xf32>
    %105 = arith.truncf %104 : vector<8x8xf32> to vector<8x8xbf16>
    %106 = vector.extract_strided_slice %21 {offsets = [0, 56], sizes = [8, 8], strides = [1, 1]} : vector<8x64xf32> to vector<8x8xf32>
    %107 = arith.truncf %106 : vector<8x8xf32> to vector<8x8xbf16>
    %108 = vector.extract_strided_slice %27 {offsets = [0, 24], sizes = [8, 8], strides = [1, 1]} : vector<8x32xf32> to vector<8x8xf32>
    %109 = arith.truncf %108 : vector<8x8xf32> to vector<8x8xbf16>
    %cst_45 = arith.constant dense<0.000000e+00> : vector<8x8xf32>
    %110 = tpu.matmul %105, %107, %cst_45 {dimension_numbers = #tpu.dot_dimension_numbers<[1], [1], [0], [0], [0, 0, 1, 0], [], []>} : vector<8x8xbf16>, vector<8x8xbf16>, vector<8x8xf32> -> vector<8x8xf32>
    %111 = vector.broadcast %5 : vector<1x8xf32> to vector<8x8xf32>
    %112 = arith.addf %110, %111 : vector<8x8xf32>
    %cst_46 = arith.constant dense<0xFF800000> : vector<8xf32>
    %113 = vector.multi_reduction <maximumf>, %112, %cst_46 [1] : vector<8x8xf32> to vector<8xf32>
    %114 = vector.shape_cast %113 : vector<8xf32> to vector<8x1xf32>
    %115 = vector.broadcast %114 : vector<8x1xf32> to vector<8x8xf32>
    %116 = arith.subf %112, %115 : vector<8x8xf32>
    %117 = math.exp %116 : vector<8x8xf32>
    %cst_47 = arith.constant dense<0.000000e+00> : vector<8xf32>
    %118 = vector.multi_reduction <add>, %117, %cst_47 [1] : vector<8x8xf32> to vector<8xf32>
    %119 = vector.shape_cast %118 : vector<8xf32> to vector<8x1xf32>
    %120 = tpu.reciprocal %119 {approx = true} : vector<8x1xf32> -> vector<8x1xf32>
    %121 = vector.broadcast %120 : vector<8x1xf32> to vector<8x8xf32>
    %122 = arith.mulf %117, %121 : vector<8x8xf32>
    %123 = arith.truncf %122 : vector<8x8xf32> to vector<8x8xbf16>
    %cst_48 = arith.constant dense<0.000000e+00> : vector<8x8xf32>
    %124 = tpu.matmul %123, %109, %cst_48 {dimension_numbers = #tpu.dot_dimension_numbers<[1], [0], [0], [1], [0, 0, 1, 1], [], []>} : vector<8x8xbf16>, vector<8x8xbf16>, vector<8x8xf32> -> vector<8x8xf32>
    %125 = arith.truncf %124 : vector<8x8xf32> to vector<8x8xbf16>
    %c24 = arith.constant 24 : index
    %c0_49 = arith.constant 0 : index
    %126 = vector.load %arg10[%c24, %c0_49] : memref<32x32xbf16, #tpu.memory_space<vmem>>, vector<8x32xbf16>
    %cst_50 = arith.constant dense<0.000000e+00> : vector<8x32xf32>
    %127 = tpu.matmul %125, %126, %cst_50 {dimension_numbers = #tpu.dot_dimension_numbers<[1], [0], [0], [1], [0, 0, 1, 1], [], []>} : vector<8x8xbf16>, vector<8x32xbf16>, vector<8x32xf32> -> vector<8x32xf32>
    %128 = arith.addf %103, %127 : vector<8x32xf32>
    %c0_51 = arith.constant 0 : index
    %c0_52 = arith.constant 0 : index
    %129 = vector.load %arg11[%c0_51, %c0_52] : memref<1x32xf32, #tpu.memory_space<vmem>>, vector<1x32xf32>
    %130 = vector.broadcast %129 : vector<1x32xf32> to vector<8x32xf32>
    %131 = arith.addf %128, %130 : vector<8x32xf32>
    %132 = vector.broadcast %10 : vector<8x1xf32> to vector<8x32xf32>
    %133 = arith.mulf %1, %132 : vector<8x32xf32>
    %134 = arith.addf %133, %131 : vector<8x32xf32>
    %135 = vector.extract_strided_slice %14 {offsets = [0, 0], sizes = [1, 32], strides = [1, 1]} : vector<6x32xf32> to vector<1x32xf32>
    %136 = vector.extract_strided_slice %14 {offsets = [1, 0], sizes = [1, 32], strides = [1, 1]} : vector<6x32xf32> to vector<1x32xf32>
    %cst_53 = arith.constant dense<0.000000e+00> : vector<8xf32>
    %137 = vector.multi_reduction <add>, %134, %cst_53 [1] : vector<8x32xf32> to vector<8xf32>
    %138 = vector.shape_cast %137 : vector<8xf32> to vector<8x1xf32>
    %cst_54 = arith.constant 3.200000e+01 : f32
    %139 = vector.broadcast %cst_54 : f32 to vector<8x1xf32>
    %140 = arith.divf %138, %139 : vector<8x1xf32>
    %141 = vector.broadcast %140 : vector<8x1xf32> to vector<8x32xf32>
    %142 = arith.subf %134, %141 : vector<8x32xf32>
    %143 = arith.mulf %142, %142 : vector<8x32xf32>
    %cst_55 = arith.constant dense<0.000000e+00> : vector<8xf32>
    %144 = vector.multi_reduction <add>, %143, %cst_55 [1] : vector<8x32xf32> to vector<8xf32>
    %145 = vector.shape_cast %144 : vector<8xf32> to vector<8x1xf32>
    %cst_56 = arith.constant 3.200000e+01 : f32
    %146 = vector.broadcast %cst_56 : f32 to vector<8x1xf32>
    %147 = arith.divf %145, %146 : vector<8x1xf32>
    %cst_57 = arith.constant 9.99999974E-6 : f32
    %148 = vector.broadcast %cst_57 : f32 to vector<8x1xf32>
    %149 = arith.addf %147, %148 : vector<8x1xf32>
    %150 = math.rsqrt %149 : vector<8x1xf32>
    %151 = vector.broadcast %150 : vector<8x1xf32> to vector<8x32xf32>
    %152 = arith.mulf %142, %151 : vector<8x32xf32>
    %153 = vector.broadcast %135 : vector<1x32xf32> to vector<8x32xf32>
    %154 = arith.mulf %152, %153 : vector<8x32xf32>
    %155 = vector.broadcast %136 : vector<1x32xf32> to vector<8x32xf32>
    %156 = arith.addf %154, %155 : vector<8x32xf32>
    %157 = arith.addf %156, %3 : vector<8x32xf32>
    %c0_58 = arith.constant 0 : index
    %c0_59 = arith.constant 0 : index
    %158 = vector.load %arg13[%c0_58, %c0_59] : memref<32x32xbf16, #tpu.memory_space<vmem>>, vector<32x32xbf16>
    %159 = arith.truncf %9 : vector<256x32xf32> to vector<256x32xbf16>
    %cst_60 = arith.constant dense<0.000000e+00> : vector<256x32xf32>
    %160 = tpu.matmul %159, %158, %cst_60 {dimension_numbers = #tpu.dot_dimension_numbers<[1], [0], [0], [1], [0, 0, 1, 1], [], []>} : vector<256x32xbf16>, vector<32x32xbf16>, vector<256x32xf32> -> vector<256x32xf32>
    %c0_61 = arith.constant 0 : index
    %c0_62 = arith.constant 0 : index
    %161 = vector.load %arg14[%c0_61, %c0_62] : memref<1x32xf32, #tpu.memory_space<vmem>>, vector<1x32xf32>
    %162 = vector.broadcast %161 : vector<1x32xf32> to vector<256x32xf32>
    %163 = arith.addf %160, %162 : vector<256x32xf32>
    %c0_63 = arith.constant 0 : index
    %c0_64 = arith.constant 0 : index
    %164 = vector.load %arg15[%c0_63, %c0_64] : memref<32x48xbf16, #tpu.memory_space<vmem>>, vector<32x48xbf16>
    %165 = arith.truncf %157 : vector<8x32xf32> to vector<8x32xbf16>
    %cst_65 = arith.constant dense<0.000000e+00> : vector<8x48xf32>
    %166 = tpu.matmul %165, %164, %cst_65 {dimension_numbers = #tpu.dot_dimension_numbers<[1], [0], [0], [1], [0, 0, 1, 1], [], []>} : vector<8x32xbf16>, vector<32x48xbf16>, vector<8x48xf32> -> vector<8x48xf32>
    %c0_66 = arith.constant 0 : index
    %c0_67 = arith.constant 0 : index
    %167 = vector.load %arg16[%c0_66, %c0_67] : memref<1x48xf32, #tpu.memory_space<vmem>>, vector<1x48xf32>
    %168 = vector.broadcast %167 : vector<1x48xf32> to vector<8x48xf32>
    %169 = arith.addf %166, %168 : vector<8x48xf32>
    %170 = vector.extract_strided_slice %169 {offsets = [0, 0], sizes = [8, 16], strides = [1, 1]} : vector<8x48xf32> to vector<8x16xf32>
    %171 = vector.extract_strided_slice %169 {offsets = [0, 16], sizes = [8, 16], strides = [1, 1]} : vector<8x48xf32> to vector<8x16xf32>
    %172 = vector.extract_strided_slice %169 {offsets = [0, 32], sizes = [8, 16], strides = [1, 1]} : vector<8x48xf32> to vector<8x16xf32>
    %cst_68 = arith.constant 6.250000e-02 : f32
    %173 = vector.broadcast %cst_68 : f32 to vector<8x16xf32>
    %174 = arith.mulf %170, %173 : vector<8x16xf32>
    %175 = vector.broadcast %12 : vector<8x1xf32> to vector<8x16xf32>
    %176 = arith.addf %175, %174 : vector<8x16xf32>
    %cst_69 = arith.constant 1.600000e+01 : f32
    %177 = vector.broadcast %cst_69 : f32 to vector<8x16xf32>
    %178 = arith.mulf %176, %177 : vector<8x16xf32>
    %cst_70 = arith.constant 5.000000e-01 : f32
    %179 = vector.broadcast %cst_70 : f32 to vector<8x16xf32>
    %180 = arith.subf %178, %179 : vector<8x16xf32>
    %cst_71 = arith.constant 6.250000e-02 : f32
    %181 = vector.broadcast %cst_71 : f32 to vector<8x16xf32>
    %182 = arith.mulf %171, %181 : vector<8x16xf32>
    %183 = vector.broadcast %13 : vector<8x1xf32> to vector<8x16xf32>
    %184 = arith.addf %183, %182 : vector<8x16xf32>
    %cst_72 = arith.constant 1.600000e+01 : f32
    %185 = vector.broadcast %cst_72 : f32 to vector<8x16xf32>
    %186 = arith.mulf %184, %185 : vector<8x16xf32>
    %cst_73 = arith.constant 5.000000e-01 : f32
    %187 = vector.broadcast %cst_73 : f32 to vector<8x16xf32>
    %188 = arith.subf %186, %187 : vector<8x16xf32>
    %189 = math.floor %180 : vector<8x16xf32>
    %190 = math.floor %188 : vector<8x16xf32>
    %191 = arith.subf %180, %189 : vector<8x16xf32>
    %192 = arith.subf %188, %190 : vector<8x16xf32>
    %193 = arith.fptosi %189 : vector<8x16xf32> to vector<8x16xi32>
    %194 = arith.fptosi %190 : vector<8x16xf32> to vector<8x16xi32>
    %c0_i32 = arith.constant 0 : i32
    %195 = vector.broadcast %c0_i32 : i32 to vector<8x16xi32>
    %196 = arith.cmpi sge, %193, %195 : vector<8x16xi32>
    %c15_i32 = arith.constant 15 : i32
    %197 = vector.broadcast %c15_i32 : i32 to vector<8x16xi32>
    %198 = arith.cmpi sle, %193, %197 : vector<8x16xi32>
    %199 = arith.andi %196, %198 : vector<8x16xi1>
    %c-1_i32 = arith.constant -1 : i32
    %200 = vector.broadcast %c-1_i32 : i32 to vector<8x16xi32>
    %201 = arith.cmpi sge, %193, %200 : vector<8x16xi32>
    %c14_i32 = arith.constant 14 : i32
    %202 = vector.broadcast %c14_i32 : i32 to vector<8x16xi32>
    %203 = arith.cmpi sle, %193, %202 : vector<8x16xi32>
    %204 = arith.andi %201, %203 : vector<8x16xi1>
    %c0_i32_74 = arith.constant 0 : i32
    %205 = vector.broadcast %c0_i32_74 : i32 to vector<8x16xi32>
    %206 = arith.cmpi sge, %194, %205 : vector<8x16xi32>
    %c15_i32_75 = arith.constant 15 : i32
    %207 = vector.broadcast %c15_i32_75 : i32 to vector<8x16xi32>
    %208 = arith.cmpi sle, %194, %207 : vector<8x16xi32>
    %209 = arith.andi %206, %208 : vector<8x16xi1>
    %c-1_i32_76 = arith.constant -1 : i32
    %210 = vector.broadcast %c-1_i32_76 : i32 to vector<8x16xi32>
    %211 = arith.cmpi sge, %194, %210 : vector<8x16xi32>
    %c14_i32_77 = arith.constant 14 : i32
    %212 = vector.broadcast %c14_i32_77 : i32 to vector<8x16xi32>
    %213 = arith.cmpi sle, %194, %212 : vector<8x16xi32>
    %214 = arith.andi %211, %213 : vector<8x16xi1>
    %215 = arith.andi %199, %209 : vector<8x16xi1>
    %cst_78 = arith.constant 1.000000e+00 : f32
    %216 = vector.broadcast %cst_78 : f32 to vector<8x16xf32>
    %217 = arith.subf %216, %191 : vector<8x16xf32>
    %cst_79 = arith.constant 1.000000e+00 : f32
    %218 = vector.broadcast %cst_79 : f32 to vector<8x16xf32>
    %219 = arith.subf %218, %192 : vector<8x16xf32>
    %220 = arith.mulf %217, %219 : vector<8x16xf32>
    %cst_80 = arith.constant 0.000000e+00 : f32
    %221 = vector.broadcast %cst_80 : f32 to vector<8x16xf32>
    %222 = arith.select %215, %220, %221 : vector<8x16xi1>, vector<8x16xf32>
    %223 = arith.andi %204, %209 : vector<8x16xi1>
    %cst_81 = arith.constant 1.000000e+00 : f32
    %224 = vector.broadcast %cst_81 : f32 to vector<8x16xf32>
    %225 = arith.subf %224, %192 : vector<8x16xf32>
    %226 = arith.mulf %191, %225 : vector<8x16xf32>
    %cst_82 = arith.constant 0.000000e+00 : f32
    %227 = vector.broadcast %cst_82 : f32 to vector<8x16xf32>
    %228 = arith.select %223, %226, %227 : vector<8x16xi1>, vector<8x16xf32>
    %229 = arith.andi %199, %214 : vector<8x16xi1>
    %cst_83 = arith.constant 1.000000e+00 : f32
    %230 = vector.broadcast %cst_83 : f32 to vector<8x16xf32>
    %231 = arith.subf %230, %191 : vector<8x16xf32>
    %232 = arith.mulf %231, %192 : vector<8x16xf32>
    %cst_84 = arith.constant 0.000000e+00 : f32
    %233 = vector.broadcast %cst_84 : f32 to vector<8x16xf32>
    %234 = arith.select %229, %232, %233 : vector<8x16xi1>, vector<8x16xf32>
    %235 = arith.andi %204, %214 : vector<8x16xi1>
    %236 = arith.mulf %191, %192 : vector<8x16xf32>
    %cst_85 = arith.constant 0.000000e+00 : f32
    %237 = vector.broadcast %cst_85 : f32 to vector<8x16xf32>
    %238 = arith.select %235, %236, %237 : vector<8x16xi1>, vector<8x16xf32>
    %c16_i32 = arith.constant 16 : i32
    %239 = vector.broadcast %c16_i32 : i32 to vector<8x16xi32>
    %240 = arith.muli %194, %239 : vector<8x16xi32>
    %241 = arith.addi %240, %193 : vector<8x16xi32>
    %242 = tpu.iota {dimensions = array<i32: 1>} : vector<8x256xi32>
    %cst_86 = arith.constant 0.000000e+00 : f32
    %243 = vector.broadcast %cst_86 : f32 to vector<8x32xf32>
    %244 = vector.extract_strided_slice %172 {offsets = [0, 0], sizes = [8, 4], strides = [1, 1]} : vector<8x16xf32> to vector<8x4xf32>
    %cst_87 = arith.constant dense<0xFF800000> : vector<8xf32>
    %245 = vector.multi_reduction <maximumf>, %244, %cst_87 [1] : vector<8x4xf32> to vector<8xf32>
    %246 = vector.shape_cast %245 : vector<8xf32> to vector<8x1xf32>
    %247 = vector.broadcast %246 : vector<8x1xf32> to vector<8x4xf32>
    %248 = arith.subf %244, %247 : vector<8x4xf32>
    %249 = math.exp %248 : vector<8x4xf32>
    %cst_88 = arith.constant dense<0.000000e+00> : vector<8xf32>
    %250 = vector.multi_reduction <add>, %249, %cst_88 [1] : vector<8x4xf32> to vector<8xf32>
    %251 = vector.shape_cast %250 : vector<8xf32> to vector<8x1xf32>
    %252 = tpu.reciprocal %251 {approx = true} : vector<8x1xf32> -> vector<8x1xf32>
    %253 = vector.broadcast %252 : vector<8x1xf32> to vector<8x4xf32>
    %254 = arith.mulf %249, %253 : vector<8x4xf32>
    %cst_89 = arith.constant 0.000000e+00 : f32
    %255 = vector.broadcast %cst_89 : f32 to vector<8x256xf32>
    %256 = vector.extract_strided_slice %254 {offsets = [0, 0], sizes = [8, 1], strides = [1, 1]} : vector<8x4xf32> to vector<8x1xf32>
    %257 = vector.extract_strided_slice %222 {offsets = [0, 0], sizes = [8, 1], strides = [1, 1]} : vector<8x16xf32> to vector<8x1xf32>
    %258 = arith.mulf %257, %256 : vector<8x1xf32>
    %259 = vector.extract_strided_slice %228 {offsets = [0, 0], sizes = [8, 1], strides = [1, 1]} : vector<8x16xf32> to vector<8x1xf32>
    %260 = arith.mulf %259, %256 : vector<8x1xf32>
    %261 = vector.extract_strided_slice %234 {offsets = [0, 0], sizes = [8, 1], strides = [1, 1]} : vector<8x16xf32> to vector<8x1xf32>
    %262 = arith.mulf %261, %256 : vector<8x1xf32>
    %263 = vector.extract_strided_slice %238 {offsets = [0, 0], sizes = [8, 1], strides = [1, 1]} : vector<8x16xf32> to vector<8x1xf32>
    %264 = arith.mulf %263, %256 : vector<8x1xf32>
    %265 = vector.extract_strided_slice %241 {offsets = [0, 0], sizes = [8, 1], strides = [1, 1]} : vector<8x16xi32> to vector<8x1xi32>
    %266 = vector.broadcast %265 : vector<8x1xi32> to vector<8x256xi32>
    %267 = arith.subi %242, %266 : vector<8x256xi32>
    %c0_i32_90 = arith.constant 0 : i32
    %268 = vector.broadcast %c0_i32_90 : i32 to vector<8x256xi32>
    %269 = arith.cmpi eq, %267, %268 : vector<8x256xi32>
    %c1_i32 = arith.constant 1 : i32
    %270 = vector.broadcast %c1_i32 : i32 to vector<8x256xi32>
    %271 = arith.cmpi eq, %267, %270 : vector<8x256xi32>
    %c16_i32_91 = arith.constant 16 : i32
    %272 = vector.broadcast %c16_i32_91 : i32 to vector<8x256xi32>
    %273 = arith.cmpi eq, %267, %272 : vector<8x256xi32>
    %c17_i32 = arith.constant 17 : i32
    %274 = vector.broadcast %c17_i32 : i32 to vector<8x256xi32>
    %275 = arith.cmpi eq, %267, %274 : vector<8x256xi32>
    %cst_92 = arith.constant 0.000000e+00 : f32
    %276 = vector.shape_cast %264 : vector<8x1xf32> to vector<8x1xf32>
    %277 = vector.broadcast %276 : vector<8x1xf32> to vector<8x256xf32>
    %278 = vector.broadcast %cst_92 : f32 to vector<8x256xf32>
    %279 = arith.select %275, %277, %278 : vector<8x256xi1>, vector<8x256xf32>
    %280 = vector.shape_cast %262 : vector<8x1xf32> to vector<8x1xf32>
    %281 = vector.broadcast %280 : vector<8x1xf32> to vector<8x256xf32>
    %282 = arith.select %273, %281, %279 : vector<8x256xi1>, vector<8x256xf32>
    %283 = vector.shape_cast %260 : vector<8x1xf32> to vector<8x1xf32>
    %284 = vector.broadcast %283 : vector<8x1xf32> to vector<8x256xf32>
    %285 = arith.select %271, %284, %282 : vector<8x256xi1>, vector<8x256xf32>
    %286 = vector.shape_cast %258 : vector<8x1xf32> to vector<8x1xf32>
    %287 = vector.broadcast %286 : vector<8x1xf32> to vector<8x256xf32>
    %288 = arith.select %269, %287, %285 : vector<8x256xi1>, vector<8x256xf32>
    %289 = arith.addf %255, %288 : vector<8x256xf32>
    %290 = vector.extract_strided_slice %254 {offsets = [0, 1], sizes = [8, 1], strides = [1, 1]} : vector<8x4xf32> to vector<8x1xf32>
    %291 = vector.extract_strided_slice %222 {offsets = [0, 1], sizes = [8, 1], strides = [1, 1]} : vector<8x16xf32> to vector<8x1xf32>
    %292 = arith.mulf %291, %290 : vector<8x1xf32>
    %293 = vector.extract_strided_slice %228 {offsets = [0, 1], sizes = [8, 1], strides = [1, 1]} : vector<8x16xf32> to vector<8x1xf32>
    %294 = arith.mulf %293, %290 : vector<8x1xf32>
    %295 = vector.extract_strided_slice %234 {offsets = [0, 1], sizes = [8, 1], strides = [1, 1]} : vector<8x16xf32> to vector<8x1xf32>
    %296 = arith.mulf %295, %290 : vector<8x1xf32>
    %297 = vector.extract_strided_slice %238 {offsets = [0, 1], sizes = [8, 1], strides = [1, 1]} : vector<8x16xf32> to vector<8x1xf32>
    %298 = arith.mulf %297, %290 : vector<8x1xf32>
    %299 = vector.extract_strided_slice %241 {offsets = [0, 1], sizes = [8, 1], strides = [1, 1]} : vector<8x16xi32> to vector<8x1xi32>
    %300 = vector.broadcast %299 : vector<8x1xi32> to vector<8x256xi32>
    %301 = arith.subi %242, %300 : vector<8x256xi32>
    %c0_i32_93 = arith.constant 0 : i32
    %302 = vector.broadcast %c0_i32_93 : i32 to vector<8x256xi32>
    %303 = arith.cmpi eq, %301, %302 : vector<8x256xi32>
    %c1_i32_94 = arith.constant 1 : i32
    %304 = vector.broadcast %c1_i32_94 : i32 to vector<8x256xi32>
    %305 = arith.cmpi eq, %301, %304 : vector<8x256xi32>
    %c16_i32_95 = arith.constant 16 : i32
    %306 = vector.broadcast %c16_i32_95 : i32 to vector<8x256xi32>
    %307 = arith.cmpi eq, %301, %306 : vector<8x256xi32>
    %c17_i32_96 = arith.constant 17 : i32
    %308 = vector.broadcast %c17_i32_96 : i32 to vector<8x256xi32>
    %309 = arith.cmpi eq, %301, %308 : vector<8x256xi32>
    %cst_97 = arith.constant 0.000000e+00 : f32
    %310 = vector.shape_cast %298 : vector<8x1xf32> to vector<8x1xf32>
    %311 = vector.broadcast %310 : vector<8x1xf32> to vector<8x256xf32>
    %312 = vector.broadcast %cst_97 : f32 to vector<8x256xf32>
    %313 = arith.select %309, %311, %312 : vector<8x256xi1>, vector<8x256xf32>
    %314 = vector.shape_cast %296 : vector<8x1xf32> to vector<8x1xf32>
    %315 = vector.broadcast %314 : vector<8x1xf32> to vector<8x256xf32>
    %316 = arith.select %307, %315, %313 : vector<8x256xi1>, vector<8x256xf32>
    %317 = vector.shape_cast %294 : vector<8x1xf32> to vector<8x1xf32>
    %318 = vector.broadcast %317 : vector<8x1xf32> to vector<8x256xf32>
    %319 = arith.select %305, %318, %316 : vector<8x256xi1>, vector<8x256xf32>
    %320 = vector.shape_cast %292 : vector<8x1xf32> to vector<8x1xf32>
    %321 = vector.broadcast %320 : vector<8x1xf32> to vector<8x256xf32>
    %322 = arith.select %303, %321, %319 : vector<8x256xi1>, vector<8x256xf32>
    %323 = arith.addf %289, %322 : vector<8x256xf32>
    %324 = vector.extract_strided_slice %254 {offsets = [0, 2], sizes = [8, 1], strides = [1, 1]} : vector<8x4xf32> to vector<8x1xf32>
    %325 = vector.extract_strided_slice %222 {offsets = [0, 2], sizes = [8, 1], strides = [1, 1]} : vector<8x16xf32> to vector<8x1xf32>
    %326 = arith.mulf %325, %324 : vector<8x1xf32>
    %327 = vector.extract_strided_slice %228 {offsets = [0, 2], sizes = [8, 1], strides = [1, 1]} : vector<8x16xf32> to vector<8x1xf32>
    %328 = arith.mulf %327, %324 : vector<8x1xf32>
    %329 = vector.extract_strided_slice %234 {offsets = [0, 2], sizes = [8, 1], strides = [1, 1]} : vector<8x16xf32> to vector<8x1xf32>
    %330 = arith.mulf %329, %324 : vector<8x1xf32>
    %331 = vector.extract_strided_slice %238 {offsets = [0, 2], sizes = [8, 1], strides = [1, 1]} : vector<8x16xf32> to vector<8x1xf32>
    %332 = arith.mulf %331, %324 : vector<8x1xf32>
    %333 = vector.extract_strided_slice %241 {offsets = [0, 2], sizes = [8, 1], strides = [1, 1]} : vector<8x16xi32> to vector<8x1xi32>
    %334 = vector.broadcast %333 : vector<8x1xi32> to vector<8x256xi32>
    %335 = arith.subi %242, %334 : vector<8x256xi32>
    %c0_i32_98 = arith.constant 0 : i32
    %336 = vector.broadcast %c0_i32_98 : i32 to vector<8x256xi32>
    %337 = arith.cmpi eq, %335, %336 : vector<8x256xi32>
    %c1_i32_99 = arith.constant 1 : i32
    %338 = vector.broadcast %c1_i32_99 : i32 to vector<8x256xi32>
    %339 = arith.cmpi eq, %335, %338 : vector<8x256xi32>
    %c16_i32_100 = arith.constant 16 : i32
    %340 = vector.broadcast %c16_i32_100 : i32 to vector<8x256xi32>
    %341 = arith.cmpi eq, %335, %340 : vector<8x256xi32>
    %c17_i32_101 = arith.constant 17 : i32
    %342 = vector.broadcast %c17_i32_101 : i32 to vector<8x256xi32>
    %343 = arith.cmpi eq, %335, %342 : vector<8x256xi32>
    %cst_102 = arith.constant 0.000000e+00 : f32
    %344 = vector.shape_cast %332 : vector<8x1xf32> to vector<8x1xf32>
    %345 = vector.broadcast %344 : vector<8x1xf32> to vector<8x256xf32>
    %346 = vector.broadcast %cst_102 : f32 to vector<8x256xf32>
    %347 = arith.select %343, %345, %346 : vector<8x256xi1>, vector<8x256xf32>
    %348 = vector.shape_cast %330 : vector<8x1xf32> to vector<8x1xf32>
    %349 = vector.broadcast %348 : vector<8x1xf32> to vector<8x256xf32>
    %350 = arith.select %341, %349, %347 : vector<8x256xi1>, vector<8x256xf32>
    %351 = vector.shape_cast %328 : vector<8x1xf32> to vector<8x1xf32>
    %352 = vector.broadcast %351 : vector<8x1xf32> to vector<8x256xf32>
    %353 = arith.select %339, %352, %350 : vector<8x256xi1>, vector<8x256xf32>
    %354 = vector.shape_cast %326 : vector<8x1xf32> to vector<8x1xf32>
    %355 = vector.broadcast %354 : vector<8x1xf32> to vector<8x256xf32>
    %356 = arith.select %337, %355, %353 : vector<8x256xi1>, vector<8x256xf32>
    %357 = arith.addf %323, %356 : vector<8x256xf32>
    %358 = vector.extract_strided_slice %254 {offsets = [0, 3], sizes = [8, 1], strides = [1, 1]} : vector<8x4xf32> to vector<8x1xf32>
    %359 = vector.extract_strided_slice %222 {offsets = [0, 3], sizes = [8, 1], strides = [1, 1]} : vector<8x16xf32> to vector<8x1xf32>
    %360 = arith.mulf %359, %358 : vector<8x1xf32>
    %361 = vector.extract_strided_slice %228 {offsets = [0, 3], sizes = [8, 1], strides = [1, 1]} : vector<8x16xf32> to vector<8x1xf32>
    %362 = arith.mulf %361, %358 : vector<8x1xf32>
    %363 = vector.extract_strided_slice %234 {offsets = [0, 3], sizes = [8, 1], strides = [1, 1]} : vector<8x16xf32> to vector<8x1xf32>
    %364 = arith.mulf %363, %358 : vector<8x1xf32>
    %365 = vector.extract_strided_slice %238 {offsets = [0, 3], sizes = [8, 1], strides = [1, 1]} : vector<8x16xf32> to vector<8x1xf32>
    %366 = arith.mulf %365, %358 : vector<8x1xf32>
    %367 = vector.extract_strided_slice %241 {offsets = [0, 3], sizes = [8, 1], strides = [1, 1]} : vector<8x16xi32> to vector<8x1xi32>
    %368 = vector.broadcast %367 : vector<8x1xi32> to vector<8x256xi32>
    %369 = arith.subi %242, %368 : vector<8x256xi32>
    %c0_i32_103 = arith.constant 0 : i32
    %370 = vector.broadcast %c0_i32_103 : i32 to vector<8x256xi32>
    %371 = arith.cmpi eq, %369, %370 : vector<8x256xi32>
    %c1_i32_104 = arith.constant 1 : i32
    %372 = vector.broadcast %c1_i32_104 : i32 to vector<8x256xi32>
    %373 = arith.cmpi eq, %369, %372 : vector<8x256xi32>
    %c16_i32_105 = arith.constant 16 : i32
    %374 = vector.broadcast %c16_i32_105 : i32 to vector<8x256xi32>
    %375 = arith.cmpi eq, %369, %374 : vector<8x256xi32>
    %c17_i32_106 = arith.constant 17 : i32
    %376 = vector.broadcast %c17_i32_106 : i32 to vector<8x256xi32>
    %377 = arith.cmpi eq, %369, %376 : vector<8x256xi32>
    %cst_107 = arith.constant 0.000000e+00 : f32
    %378 = vector.shape_cast %366 : vector<8x1xf32> to vector<8x1xf32>
    %379 = vector.broadcast %378 : vector<8x1xf32> to vector<8x256xf32>
    %380 = vector.broadcast %cst_107 : f32 to vector<8x256xf32>
    %381 = arith.select %377, %379, %380 : vector<8x256xi1>, vector<8x256xf32>
    %382 = vector.shape_cast %364 : vector<8x1xf32> to vector<8x1xf32>
    %383 = vector.broadcast %382 : vector<8x1xf32> to vector<8x256xf32>
    %384 = arith.select %375, %383, %381 : vector<8x256xi1>, vector<8x256xf32>
    %385 = vector.shape_cast %362 : vector<8x1xf32> to vector<8x1xf32>
    %386 = vector.broadcast %385 : vector<8x1xf32> to vector<8x256xf32>
    %387 = arith.select %373, %386, %384 : vector<8x256xi1>, vector<8x256xf32>
    %388 = vector.shape_cast %360 : vector<8x1xf32> to vector<8x1xf32>
    %389 = vector.broadcast %388 : vector<8x1xf32> to vector<8x256xf32>
    %390 = arith.select %371, %389, %387 : vector<8x256xi1>, vector<8x256xf32>
    %391 = arith.addf %357, %390 : vector<8x256xf32>
    %392 = arith.truncf %391 : vector<8x256xf32> to vector<8x256xbf16>
    %393 = vector.extract_strided_slice %163 {offsets = [0, 0], sizes = [256, 8], strides = [1, 1]} : vector<256x32xf32> to vector<256x8xf32>
    %394 = arith.truncf %393 : vector<256x8xf32> to vector<256x8xbf16>
    %cst_108 = arith.constant dense<0.000000e+00> : vector<8x8xf32>
    %395 = tpu.matmul %392, %394, %cst_108 {dimension_numbers = #tpu.dot_dimension_numbers<[1], [0], [0], [1], [0, 0, 1, 1], [], []>} : vector<8x256xbf16>, vector<256x8xbf16>, vector<8x8xf32> -> vector<8x8xf32>
    %396 = arith.truncf %395 : vector<8x8xf32> to vector<8x8xbf16>
    %c0_109 = arith.constant 0 : index
    %c0_110 = arith.constant 0 : index
    %397 = vector.load %arg17[%c0_109, %c0_110] : memref<32x32xbf16, #tpu.memory_space<vmem>>, vector<8x32xbf16>
    %cst_111 = arith.constant dense<0.000000e+00> : vector<8x32xf32>
    %398 = tpu.matmul %396, %397, %cst_111 {dimension_numbers = #tpu.dot_dimension_numbers<[1], [0], [0], [1], [0, 0, 1, 1], [], []>} : vector<8x8xbf16>, vector<8x32xbf16>, vector<8x32xf32> -> vector<8x32xf32>
    %399 = arith.addf %243, %398 : vector<8x32xf32>
    %400 = vector.extract_strided_slice %172 {offsets = [0, 4], sizes = [8, 4], strides = [1, 1]} : vector<8x16xf32> to vector<8x4xf32>
    %cst_112 = arith.constant dense<0xFF800000> : vector<8xf32>
    %401 = vector.multi_reduction <maximumf>, %400, %cst_112 [1] : vector<8x4xf32> to vector<8xf32>
    %402 = vector.shape_cast %401 : vector<8xf32> to vector<8x1xf32>
    %403 = vector.broadcast %402 : vector<8x1xf32> to vector<8x4xf32>
    %404 = arith.subf %400, %403 : vector<8x4xf32>
    %405 = math.exp %404 : vector<8x4xf32>
    %cst_113 = arith.constant dense<0.000000e+00> : vector<8xf32>
    %406 = vector.multi_reduction <add>, %405, %cst_113 [1] : vector<8x4xf32> to vector<8xf32>
    %407 = vector.shape_cast %406 : vector<8xf32> to vector<8x1xf32>
    %408 = tpu.reciprocal %407 {approx = true} : vector<8x1xf32> -> vector<8x1xf32>
    %409 = vector.broadcast %408 : vector<8x1xf32> to vector<8x4xf32>
    %410 = arith.mulf %405, %409 : vector<8x4xf32>
    %cst_114 = arith.constant 0.000000e+00 : f32
    %411 = vector.broadcast %cst_114 : f32 to vector<8x256xf32>
    %412 = vector.extract_strided_slice %410 {offsets = [0, 0], sizes = [8, 1], strides = [1, 1]} : vector<8x4xf32> to vector<8x1xf32>
    %413 = vector.extract_strided_slice %222 {offsets = [0, 4], sizes = [8, 1], strides = [1, 1]} : vector<8x16xf32> to vector<8x1xf32>
    %414 = arith.mulf %413, %412 : vector<8x1xf32>
    %415 = vector.extract_strided_slice %228 {offsets = [0, 4], sizes = [8, 1], strides = [1, 1]} : vector<8x16xf32> to vector<8x1xf32>
    %416 = arith.mulf %415, %412 : vector<8x1xf32>
    %417 = vector.extract_strided_slice %234 {offsets = [0, 4], sizes = [8, 1], strides = [1, 1]} : vector<8x16xf32> to vector<8x1xf32>
    %418 = arith.mulf %417, %412 : vector<8x1xf32>
    %419 = vector.extract_strided_slice %238 {offsets = [0, 4], sizes = [8, 1], strides = [1, 1]} : vector<8x16xf32> to vector<8x1xf32>
    %420 = arith.mulf %419, %412 : vector<8x1xf32>
    %421 = vector.extract_strided_slice %241 {offsets = [0, 4], sizes = [8, 1], strides = [1, 1]} : vector<8x16xi32> to vector<8x1xi32>
    %422 = vector.broadcast %421 : vector<8x1xi32> to vector<8x256xi32>
    %423 = arith.subi %242, %422 : vector<8x256xi32>
    %c0_i32_115 = arith.constant 0 : i32
    %424 = vector.broadcast %c0_i32_115 : i32 to vector<8x256xi32>
    %425 = arith.cmpi eq, %423, %424 : vector<8x256xi32>
    %c1_i32_116 = arith.constant 1 : i32
    %426 = vector.broadcast %c1_i32_116 : i32 to vector<8x256xi32>
    %427 = arith.cmpi eq, %423, %426 : vector<8x256xi32>
    %c16_i32_117 = arith.constant 16 : i32
    %428 = vector.broadcast %c16_i32_117 : i32 to vector<8x256xi32>
    %429 = arith.cmpi eq, %423, %428 : vector<8x256xi32>
    %c17_i32_118 = arith.constant 17 : i32
    %430 = vector.broadcast %c17_i32_118 : i32 to vector<8x256xi32>
    %431 = arith.cmpi eq, %423, %430 : vector<8x256xi32>
    %cst_119 = arith.constant 0.000000e+00 : f32
    %432 = vector.shape_cast %420 : vector<8x1xf32> to vector<8x1xf32>
    %433 = vector.broadcast %432 : vector<8x1xf32> to vector<8x256xf32>
    %434 = vector.broadcast %cst_119 : f32 to vector<8x256xf32>
    %435 = arith.select %431, %433, %434 : vector<8x256xi1>, vector<8x256xf32>
    %436 = vector.shape_cast %418 : vector<8x1xf32> to vector<8x1xf32>
    %437 = vector.broadcast %436 : vector<8x1xf32> to vector<8x256xf32>
    %438 = arith.select %429, %437, %435 : vector<8x256xi1>, vector<8x256xf32>
    %439 = vector.shape_cast %416 : vector<8x1xf32> to vector<8x1xf32>
    %440 = vector.broadcast %439 : vector<8x1xf32> to vector<8x256xf32>
    %441 = arith.select %427, %440, %438 : vector<8x256xi1>, vector<8x256xf32>
    %442 = vector.shape_cast %414 : vector<8x1xf32> to vector<8x1xf32>
    %443 = vector.broadcast %442 : vector<8x1xf32> to vector<8x256xf32>
    %444 = arith.select %425, %443, %441 : vector<8x256xi1>, vector<8x256xf32>
    %445 = arith.addf %411, %444 : vector<8x256xf32>
    %446 = vector.extract_strided_slice %410 {offsets = [0, 1], sizes = [8, 1], strides = [1, 1]} : vector<8x4xf32> to vector<8x1xf32>
    %447 = vector.extract_strided_slice %222 {offsets = [0, 5], sizes = [8, 1], strides = [1, 1]} : vector<8x16xf32> to vector<8x1xf32>
    %448 = arith.mulf %447, %446 : vector<8x1xf32>
    %449 = vector.extract_strided_slice %228 {offsets = [0, 5], sizes = [8, 1], strides = [1, 1]} : vector<8x16xf32> to vector<8x1xf32>
    %450 = arith.mulf %449, %446 : vector<8x1xf32>
    %451 = vector.extract_strided_slice %234 {offsets = [0, 5], sizes = [8, 1], strides = [1, 1]} : vector<8x16xf32> to vector<8x1xf32>
    %452 = arith.mulf %451, %446 : vector<8x1xf32>
    %453 = vector.extract_strided_slice %238 {offsets = [0, 5], sizes = [8, 1], strides = [1, 1]} : vector<8x16xf32> to vector<8x1xf32>
    %454 = arith.mulf %453, %446 : vector<8x1xf32>
    %455 = vector.extract_strided_slice %241 {offsets = [0, 5], sizes = [8, 1], strides = [1, 1]} : vector<8x16xi32> to vector<8x1xi32>
    %456 = vector.broadcast %455 : vector<8x1xi32> to vector<8x256xi32>
    %457 = arith.subi %242, %456 : vector<8x256xi32>
    %c0_i32_120 = arith.constant 0 : i32
    %458 = vector.broadcast %c0_i32_120 : i32 to vector<8x256xi32>
    %459 = arith.cmpi eq, %457, %458 : vector<8x256xi32>
    %c1_i32_121 = arith.constant 1 : i32
    %460 = vector.broadcast %c1_i32_121 : i32 to vector<8x256xi32>
    %461 = arith.cmpi eq, %457, %460 : vector<8x256xi32>
    %c16_i32_122 = arith.constant 16 : i32
    %462 = vector.broadcast %c16_i32_122 : i32 to vector<8x256xi32>
    %463 = arith.cmpi eq, %457, %462 : vector<8x256xi32>
    %c17_i32_123 = arith.constant 17 : i32
    %464 = vector.broadcast %c17_i32_123 : i32 to vector<8x256xi32>
    %465 = arith.cmpi eq, %457, %464 : vector<8x256xi32>
    %cst_124 = arith.constant 0.000000e+00 : f32
    %466 = vector.shape_cast %454 : vector<8x1xf32> to vector<8x1xf32>
    %467 = vector.broadcast %466 : vector<8x1xf32> to vector<8x256xf32>
    %468 = vector.broadcast %cst_124 : f32 to vector<8x256xf32>
    %469 = arith.select %465, %467, %468 : vector<8x256xi1>, vector<8x256xf32>
    %470 = vector.shape_cast %452 : vector<8x1xf32> to vector<8x1xf32>
    %471 = vector.broadcast %470 : vector<8x1xf32> to vector<8x256xf32>
    %472 = arith.select %463, %471, %469 : vector<8x256xi1>, vector<8x256xf32>
    %473 = vector.shape_cast %450 : vector<8x1xf32> to vector<8x1xf32>
    %474 = vector.broadcast %473 : vector<8x1xf32> to vector<8x256xf32>
    %475 = arith.select %461, %474, %472 : vector<8x256xi1>, vector<8x256xf32>
    %476 = vector.shape_cast %448 : vector<8x1xf32> to vector<8x1xf32>
    %477 = vector.broadcast %476 : vector<8x1xf32> to vector<8x256xf32>
    %478 = arith.select %459, %477, %475 : vector<8x256xi1>, vector<8x256xf32>
    %479 = arith.addf %445, %478 : vector<8x256xf32>
    %480 = vector.extract_strided_slice %410 {offsets = [0, 2], sizes = [8, 1], strides = [1, 1]} : vector<8x4xf32> to vector<8x1xf32>
    %481 = vector.extract_strided_slice %222 {offsets = [0, 6], sizes = [8, 1], strides = [1, 1]} : vector<8x16xf32> to vector<8x1xf32>
    %482 = arith.mulf %481, %480 : vector<8x1xf32>
    %483 = vector.extract_strided_slice %228 {offsets = [0, 6], sizes = [8, 1], strides = [1, 1]} : vector<8x16xf32> to vector<8x1xf32>
    %484 = arith.mulf %483, %480 : vector<8x1xf32>
    %485 = vector.extract_strided_slice %234 {offsets = [0, 6], sizes = [8, 1], strides = [1, 1]} : vector<8x16xf32> to vector<8x1xf32>
    %486 = arith.mulf %485, %480 : vector<8x1xf32>
    %487 = vector.extract_strided_slice %238 {offsets = [0, 6], sizes = [8, 1], strides = [1, 1]} : vector<8x16xf32> to vector<8x1xf32>
    %488 = arith.mulf %487, %480 : vector<8x1xf32>
    %489 = vector.extract_strided_slice %241 {offsets = [0, 6], sizes = [8, 1], strides = [1, 1]} : vector<8x16xi32> to vector<8x1xi32>
    %490 = vector.broadcast %489 : vector<8x1xi32> to vector<8x256xi32>
    %491 = arith.subi %242, %490 : vector<8x256xi32>
    %c0_i32_125 = arith.constant 0 : i32
    %492 = vector.broadcast %c0_i32_125 : i32 to vector<8x256xi32>
    %493 = arith.cmpi eq, %491, %492 : vector<8x256xi32>
    %c1_i32_126 = arith.constant 1 : i32
    %494 = vector.broadcast %c1_i32_126 : i32 to vector<8x256xi32>
    %495 = arith.cmpi eq, %491, %494 : vector<8x256xi32>
    %c16_i32_127 = arith.constant 16 : i32
    %496 = vector.broadcast %c16_i32_127 : i32 to vector<8x256xi32>
    %497 = arith.cmpi eq, %491, %496 : vector<8x256xi32>
    %c17_i32_128 = arith.constant 17 : i32
    %498 = vector.broadcast %c17_i32_128 : i32 to vector<8x256xi32>
    %499 = arith.cmpi eq, %491, %498 : vector<8x256xi32>
    %cst_129 = arith.constant 0.000000e+00 : f32
    %500 = vector.shape_cast %488 : vector<8x1xf32> to vector<8x1xf32>
    %501 = vector.broadcast %500 : vector<8x1xf32> to vector<8x256xf32>
    %502 = vector.broadcast %cst_129 : f32 to vector<8x256xf32>
    %503 = arith.select %499, %501, %502 : vector<8x256xi1>, vector<8x256xf32>
    %504 = vector.shape_cast %486 : vector<8x1xf32> to vector<8x1xf32>
    %505 = vector.broadcast %504 : vector<8x1xf32> to vector<8x256xf32>
    %506 = arith.select %497, %505, %503 : vector<8x256xi1>, vector<8x256xf32>
    %507 = vector.shape_cast %484 : vector<8x1xf32> to vector<8x1xf32>
    %508 = vector.broadcast %507 : vector<8x1xf32> to vector<8x256xf32>
    %509 = arith.select %495, %508, %506 : vector<8x256xi1>, vector<8x256xf32>
    %510 = vector.shape_cast %482 : vector<8x1xf32> to vector<8x1xf32>
    %511 = vector.broadcast %510 : vector<8x1xf32> to vector<8x256xf32>
    %512 = arith.select %493, %511, %509 : vector<8x256xi1>, vector<8x256xf32>
    %513 = arith.addf %479, %512 : vector<8x256xf32>
    %514 = vector.extract_strided_slice %410 {offsets = [0, 3], sizes = [8, 1], strides = [1, 1]} : vector<8x4xf32> to vector<8x1xf32>
    %515 = vector.extract_strided_slice %222 {offsets = [0, 7], sizes = [8, 1], strides = [1, 1]} : vector<8x16xf32> to vector<8x1xf32>
    %516 = arith.mulf %515, %514 : vector<8x1xf32>
    %517 = vector.extract_strided_slice %228 {offsets = [0, 7], sizes = [8, 1], strides = [1, 1]} : vector<8x16xf32> to vector<8x1xf32>
    %518 = arith.mulf %517, %514 : vector<8x1xf32>
    %519 = vector.extract_strided_slice %234 {offsets = [0, 7], sizes = [8, 1], strides = [1, 1]} : vector<8x16xf32> to vector<8x1xf32>
    %520 = arith.mulf %519, %514 : vector<8x1xf32>
    %521 = vector.extract_strided_slice %238 {offsets = [0, 7], sizes = [8, 1], strides = [1, 1]} : vector<8x16xf32> to vector<8x1xf32>
    %522 = arith.mulf %521, %514 : vector<8x1xf32>
    %523 = vector.extract_strided_slice %241 {offsets = [0, 7], sizes = [8, 1], strides = [1, 1]} : vector<8x16xi32> to vector<8x1xi32>
    %524 = vector.broadcast %523 : vector<8x1xi32> to vector<8x256xi32>
    %525 = arith.subi %242, %524 : vector<8x256xi32>
    %c0_i32_130 = arith.constant 0 : i32
    %526 = vector.broadcast %c0_i32_130 : i32 to vector<8x256xi32>
    %527 = arith.cmpi eq, %525, %526 : vector<8x256xi32>
    %c1_i32_131 = arith.constant 1 : i32
    %528 = vector.broadcast %c1_i32_131 : i32 to vector<8x256xi32>
    %529 = arith.cmpi eq, %525, %528 : vector<8x256xi32>
    %c16_i32_132 = arith.constant 16 : i32
    %530 = vector.broadcast %c16_i32_132 : i32 to vector<8x256xi32>
    %531 = arith.cmpi eq, %525, %530 : vector<8x256xi32>
    %c17_i32_133 = arith.constant 17 : i32
    %532 = vector.broadcast %c17_i32_133 : i32 to vector<8x256xi32>
    %533 = arith.cmpi eq, %525, %532 : vector<8x256xi32>
    %cst_134 = arith.constant 0.000000e+00 : f32
    %534 = vector.shape_cast %522 : vector<8x1xf32> to vector<8x1xf32>
    %535 = vector.broadcast %534 : vector<8x1xf32> to vector<8x256xf32>
    %536 = vector.broadcast %cst_134 : f32 to vector<8x256xf32>
    %537 = arith.select %533, %535, %536 : vector<8x256xi1>, vector<8x256xf32>
    %538 = vector.shape_cast %520 : vector<8x1xf32> to vector<8x1xf32>
    %539 = vector.broadcast %538 : vector<8x1xf32> to vector<8x256xf32>
    %540 = arith.select %531, %539, %537 : vector<8x256xi1>, vector<8x256xf32>
    %541 = vector.shape_cast %518 : vector<8x1xf32> to vector<8x1xf32>
    %542 = vector.broadcast %541 : vector<8x1xf32> to vector<8x256xf32>
    %543 = arith.select %529, %542, %540 : vector<8x256xi1>, vector<8x256xf32>
    %544 = vector.shape_cast %516 : vector<8x1xf32> to vector<8x1xf32>
    %545 = vector.broadcast %544 : vector<8x1xf32> to vector<8x256xf32>
    %546 = arith.select %527, %545, %543 : vector<8x256xi1>, vector<8x256xf32>
    %547 = arith.addf %513, %546 : vector<8x256xf32>
    %548 = arith.truncf %547 : vector<8x256xf32> to vector<8x256xbf16>
    %549 = vector.extract_strided_slice %163 {offsets = [0, 8], sizes = [256, 8], strides = [1, 1]} : vector<256x32xf32> to vector<256x8xf32>
    %550 = arith.truncf %549 : vector<256x8xf32> to vector<256x8xbf16>
    %cst_135 = arith.constant dense<0.000000e+00> : vector<8x8xf32>
    %551 = tpu.matmul %548, %550, %cst_135 {dimension_numbers = #tpu.dot_dimension_numbers<[1], [0], [0], [1], [0, 0, 1, 1], [], []>} : vector<8x256xbf16>, vector<256x8xbf16>, vector<8x8xf32> -> vector<8x8xf32>
    %552 = arith.truncf %551 : vector<8x8xf32> to vector<8x8xbf16>
    %c8_136 = arith.constant 8 : index
    %c0_137 = arith.constant 0 : index
    %553 = vector.load %arg17[%c8_136, %c0_137] : memref<32x32xbf16, #tpu.memory_space<vmem>>, vector<8x32xbf16>
    %cst_138 = arith.constant dense<0.000000e+00> : vector<8x32xf32>
    %554 = tpu.matmul %552, %553, %cst_138 {dimension_numbers = #tpu.dot_dimension_numbers<[1], [0], [0], [1], [0, 0, 1, 1], [], []>} : vector<8x8xbf16>, vector<8x32xbf16>, vector<8x32xf32> -> vector<8x32xf32>
    %555 = arith.addf %399, %554 : vector<8x32xf32>
    %556 = vector.extract_strided_slice %172 {offsets = [0, 8], sizes = [8, 4], strides = [1, 1]} : vector<8x16xf32> to vector<8x4xf32>
    %cst_139 = arith.constant dense<0xFF800000> : vector<8xf32>
    %557 = vector.multi_reduction <maximumf>, %556, %cst_139 [1] : vector<8x4xf32> to vector<8xf32>
    %558 = vector.shape_cast %557 : vector<8xf32> to vector<8x1xf32>
    %559 = vector.broadcast %558 : vector<8x1xf32> to vector<8x4xf32>
    %560 = arith.subf %556, %559 : vector<8x4xf32>
    %561 = math.exp %560 : vector<8x4xf32>
    %cst_140 = arith.constant dense<0.000000e+00> : vector<8xf32>
    %562 = vector.multi_reduction <add>, %561, %cst_140 [1] : vector<8x4xf32> to vector<8xf32>
    %563 = vector.shape_cast %562 : vector<8xf32> to vector<8x1xf32>
    %564 = tpu.reciprocal %563 {approx = true} : vector<8x1xf32> -> vector<8x1xf32>
    %565 = vector.broadcast %564 : vector<8x1xf32> to vector<8x4xf32>
    %566 = arith.mulf %561, %565 : vector<8x4xf32>
    %cst_141 = arith.constant 0.000000e+00 : f32
    %567 = vector.broadcast %cst_141 : f32 to vector<8x256xf32>
    %568 = vector.extract_strided_slice %566 {offsets = [0, 0], sizes = [8, 1], strides = [1, 1]} : vector<8x4xf32> to vector<8x1xf32>
    %569 = vector.extract_strided_slice %222 {offsets = [0, 8], sizes = [8, 1], strides = [1, 1]} : vector<8x16xf32> to vector<8x1xf32>
    %570 = arith.mulf %569, %568 : vector<8x1xf32>
    %571 = vector.extract_strided_slice %228 {offsets = [0, 8], sizes = [8, 1], strides = [1, 1]} : vector<8x16xf32> to vector<8x1xf32>
    %572 = arith.mulf %571, %568 : vector<8x1xf32>
    %573 = vector.extract_strided_slice %234 {offsets = [0, 8], sizes = [8, 1], strides = [1, 1]} : vector<8x16xf32> to vector<8x1xf32>
    %574 = arith.mulf %573, %568 : vector<8x1xf32>
    %575 = vector.extract_strided_slice %238 {offsets = [0, 8], sizes = [8, 1], strides = [1, 1]} : vector<8x16xf32> to vector<8x1xf32>
    %576 = arith.mulf %575, %568 : vector<8x1xf32>
    %577 = vector.extract_strided_slice %241 {offsets = [0, 8], sizes = [8, 1], strides = [1, 1]} : vector<8x16xi32> to vector<8x1xi32>
    %578 = vector.broadcast %577 : vector<8x1xi32> to vector<8x256xi32>
    %579 = arith.subi %242, %578 : vector<8x256xi32>
    %c0_i32_142 = arith.constant 0 : i32
    %580 = vector.broadcast %c0_i32_142 : i32 to vector<8x256xi32>
    %581 = arith.cmpi eq, %579, %580 : vector<8x256xi32>
    %c1_i32_143 = arith.constant 1 : i32
    %582 = vector.broadcast %c1_i32_143 : i32 to vector<8x256xi32>
    %583 = arith.cmpi eq, %579, %582 : vector<8x256xi32>
    %c16_i32_144 = arith.constant 16 : i32
    %584 = vector.broadcast %c16_i32_144 : i32 to vector<8x256xi32>
    %585 = arith.cmpi eq, %579, %584 : vector<8x256xi32>
    %c17_i32_145 = arith.constant 17 : i32
    %586 = vector.broadcast %c17_i32_145 : i32 to vector<8x256xi32>
    %587 = arith.cmpi eq, %579, %586 : vector<8x256xi32>
    %cst_146 = arith.constant 0.000000e+00 : f32
    %588 = vector.shape_cast %576 : vector<8x1xf32> to vector<8x1xf32>
    %589 = vector.broadcast %588 : vector<8x1xf32> to vector<8x256xf32>
    %590 = vector.broadcast %cst_146 : f32 to vector<8x256xf32>
    %591 = arith.select %587, %589, %590 : vector<8x256xi1>, vector<8x256xf32>
    %592 = vector.shape_cast %574 : vector<8x1xf32> to vector<8x1xf32>
    %593 = vector.broadcast %592 : vector<8x1xf32> to vector<8x256xf32>
    %594 = arith.select %585, %593, %591 : vector<8x256xi1>, vector<8x256xf32>
    %595 = vector.shape_cast %572 : vector<8x1xf32> to vector<8x1xf32>
    %596 = vector.broadcast %595 : vector<8x1xf32> to vector<8x256xf32>
    %597 = arith.select %583, %596, %594 : vector<8x256xi1>, vector<8x256xf32>
    %598 = vector.shape_cast %570 : vector<8x1xf32> to vector<8x1xf32>
    %599 = vector.broadcast %598 : vector<8x1xf32> to vector<8x256xf32>
    %600 = arith.select %581, %599, %597 : vector<8x256xi1>, vector<8x256xf32>
    %601 = arith.addf %567, %600 : vector<8x256xf32>
    %602 = vector.extract_strided_slice %566 {offsets = [0, 1], sizes = [8, 1], strides = [1, 1]} : vector<8x4xf32> to vector<8x1xf32>
    %603 = vector.extract_strided_slice %222 {offsets = [0, 9], sizes = [8, 1], strides = [1, 1]} : vector<8x16xf32> to vector<8x1xf32>
    %604 = arith.mulf %603, %602 : vector<8x1xf32>
    %605 = vector.extract_strided_slice %228 {offsets = [0, 9], sizes = [8, 1], strides = [1, 1]} : vector<8x16xf32> to vector<8x1xf32>
    %606 = arith.mulf %605, %602 : vector<8x1xf32>
    %607 = vector.extract_strided_slice %234 {offsets = [0, 9], sizes = [8, 1], strides = [1, 1]} : vector<8x16xf32> to vector<8x1xf32>
    %608 = arith.mulf %607, %602 : vector<8x1xf32>
    %609 = vector.extract_strided_slice %238 {offsets = [0, 9], sizes = [8, 1], strides = [1, 1]} : vector<8x16xf32> to vector<8x1xf32>
    %610 = arith.mulf %609, %602 : vector<8x1xf32>
    %611 = vector.extract_strided_slice %241 {offsets = [0, 9], sizes = [8, 1], strides = [1, 1]} : vector<8x16xi32> to vector<8x1xi32>
    %612 = vector.broadcast %611 : vector<8x1xi32> to vector<8x256xi32>
    %613 = arith.subi %242, %612 : vector<8x256xi32>
    %c0_i32_147 = arith.constant 0 : i32
    %614 = vector.broadcast %c0_i32_147 : i32 to vector<8x256xi32>
    %615 = arith.cmpi eq, %613, %614 : vector<8x256xi32>
    %c1_i32_148 = arith.constant 1 : i32
    %616 = vector.broadcast %c1_i32_148 : i32 to vector<8x256xi32>
    %617 = arith.cmpi eq, %613, %616 : vector<8x256xi32>
    %c16_i32_149 = arith.constant 16 : i32
    %618 = vector.broadcast %c16_i32_149 : i32 to vector<8x256xi32>
    %619 = arith.cmpi eq, %613, %618 : vector<8x256xi32>
    %c17_i32_150 = arith.constant 17 : i32
    %620 = vector.broadcast %c17_i32_150 : i32 to vector<8x256xi32>
    %621 = arith.cmpi eq, %613, %620 : vector<8x256xi32>
    %cst_151 = arith.constant 0.000000e+00 : f32
    %622 = vector.shape_cast %610 : vector<8x1xf32> to vector<8x1xf32>
    %623 = vector.broadcast %622 : vector<8x1xf32> to vector<8x256xf32>
    %624 = vector.broadcast %cst_151 : f32 to vector<8x256xf32>
    %625 = arith.select %621, %623, %624 : vector<8x256xi1>, vector<8x256xf32>
    %626 = vector.shape_cast %608 : vector<8x1xf32> to vector<8x1xf32>
    %627 = vector.broadcast %626 : vector<8x1xf32> to vector<8x256xf32>
    %628 = arith.select %619, %627, %625 : vector<8x256xi1>, vector<8x256xf32>
    %629 = vector.shape_cast %606 : vector<8x1xf32> to vector<8x1xf32>
    %630 = vector.broadcast %629 : vector<8x1xf32> to vector<8x256xf32>
    %631 = arith.select %617, %630, %628 : vector<8x256xi1>, vector<8x256xf32>
    %632 = vector.shape_cast %604 : vector<8x1xf32> to vector<8x1xf32>
    %633 = vector.broadcast %632 : vector<8x1xf32> to vector<8x256xf32>
    %634 = arith.select %615, %633, %631 : vector<8x256xi1>, vector<8x256xf32>
    %635 = arith.addf %601, %634 : vector<8x256xf32>
    %636 = vector.extract_strided_slice %566 {offsets = [0, 2], sizes = [8, 1], strides = [1, 1]} : vector<8x4xf32> to vector<8x1xf32>
    %637 = vector.extract_strided_slice %222 {offsets = [0, 10], sizes = [8, 1], strides = [1, 1]} : vector<8x16xf32> to vector<8x1xf32>
    %638 = arith.mulf %637, %636 : vector<8x1xf32>
    %639 = vector.extract_strided_slice %228 {offsets = [0, 10], sizes = [8, 1], strides = [1, 1]} : vector<8x16xf32> to vector<8x1xf32>
    %640 = arith.mulf %639, %636 : vector<8x1xf32>
    %641 = vector.extract_strided_slice %234 {offsets = [0, 10], sizes = [8, 1], strides = [1, 1]} : vector<8x16xf32> to vector<8x1xf32>
    %642 = arith.mulf %641, %636 : vector<8x1xf32>
    %643 = vector.extract_strided_slice %238 {offsets = [0, 10], sizes = [8, 1], strides = [1, 1]} : vector<8x16xf32> to vector<8x1xf32>
    %644 = arith.mulf %643, %636 : vector<8x1xf32>
    %645 = vector.extract_strided_slice %241 {offsets = [0, 10], sizes = [8, 1], strides = [1, 1]} : vector<8x16xi32> to vector<8x1xi32>
    %646 = vector.broadcast %645 : vector<8x1xi32> to vector<8x256xi32>
    %647 = arith.subi %242, %646 : vector<8x256xi32>
    %c0_i32_152 = arith.constant 0 : i32
    %648 = vector.broadcast %c0_i32_152 : i32 to vector<8x256xi32>
    %649 = arith.cmpi eq, %647, %648 : vector<8x256xi32>
    %c1_i32_153 = arith.constant 1 : i32
    %650 = vector.broadcast %c1_i32_153 : i32 to vector<8x256xi32>
    %651 = arith.cmpi eq, %647, %650 : vector<8x256xi32>
    %c16_i32_154 = arith.constant 16 : i32
    %652 = vector.broadcast %c16_i32_154 : i32 to vector<8x256xi32>
    %653 = arith.cmpi eq, %647, %652 : vector<8x256xi32>
    %c17_i32_155 = arith.constant 17 : i32
    %654 = vector.broadcast %c17_i32_155 : i32 to vector<8x256xi32>
    %655 = arith.cmpi eq, %647, %654 : vector<8x256xi32>
    %cst_156 = arith.constant 0.000000e+00 : f32
    %656 = vector.shape_cast %644 : vector<8x1xf32> to vector<8x1xf32>
    %657 = vector.broadcast %656 : vector<8x1xf32> to vector<8x256xf32>
    %658 = vector.broadcast %cst_156 : f32 to vector<8x256xf32>
    %659 = arith.select %655, %657, %658 : vector<8x256xi1>, vector<8x256xf32>
    %660 = vector.shape_cast %642 : vector<8x1xf32> to vector<8x1xf32>
    %661 = vector.broadcast %660 : vector<8x1xf32> to vector<8x256xf32>
    %662 = arith.select %653, %661, %659 : vector<8x256xi1>, vector<8x256xf32>
    %663 = vector.shape_cast %640 : vector<8x1xf32> to vector<8x1xf32>
    %664 = vector.broadcast %663 : vector<8x1xf32> to vector<8x256xf32>
    %665 = arith.select %651, %664, %662 : vector<8x256xi1>, vector<8x256xf32>
    %666 = vector.shape_cast %638 : vector<8x1xf32> to vector<8x1xf32>
    %667 = vector.broadcast %666 : vector<8x1xf32> to vector<8x256xf32>
    %668 = arith.select %649, %667, %665 : vector<8x256xi1>, vector<8x256xf32>
    %669 = arith.addf %635, %668 : vector<8x256xf32>
    %670 = vector.extract_strided_slice %566 {offsets = [0, 3], sizes = [8, 1], strides = [1, 1]} : vector<8x4xf32> to vector<8x1xf32>
    %671 = vector.extract_strided_slice %222 {offsets = [0, 11], sizes = [8, 1], strides = [1, 1]} : vector<8x16xf32> to vector<8x1xf32>
    %672 = arith.mulf %671, %670 : vector<8x1xf32>
    %673 = vector.extract_strided_slice %228 {offsets = [0, 11], sizes = [8, 1], strides = [1, 1]} : vector<8x16xf32> to vector<8x1xf32>
    %674 = arith.mulf %673, %670 : vector<8x1xf32>
    %675 = vector.extract_strided_slice %234 {offsets = [0, 11], sizes = [8, 1], strides = [1, 1]} : vector<8x16xf32> to vector<8x1xf32>
    %676 = arith.mulf %675, %670 : vector<8x1xf32>
    %677 = vector.extract_strided_slice %238 {offsets = [0, 11], sizes = [8, 1], strides = [1, 1]} : vector<8x16xf32> to vector<8x1xf32>
    %678 = arith.mulf %677, %670 : vector<8x1xf32>
    %679 = vector.extract_strided_slice %241 {offsets = [0, 11], sizes = [8, 1], strides = [1, 1]} : vector<8x16xi32> to vector<8x1xi32>
    %680 = vector.broadcast %679 : vector<8x1xi32> to vector<8x256xi32>
    %681 = arith.subi %242, %680 : vector<8x256xi32>
    %c0_i32_157 = arith.constant 0 : i32
    %682 = vector.broadcast %c0_i32_157 : i32 to vector<8x256xi32>
    %683 = arith.cmpi eq, %681, %682 : vector<8x256xi32>
    %c1_i32_158 = arith.constant 1 : i32
    %684 = vector.broadcast %c1_i32_158 : i32 to vector<8x256xi32>
    %685 = arith.cmpi eq, %681, %684 : vector<8x256xi32>
    %c16_i32_159 = arith.constant 16 : i32
    %686 = vector.broadcast %c16_i32_159 : i32 to vector<8x256xi32>
    %687 = arith.cmpi eq, %681, %686 : vector<8x256xi32>
    %c17_i32_160 = arith.constant 17 : i32
    %688 = vector.broadcast %c17_i32_160 : i32 to vector<8x256xi32>
    %689 = arith.cmpi eq, %681, %688 : vector<8x256xi32>
    %cst_161 = arith.constant 0.000000e+00 : f32
    %690 = vector.shape_cast %678 : vector<8x1xf32> to vector<8x1xf32>
    %691 = vector.broadcast %690 : vector<8x1xf32> to vector<8x256xf32>
    %692 = vector.broadcast %cst_161 : f32 to vector<8x256xf32>
    %693 = arith.select %689, %691, %692 : vector<8x256xi1>, vector<8x256xf32>
    %694 = vector.shape_cast %676 : vector<8x1xf32> to vector<8x1xf32>
    %695 = vector.broadcast %694 : vector<8x1xf32> to vector<8x256xf32>
    %696 = arith.select %687, %695, %693 : vector<8x256xi1>, vector<8x256xf32>
    %697 = vector.shape_cast %674 : vector<8x1xf32> to vector<8x1xf32>
    %698 = vector.broadcast %697 : vector<8x1xf32> to vector<8x256xf32>
    %699 = arith.select %685, %698, %696 : vector<8x256xi1>, vector<8x256xf32>
    %700 = vector.shape_cast %672 : vector<8x1xf32> to vector<8x1xf32>
    %701 = vector.broadcast %700 : vector<8x1xf32> to vector<8x256xf32>
    %702 = arith.select %683, %701, %699 : vector<8x256xi1>, vector<8x256xf32>
    %703 = arith.addf %669, %702 : vector<8x256xf32>
    %704 = arith.truncf %703 : vector<8x256xf32> to vector<8x256xbf16>
    %705 = vector.extract_strided_slice %163 {offsets = [0, 16], sizes = [256, 8], strides = [1, 1]} : vector<256x32xf32> to vector<256x8xf32>
    %706 = arith.truncf %705 : vector<256x8xf32> to vector<256x8xbf16>
    %cst_162 = arith.constant dense<0.000000e+00> : vector<8x8xf32>
    %707 = tpu.matmul %704, %706, %cst_162 {dimension_numbers = #tpu.dot_dimension_numbers<[1], [0], [0], [1], [0, 0, 1, 1], [], []>} : vector<8x256xbf16>, vector<256x8xbf16>, vector<8x8xf32> -> vector<8x8xf32>
    %708 = arith.truncf %707 : vector<8x8xf32> to vector<8x8xbf16>
    %c16_163 = arith.constant 16 : index
    %c0_164 = arith.constant 0 : index
    %709 = vector.load %arg17[%c16_163, %c0_164] : memref<32x32xbf16, #tpu.memory_space<vmem>>, vector<8x32xbf16>
    %cst_165 = arith.constant dense<0.000000e+00> : vector<8x32xf32>
    %710 = tpu.matmul %708, %709, %cst_165 {dimension_numbers = #tpu.dot_dimension_numbers<[1], [0], [0], [1], [0, 0, 1, 1], [], []>} : vector<8x8xbf16>, vector<8x32xbf16>, vector<8x32xf32> -> vector<8x32xf32>
    %711 = arith.addf %555, %710 : vector<8x32xf32>
    %712 = vector.extract_strided_slice %172 {offsets = [0, 12], sizes = [8, 4], strides = [1, 1]} : vector<8x16xf32> to vector<8x4xf32>
    %cst_166 = arith.constant dense<0xFF800000> : vector<8xf32>
    %713 = vector.multi_reduction <maximumf>, %712, %cst_166 [1] : vector<8x4xf32> to vector<8xf32>
    %714 = vector.shape_cast %713 : vector<8xf32> to vector<8x1xf32>
    %715 = vector.broadcast %714 : vector<8x1xf32> to vector<8x4xf32>
    %716 = arith.subf %712, %715 : vector<8x4xf32>
    %717 = math.exp %716 : vector<8x4xf32>
    %cst_167 = arith.constant dense<0.000000e+00> : vector<8xf32>
    %718 = vector.multi_reduction <add>, %717, %cst_167 [1] : vector<8x4xf32> to vector<8xf32>
    %719 = vector.shape_cast %718 : vector<8xf32> to vector<8x1xf32>
    %720 = tpu.reciprocal %719 {approx = true} : vector<8x1xf32> -> vector<8x1xf32>
    %721 = vector.broadcast %720 : vector<8x1xf32> to vector<8x4xf32>
    %722 = arith.mulf %717, %721 : vector<8x4xf32>
    %cst_168 = arith.constant 0.000000e+00 : f32
    %723 = vector.broadcast %cst_168 : f32 to vector<8x256xf32>
    %724 = vector.extract_strided_slice %722 {offsets = [0, 0], sizes = [8, 1], strides = [1, 1]} : vector<8x4xf32> to vector<8x1xf32>
    %725 = vector.extract_strided_slice %222 {offsets = [0, 12], sizes = [8, 1], strides = [1, 1]} : vector<8x16xf32> to vector<8x1xf32>
    %726 = arith.mulf %725, %724 : vector<8x1xf32>
    %727 = vector.extract_strided_slice %228 {offsets = [0, 12], sizes = [8, 1], strides = [1, 1]} : vector<8x16xf32> to vector<8x1xf32>
    %728 = arith.mulf %727, %724 : vector<8x1xf32>
    %729 = vector.extract_strided_slice %234 {offsets = [0, 12], sizes = [8, 1], strides = [1, 1]} : vector<8x16xf32> to vector<8x1xf32>
    %730 = arith.mulf %729, %724 : vector<8x1xf32>
    %731 = vector.extract_strided_slice %238 {offsets = [0, 12], sizes = [8, 1], strides = [1, 1]} : vector<8x16xf32> to vector<8x1xf32>
    %732 = arith.mulf %731, %724 : vector<8x1xf32>
    %733 = vector.extract_strided_slice %241 {offsets = [0, 12], sizes = [8, 1], strides = [1, 1]} : vector<8x16xi32> to vector<8x1xi32>
    %734 = vector.broadcast %733 : vector<8x1xi32> to vector<8x256xi32>
    %735 = arith.subi %242, %734 : vector<8x256xi32>
    %c0_i32_169 = arith.constant 0 : i32
    %736 = vector.broadcast %c0_i32_169 : i32 to vector<8x256xi32>
    %737 = arith.cmpi eq, %735, %736 : vector<8x256xi32>
    %c1_i32_170 = arith.constant 1 : i32
    %738 = vector.broadcast %c1_i32_170 : i32 to vector<8x256xi32>
    %739 = arith.cmpi eq, %735, %738 : vector<8x256xi32>
    %c16_i32_171 = arith.constant 16 : i32
    %740 = vector.broadcast %c16_i32_171 : i32 to vector<8x256xi32>
    %741 = arith.cmpi eq, %735, %740 : vector<8x256xi32>
    %c17_i32_172 = arith.constant 17 : i32
    %742 = vector.broadcast %c17_i32_172 : i32 to vector<8x256xi32>
    %743 = arith.cmpi eq, %735, %742 : vector<8x256xi32>
    %cst_173 = arith.constant 0.000000e+00 : f32
    %744 = vector.shape_cast %732 : vector<8x1xf32> to vector<8x1xf32>
    %745 = vector.broadcast %744 : vector<8x1xf32> to vector<8x256xf32>
    %746 = vector.broadcast %cst_173 : f32 to vector<8x256xf32>
    %747 = arith.select %743, %745, %746 : vector<8x256xi1>, vector<8x256xf32>
    %748 = vector.shape_cast %730 : vector<8x1xf32> to vector<8x1xf32>
    %749 = vector.broadcast %748 : vector<8x1xf32> to vector<8x256xf32>
    %750 = arith.select %741, %749, %747 : vector<8x256xi1>, vector<8x256xf32>
    %751 = vector.shape_cast %728 : vector<8x1xf32> to vector<8x1xf32>
    %752 = vector.broadcast %751 : vector<8x1xf32> to vector<8x256xf32>
    %753 = arith.select %739, %752, %750 : vector<8x256xi1>, vector<8x256xf32>
    %754 = vector.shape_cast %726 : vector<8x1xf32> to vector<8x1xf32>
    %755 = vector.broadcast %754 : vector<8x1xf32> to vector<8x256xf32>
    %756 = arith.select %737, %755, %753 : vector<8x256xi1>, vector<8x256xf32>
    %757 = arith.addf %723, %756 : vector<8x256xf32>
    %758 = vector.extract_strided_slice %722 {offsets = [0, 1], sizes = [8, 1], strides = [1, 1]} : vector<8x4xf32> to vector<8x1xf32>
    %759 = vector.extract_strided_slice %222 {offsets = [0, 13], sizes = [8, 1], strides = [1, 1]} : vector<8x16xf32> to vector<8x1xf32>
    %760 = arith.mulf %759, %758 : vector<8x1xf32>
    %761 = vector.extract_strided_slice %228 {offsets = [0, 13], sizes = [8, 1], strides = [1, 1]} : vector<8x16xf32> to vector<8x1xf32>
    %762 = arith.mulf %761, %758 : vector<8x1xf32>
    %763 = vector.extract_strided_slice %234 {offsets = [0, 13], sizes = [8, 1], strides = [1, 1]} : vector<8x16xf32> to vector<8x1xf32>
    %764 = arith.mulf %763, %758 : vector<8x1xf32>
    %765 = vector.extract_strided_slice %238 {offsets = [0, 13], sizes = [8, 1], strides = [1, 1]} : vector<8x16xf32> to vector<8x1xf32>
    %766 = arith.mulf %765, %758 : vector<8x1xf32>
    %767 = vector.extract_strided_slice %241 {offsets = [0, 13], sizes = [8, 1], strides = [1, 1]} : vector<8x16xi32> to vector<8x1xi32>
    %768 = vector.broadcast %767 : vector<8x1xi32> to vector<8x256xi32>
    %769 = arith.subi %242, %768 : vector<8x256xi32>
    %c0_i32_174 = arith.constant 0 : i32
    %770 = vector.broadcast %c0_i32_174 : i32 to vector<8x256xi32>
    %771 = arith.cmpi eq, %769, %770 : vector<8x256xi32>
    %c1_i32_175 = arith.constant 1 : i32
    %772 = vector.broadcast %c1_i32_175 : i32 to vector<8x256xi32>
    %773 = arith.cmpi eq, %769, %772 : vector<8x256xi32>
    %c16_i32_176 = arith.constant 16 : i32
    %774 = vector.broadcast %c16_i32_176 : i32 to vector<8x256xi32>
    %775 = arith.cmpi eq, %769, %774 : vector<8x256xi32>
    %c17_i32_177 = arith.constant 17 : i32
    %776 = vector.broadcast %c17_i32_177 : i32 to vector<8x256xi32>
    %777 = arith.cmpi eq, %769, %776 : vector<8x256xi32>
    %cst_178 = arith.constant 0.000000e+00 : f32
    %778 = vector.shape_cast %766 : vector<8x1xf32> to vector<8x1xf32>
    %779 = vector.broadcast %778 : vector<8x1xf32> to vector<8x256xf32>
    %780 = vector.broadcast %cst_178 : f32 to vector<8x256xf32>
    %781 = arith.select %777, %779, %780 : vector<8x256xi1>, vector<8x256xf32>
    %782 = vector.shape_cast %764 : vector<8x1xf32> to vector<8x1xf32>
    %783 = vector.broadcast %782 : vector<8x1xf32> to vector<8x256xf32>
    %784 = arith.select %775, %783, %781 : vector<8x256xi1>, vector<8x256xf32>
    %785 = vector.shape_cast %762 : vector<8x1xf32> to vector<8x1xf32>
    %786 = vector.broadcast %785 : vector<8x1xf32> to vector<8x256xf32>
    %787 = arith.select %773, %786, %784 : vector<8x256xi1>, vector<8x256xf32>
    %788 = vector.shape_cast %760 : vector<8x1xf32> to vector<8x1xf32>
    %789 = vector.broadcast %788 : vector<8x1xf32> to vector<8x256xf32>
    %790 = arith.select %771, %789, %787 : vector<8x256xi1>, vector<8x256xf32>
    %791 = arith.addf %757, %790 : vector<8x256xf32>
    %792 = vector.extract_strided_slice %722 {offsets = [0, 2], sizes = [8, 1], strides = [1, 1]} : vector<8x4xf32> to vector<8x1xf32>
    %793 = vector.extract_strided_slice %222 {offsets = [0, 14], sizes = [8, 1], strides = [1, 1]} : vector<8x16xf32> to vector<8x1xf32>
    %794 = arith.mulf %793, %792 : vector<8x1xf32>
    %795 = vector.extract_strided_slice %228 {offsets = [0, 14], sizes = [8, 1], strides = [1, 1]} : vector<8x16xf32> to vector<8x1xf32>
    %796 = arith.mulf %795, %792 : vector<8x1xf32>
    %797 = vector.extract_strided_slice %234 {offsets = [0, 14], sizes = [8, 1], strides = [1, 1]} : vector<8x16xf32> to vector<8x1xf32>
    %798 = arith.mulf %797, %792 : vector<8x1xf32>
    %799 = vector.extract_strided_slice %238 {offsets = [0, 14], sizes = [8, 1], strides = [1, 1]} : vector<8x16xf32> to vector<8x1xf32>
    %800 = arith.mulf %799, %792 : vector<8x1xf32>
    %801 = vector.extract_strided_slice %241 {offsets = [0, 14], sizes = [8, 1], strides = [1, 1]} : vector<8x16xi32> to vector<8x1xi32>
    %802 = vector.broadcast %801 : vector<8x1xi32> to vector<8x256xi32>
    %803 = arith.subi %242, %802 : vector<8x256xi32>
    %c0_i32_179 = arith.constant 0 : i32
    %804 = vector.broadcast %c0_i32_179 : i32 to vector<8x256xi32>
    %805 = arith.cmpi eq, %803, %804 : vector<8x256xi32>
    %c1_i32_180 = arith.constant 1 : i32
    %806 = vector.broadcast %c1_i32_180 : i32 to vector<8x256xi32>
    %807 = arith.cmpi eq, %803, %806 : vector<8x256xi32>
    %c16_i32_181 = arith.constant 16 : i32
    %808 = vector.broadcast %c16_i32_181 : i32 to vector<8x256xi32>
    %809 = arith.cmpi eq, %803, %808 : vector<8x256xi32>
    %c17_i32_182 = arith.constant 17 : i32
    %810 = vector.broadcast %c17_i32_182 : i32 to vector<8x256xi32>
    %811 = arith.cmpi eq, %803, %810 : vector<8x256xi32>
    %cst_183 = arith.constant 0.000000e+00 : f32
    %812 = vector.shape_cast %800 : vector<8x1xf32> to vector<8x1xf32>
    %813 = vector.broadcast %812 : vector<8x1xf32> to vector<8x256xf32>
    %814 = vector.broadcast %cst_183 : f32 to vector<8x256xf32>
    %815 = arith.select %811, %813, %814 : vector<8x256xi1>, vector<8x256xf32>
    %816 = vector.shape_cast %798 : vector<8x1xf32> to vector<8x1xf32>
    %817 = vector.broadcast %816 : vector<8x1xf32> to vector<8x256xf32>
    %818 = arith.select %809, %817, %815 : vector<8x256xi1>, vector<8x256xf32>
    %819 = vector.shape_cast %796 : vector<8x1xf32> to vector<8x1xf32>
    %820 = vector.broadcast %819 : vector<8x1xf32> to vector<8x256xf32>
    %821 = arith.select %807, %820, %818 : vector<8x256xi1>, vector<8x256xf32>
    %822 = vector.shape_cast %794 : vector<8x1xf32> to vector<8x1xf32>
    %823 = vector.broadcast %822 : vector<8x1xf32> to vector<8x256xf32>
    %824 = arith.select %805, %823, %821 : vector<8x256xi1>, vector<8x256xf32>
    %825 = arith.addf %791, %824 : vector<8x256xf32>
    %826 = vector.extract_strided_slice %722 {offsets = [0, 3], sizes = [8, 1], strides = [1, 1]} : vector<8x4xf32> to vector<8x1xf32>
    %827 = vector.extract_strided_slice %222 {offsets = [0, 15], sizes = [8, 1], strides = [1, 1]} : vector<8x16xf32> to vector<8x1xf32>
    %828 = arith.mulf %827, %826 : vector<8x1xf32>
    %829 = vector.extract_strided_slice %228 {offsets = [0, 15], sizes = [8, 1], strides = [1, 1]} : vector<8x16xf32> to vector<8x1xf32>
    %830 = arith.mulf %829, %826 : vector<8x1xf32>
    %831 = vector.extract_strided_slice %234 {offsets = [0, 15], sizes = [8, 1], strides = [1, 1]} : vector<8x16xf32> to vector<8x1xf32>
    %832 = arith.mulf %831, %826 : vector<8x1xf32>
    %833 = vector.extract_strided_slice %238 {offsets = [0, 15], sizes = [8, 1], strides = [1, 1]} : vector<8x16xf32> to vector<8x1xf32>
    %834 = arith.mulf %833, %826 : vector<8x1xf32>
    %835 = vector.extract_strided_slice %241 {offsets = [0, 15], sizes = [8, 1], strides = [1, 1]} : vector<8x16xi32> to vector<8x1xi32>
    %836 = vector.broadcast %835 : vector<8x1xi32> to vector<8x256xi32>
    %837 = arith.subi %242, %836 : vector<8x256xi32>
    %c0_i32_184 = arith.constant 0 : i32
    %838 = vector.broadcast %c0_i32_184 : i32 to vector<8x256xi32>
    %839 = arith.cmpi eq, %837, %838 : vector<8x256xi32>
    %c1_i32_185 = arith.constant 1 : i32
    %840 = vector.broadcast %c1_i32_185 : i32 to vector<8x256xi32>
    %841 = arith.cmpi eq, %837, %840 : vector<8x256xi32>
    %c16_i32_186 = arith.constant 16 : i32
    %842 = vector.broadcast %c16_i32_186 : i32 to vector<8x256xi32>
    %843 = arith.cmpi eq, %837, %842 : vector<8x256xi32>
    %c17_i32_187 = arith.constant 17 : i32
    %844 = vector.broadcast %c17_i32_187 : i32 to vector<8x256xi32>
    %845 = arith.cmpi eq, %837, %844 : vector<8x256xi32>
    %cst_188 = arith.constant 0.000000e+00 : f32
    %846 = vector.shape_cast %834 : vector<8x1xf32> to vector<8x1xf32>
    %847 = vector.broadcast %846 : vector<8x1xf32> to vector<8x256xf32>
    %848 = vector.broadcast %cst_188 : f32 to vector<8x256xf32>
    %849 = arith.select %845, %847, %848 : vector<8x256xi1>, vector<8x256xf32>
    %850 = vector.shape_cast %832 : vector<8x1xf32> to vector<8x1xf32>
    %851 = vector.broadcast %850 : vector<8x1xf32> to vector<8x256xf32>
    %852 = arith.select %843, %851, %849 : vector<8x256xi1>, vector<8x256xf32>
    %853 = vector.shape_cast %830 : vector<8x1xf32> to vector<8x1xf32>
    %854 = vector.broadcast %853 : vector<8x1xf32> to vector<8x256xf32>
    %855 = arith.select %841, %854, %852 : vector<8x256xi1>, vector<8x256xf32>
    %856 = vector.shape_cast %828 : vector<8x1xf32> to vector<8x1xf32>
    %857 = vector.broadcast %856 : vector<8x1xf32> to vector<8x256xf32>
    %858 = arith.select %839, %857, %855 : vector<8x256xi1>, vector<8x256xf32>
    %859 = arith.addf %825, %858 : vector<8x256xf32>
    %860 = arith.truncf %859 : vector<8x256xf32> to vector<8x256xbf16>
    %861 = vector.extract_strided_slice %163 {offsets = [0, 24], sizes = [256, 8], strides = [1, 1]} : vector<256x32xf32> to vector<256x8xf32>
    %862 = arith.truncf %861 : vector<256x8xf32> to vector<256x8xbf16>
    %cst_189 = arith.constant dense<0.000000e+00> : vector<8x8xf32>
    %863 = tpu.matmul %860, %862, %cst_189 {dimension_numbers = #tpu.dot_dimension_numbers<[1], [0], [0], [1], [0, 0, 1, 1], [], []>} : vector<8x256xbf16>, vector<256x8xbf16>, vector<8x8xf32> -> vector<8x8xf32>
    %864 = arith.truncf %863 : vector<8x8xf32> to vector<8x8xbf16>
    %c24_190 = arith.constant 24 : index
    %c0_191 = arith.constant 0 : index
    %865 = vector.load %arg17[%c24_190, %c0_191] : memref<32x32xbf16, #tpu.memory_space<vmem>>, vector<8x32xbf16>
    %cst_192 = arith.constant dense<0.000000e+00> : vector<8x32xf32>
    %866 = tpu.matmul %864, %865, %cst_192 {dimension_numbers = #tpu.dot_dimension_numbers<[1], [0], [0], [1], [0, 0, 1, 1], [], []>} : vector<8x8xbf16>, vector<8x32xbf16>, vector<8x32xf32> -> vector<8x32xf32>
    %867 = arith.addf %711, %866 : vector<8x32xf32>
    %c0_193 = arith.constant 0 : index
    %c0_194 = arith.constant 0 : index
    %868 = vector.load %arg18[%c0_193, %c0_194] : memref<1x32xf32, #tpu.memory_space<vmem>>, vector<1x32xf32>
    %869 = vector.broadcast %868 : vector<1x32xf32> to vector<8x32xf32>
    %870 = arith.addf %867, %869 : vector<8x32xf32>
    %871 = vector.broadcast %11 : vector<8x1xf32> to vector<8x32xf32>
    %872 = arith.mulf %870, %871 : vector<8x32xf32>
    %873 = arith.addf %156, %872 : vector<8x32xf32>
    %874 = vector.extract_strided_slice %14 {offsets = [2, 0], sizes = [1, 32], strides = [1, 1]} : vector<6x32xf32> to vector<1x32xf32>
    %875 = vector.extract_strided_slice %14 {offsets = [3, 0], sizes = [1, 32], strides = [1, 1]} : vector<6x32xf32> to vector<1x32xf32>
    %cst_195 = arith.constant dense<0.000000e+00> : vector<8xf32>
    %876 = vector.multi_reduction <add>, %873, %cst_195 [1] : vector<8x32xf32> to vector<8xf32>
    %877 = vector.shape_cast %876 : vector<8xf32> to vector<8x1xf32>
    %cst_196 = arith.constant 3.200000e+01 : f32
    %878 = vector.broadcast %cst_196 : f32 to vector<8x1xf32>
    %879 = arith.divf %877, %878 : vector<8x1xf32>
    %880 = vector.broadcast %879 : vector<8x1xf32> to vector<8x32xf32>
    %881 = arith.subf %873, %880 : vector<8x32xf32>
    %882 = arith.mulf %881, %881 : vector<8x32xf32>
    %cst_197 = arith.constant dense<0.000000e+00> : vector<8xf32>
    %883 = vector.multi_reduction <add>, %882, %cst_197 [1] : vector<8x32xf32> to vector<8xf32>
    %884 = vector.shape_cast %883 : vector<8xf32> to vector<8x1xf32>
    %cst_198 = arith.constant 3.200000e+01 : f32
    %885 = vector.broadcast %cst_198 : f32 to vector<8x1xf32>
    %886 = arith.divf %884, %885 : vector<8x1xf32>
    %cst_199 = arith.constant 9.99999974E-6 : f32
    %887 = vector.broadcast %cst_199 : f32 to vector<8x1xf32>
    %888 = arith.addf %886, %887 : vector<8x1xf32>
    %889 = math.rsqrt %888 : vector<8x1xf32>
    %890 = vector.broadcast %889 : vector<8x1xf32> to vector<8x32xf32>
    %891 = arith.mulf %881, %890 : vector<8x32xf32>
    %892 = vector.broadcast %874 : vector<1x32xf32> to vector<8x32xf32>
    %893 = arith.mulf %891, %892 : vector<8x32xf32>
    %894 = vector.broadcast %875 : vector<1x32xf32> to vector<8x32xf32>
    %895 = arith.addf %893, %894 : vector<8x32xf32>
    %c0_200 = arith.constant 0 : index
    %c0_201 = arith.constant 0 : index
    %896 = vector.load %arg19[%c0_200, %c0_201] : memref<32x64xbf16, #tpu.memory_space<vmem>>, vector<32x64xbf16>
    %897 = arith.truncf %895 : vector<8x32xf32> to vector<8x32xbf16>
    %cst_202 = arith.constant dense<0.000000e+00> : vector<8x64xf32>
    %898 = tpu.matmul %897, %896, %cst_202 {dimension_numbers = #tpu.dot_dimension_numbers<[1], [0], [0], [1], [0, 0, 1, 1], [], []>} : vector<8x32xbf16>, vector<32x64xbf16>, vector<8x64xf32> -> vector<8x64xf32>
    %c0_203 = arith.constant 0 : index
    %c0_204 = arith.constant 0 : index
    %899 = vector.load %arg20[%c0_203, %c0_204] : memref<1x64xf32, #tpu.memory_space<vmem>>, vector<1x64xf32>
    %900 = vector.broadcast %899 : vector<1x64xf32> to vector<8x64xf32>
    %901 = arith.addf %898, %900 : vector<8x64xf32>
    %cst_205 = arith.constant 0.000000e+00 : f32
    %902 = vector.broadcast %cst_205 : f32 to vector<8x64xf32>
    %903 = arith.maximumf %901, %902 : vector<8x64xf32>
    %c0_206 = arith.constant 0 : index
    %c0_207 = arith.constant 0 : index
    %904 = vector.load %arg21[%c0_206, %c0_207] : memref<64x32xbf16, #tpu.memory_space<vmem>>, vector<64x32xbf16>
    %905 = arith.truncf %903 : vector<8x64xf32> to vector<8x64xbf16>
    %cst_208 = arith.constant dense<0.000000e+00> : vector<8x32xf32>
    %906 = tpu.matmul %905, %904, %cst_208 {dimension_numbers = #tpu.dot_dimension_numbers<[1], [0], [0], [1], [0, 0, 1, 1], [], []>} : vector<8x64xbf16>, vector<64x32xbf16>, vector<8x32xf32> -> vector<8x32xf32>
    %c0_209 = arith.constant 0 : index
    %c0_210 = arith.constant 0 : index
    %907 = vector.load %arg22[%c0_209, %c0_210] : memref<1x32xf32, #tpu.memory_space<vmem>>, vector<1x32xf32>
    %908 = vector.broadcast %907 : vector<1x32xf32> to vector<8x32xf32>
    %909 = arith.addf %906, %908 : vector<8x32xf32>
    %910 = arith.addf %895, %909 : vector<8x32xf32>
    %911 = vector.extract_strided_slice %14 {offsets = [4, 0], sizes = [1, 32], strides = [1, 1]} : vector<6x32xf32> to vector<1x32xf32>
    %912 = vector.extract_strided_slice %14 {offsets = [5, 0], sizes = [1, 32], strides = [1, 1]} : vector<6x32xf32> to vector<1x32xf32>
    %cst_211 = arith.constant dense<0.000000e+00> : vector<8xf32>
    %913 = vector.multi_reduction <add>, %910, %cst_211 [1] : vector<8x32xf32> to vector<8xf32>
    %914 = vector.shape_cast %913 : vector<8xf32> to vector<8x1xf32>
    %cst_212 = arith.constant 3.200000e+01 : f32
    %915 = vector.broadcast %cst_212 : f32 to vector<8x1xf32>
    %916 = arith.divf %914, %915 : vector<8x1xf32>
    %917 = vector.broadcast %916 : vector<8x1xf32> to vector<8x32xf32>
    %918 = arith.subf %910, %917 : vector<8x32xf32>
    %919 = arith.mulf %918, %918 : vector<8x32xf32>
    %cst_213 = arith.constant dense<0.000000e+00> : vector<8xf32>
    %920 = vector.multi_reduction <add>, %919, %cst_213 [1] : vector<8x32xf32> to vector<8xf32>
    %921 = vector.shape_cast %920 : vector<8xf32> to vector<8x1xf32>
    %cst_214 = arith.constant 3.200000e+01 : f32
    %922 = vector.broadcast %cst_214 : f32 to vector<8x1xf32>
    %923 = arith.divf %921, %922 : vector<8x1xf32>
    %cst_215 = arith.constant 9.99999974E-6 : f32
    %924 = vector.broadcast %cst_215 : f32 to vector<8x1xf32>
    %925 = arith.addf %923, %924 : vector<8x1xf32>
    %926 = math.rsqrt %925 : vector<8x1xf32>
    %927 = vector.broadcast %926 : vector<8x1xf32> to vector<8x32xf32>
    %928 = arith.mulf %918, %927 : vector<8x32xf32>
    %929 = vector.broadcast %911 : vector<1x32xf32> to vector<8x32xf32>
    %930 = arith.mulf %928, %929 : vector<8x32xf32>
    %931 = vector.broadcast %912 : vector<1x32xf32> to vector<8x32xf32>
    %932 = arith.addf %930, %931 : vector<8x32xf32>
    %c0_216 = arith.constant 0 : index
    %c0_217 = arith.constant 0 : index
    %c0_218 = arith.constant 0 : index
    %933 = vector.load %arg23[%c0_216, %c0_217, %c0_218] : memref<1x8x32xf32, #tpu.memory_space<vmem>>, vector<1x8x32xf32>
    %934 = vector.shape_cast %933 : vector<1x8x32xf32> to vector<8x32xf32>
    %935 = vector.shape_cast %932 : vector<8x32xf32> to vector<1x8x32xf32>
    tpu.vector_store %arg23[%c0_216, %c0_217, %c0_218], %935 {strides = array<i32>} : memref<1x8x32xf32, #tpu.memory_space<vmem>>, vector<1x8x32xf32>,
    return
  }
  func.func @transform_0(%arg0: i32) -> (i32, i32, i32) {
    %c0_i32 = arith.constant 0 : i32
    %c0_i32_0 = arith.constant 0 : i32
    %c0_i32_1 = arith.constant 0 : i32
    return %arg0, %c0_i32, %c0_i32_0 : i32, i32, i32
  }
  func.func @transform_1(%arg0: i32) -> (i32, i32, i32) {
    %c0_i32 = arith.constant 0 : i32
    %c0_i32_0 = arith.constant 0 : i32
    %c0_i32_1 = arith.constant 0 : i32
    return %arg0, %c0_i32, %c0_i32_0 : i32, i32, i32
  }
  func.func @transform_2(%arg0: i32) -> (i32, i32, i32) {
    %c0_i32 = arith.constant 0 : i32
    %c0_i32_0 = arith.constant 0 : i32
    %c0_i32_1 = arith.constant 0 : i32
    return %arg0, %c0_i32, %c0_i32_0 : i32, i32, i32
  }
  func.func @transform_3(%arg0: i32) -> (i32, i32, i32) {
    %c0_i32 = arith.constant 0 : i32
    %c0_i32_0 = arith.constant 0 : i32
    %c0_i32_1 = arith.constant 0 : i32
    return %arg0, %c0_i32, %c0_i32_0 : i32, i32, i32
  }
  func.func @transform_4(%arg0: i32) -> (i32, i32, i32) {
    %c0_i32 = arith.constant 0 : i32
    %c0_i32_0 = arith.constant 0 : i32
    %c0_i32_1 = arith.constant 0 : i32
    return %arg0, %c0_i32, %c0_i32_0 : i32, i32, i32
  }
  func.func @transform_5(%arg0: i32) -> (i32, i32) {
    %c0_i32 = arith.constant 0 : i32
    %c0_i32_0 = arith.constant 0 : i32
    %c0_i32_1 = arith.constant 0 : i32
    return %c0_i32, %c0_i32_0 : i32, i32
  }
  func.func @transform_6(%arg0: i32) -> (i32, i32) {
    %c0_i32 = arith.constant 0 : i32
    %c0_i32_0 = arith.constant 0 : i32
    %c0_i32_1 = arith.constant 0 : i32
    return %c0_i32, %c0_i32_0 : i32, i32
  }
  func.func @transform_7(%arg0: i32) -> (i32, i32) {
    %c0_i32 = arith.constant 0 : i32
    %c0_i32_0 = arith.constant 0 : i32
    %c0_i32_1 = arith.constant 0 : i32
    return %c0_i32, %c0_i32_0 : i32, i32
  }
  func.func @transform_8(%arg0: i32) -> (i32, i32) {
    %c0_i32 = arith.constant 0 : i32
    %c0_i32_0 = arith.constant 0 : i32
    %c0_i32_1 = arith.constant 0 : i32
    return %c0_i32, %c0_i32_0 : i32, i32
  }
  func.func @transform_9(%arg0: i32) -> (i32, i32) {
    %c0_i32 = arith.constant 0 : i32
    %c0_i32_0 = arith.constant 0 : i32
    %c0_i32_1 = arith.constant 0 : i32
    return %c0_i32, %c0_i32_0 : i32, i32
  }
  func.func @transform_10(%arg0: i32) -> (i32, i32) {
    %c0_i32 = arith.constant 0 : i32
    %c0_i32_0 = arith.constant 0 : i32
    %c0_i32_1 = arith.constant 0 : i32
    return %c0_i32, %c0_i32_0 : i32, i32
  }
  func.func @transform_11(%arg0: i32) -> (i32, i32) {
    %c0_i32 = arith.constant 0 : i32
    %c0_i32_0 = arith.constant 0 : i32
    %c0_i32_1 = arith.constant 0 : i32
    return %c0_i32, %c0_i32_0 : i32, i32
  }
  func.func @transform_12(%arg0: i32) -> (i32, i32) {
    %c0_i32 = arith.constant 0 : i32
    %c0_i32_0 = arith.constant 0 : i32
    %c0_i32_1 = arith.constant 0 : i32
    return %c0_i32, %c0_i32_0 : i32, i32
  }
  func.func @transform_13(%arg0: i32) -> (i32, i32) {
    %c0_i32 = arith.constant 0 : i32
    %c0_i32_0 = arith.constant 0 : i32
    %c0_i32_1 = arith.constant 0 : i32
    return %c0_i32, %c0_i32_0 : i32, i32
  }
  func.func @transform_14(%arg0: i32) -> (i32, i32) {
    %c0_i32 = arith.constant 0 : i32
    %c0_i32_0 = arith.constant 0 : i32
    %c0_i32_1 = arith.constant 0 : i32
    return %c0_i32, %c0_i32_0 : i32, i32
  }
  func.func @transform_15(%arg0: i32) -> (i32, i32) {
    %c0_i32 = arith.constant 0 : i32
    %c0_i32_0 = arith.constant 0 : i32
    %c0_i32_1 = arith.constant 0 : i32
    return %c0_i32, %c0_i32_0 : i32, i32
  }
  func.func @transform_16(%arg0: i32) -> (i32, i32) {
    %c0_i32 = arith.constant 0 : i32
    %c0_i32_0 = arith.constant 0 : i32
    %c0_i32_1 = arith.constant 0 : i32
    return %c0_i32, %c0_i32_0 : i32, i32
  }
  func.func @transform_17(%arg0: i32) -> (i32, i32) {
    %c0_i32 = arith.constant 0 : i32
    %c0_i32_0 = arith.constant 0 : i32
    %c0_i32_1 = arith.constant 0 : i32
    return %c0_i32, %c0_i32_0 : i32, i32
  }
  func.func @transform_18(%arg0: i32) -> (i32, i32) {
    %c0_i32 = arith.constant 0 : i32
    %c0_i32_0 = arith.constant 0 : i32
    %c0_i32_1 = arith.constant 0 : i32
    return %c0_i32, %c0_i32_0 : i32, i32
  }
  func.func @transform_19(%arg0: i32) -> (i32, i32) {
    %c0_i32 = arith.constant 0 : i32
    %c0_i32_0 = arith.constant 0 : i32
    %c0_i32_1 = arith.constant 0 : i32
    return %c0_i32, %c0_i32_0 : i32, i32
  }
  func.func @transform_20(%arg0: i32) -> (i32, i32) {
    %c0_i32 = arith.constant 0 : i32
    %c0_i32_0 = arith.constant 0 : i32
    %c0_i32_1 = arith.constant 0 : i32
    return %c0_i32, %c0_i32_0 : i32, i32
  }
  func.func @transform_21(%arg0: i32) -> (i32, i32) {
    %c0_i32 = arith.constant 0 : i32
    %c0_i32_0 = arith.constant 0 : i32
    %c0_i32_1 = arith.constant 0 : i32
    return %c0_i32, %c0_i32_0 : i32, i32
  }
  func.func @transform_22(%arg0: i32) -> (i32, i32, i32) {
    %c0_i32 = arith.constant 0 : i32
    %c0_i32_0 = arith.constant 0 : i32
    %c0_i32_1 = arith.constant 0 : i32
    return %arg0, %c0_i32, %c0_i32_0 : i32, i32, i32
  }
}

</mosaic_0001>

<bundles_post_ra>
// kernel: trackformer_decoder_layer.1
= control target key start
LH: loop header
LB: loop body
LE: loop exit
PB: predicated region body
PF: predicated region fallthrough
CT: control target
= control target key end

     0   :  { %s4289_s0 = inlined_call_operand.vmem [shape: f32[2,8,32], index: 0, kind: input, shape index: {}]   ;;  %s4290_s1 = inlined_call_operand.vmem [shape: f32[2,8,32], index: 1, kind: input, shape index: {}]   ;;  %s4291_s2 = inlined_call_operand.vmem [shape: f32[2,1,8], index: 2, kind: input, shape index: {}]   ;;  %s4292_s3 = inlined_call_operand.vmem [shape: f32[2,8,4], index: 3, kind: input, shape index: {}]   ;;  %s4293_s4 = inlined_call_operand.vmem [shape: f32[2,256,32], index: 4, kind: input, shape index: {}]   ;;  %s4294_s5 = inlined_call_operand.vmem [shape: bf16[32,64], index: 5, kind: input, shape index: {}]   ;;  %s4295_s6 = inlined_call_operand.vmem [shape: f32[1,64], index: 6, kind: input, shape index: {}]   ;;  %s4296_s7 = inlined_call_operand.vmem [shape: bf16[32,32], index: 7, kind: input, shape index: {}]   ;;  %s4297_s8 = inlined_call_operand.vmem [shape: f32[1,32], index: 8, kind: input, shape index: {}]   ;;  %s4298_s9 = inlined_call_operand.vmem [shape: bf16[32,32], index: 9, kind: input, shape index: {}]   ;;  %s4299_s10 = inlined_call_operand.vmem [shape: f32[1,32], index: 10, kind: input, shape index: {}]   ;;  %s4300_s11 = inlined_call_operand.vmem [shape: f32[6,32], index: 11, kind: input, shape index: {}]   ;;  %s4301_s12 = inlined_call_operand.vmem [shape: bf16[32,32], index: 12, kind: input, shape index: {}]   ;;  %s4302_s13 = inlined_call_operand.vmem [shape: f32[1,32], index: 13, kind: input, shape index: {}]   ;;  %s4303_s14 = inlined_call_operand.vmem [shape: bf16[32,48], index: 14, kind: input, shape index: {}]   ;;  %s4304_s15 = inlined_call_operand.vmem [shape: f32[1,48], index: 15, kind: input, shape index: {}]   ;;  %s4305_s16 = inlined_call_operand.vmem [shape: bf16[32,32], index: 16, kind: input, shape index: {}]   ;;  %s4306_s17 = inlined_call_operand.vmem [shape: f32[1,32], index: 17, kind: input, shape index: {}]   ;;  %s4307_s18 = inlined_call_operand.vmem [shape: bf16[32,64], index: 18, kind: input, shape index: {}]   ;;  %s4308_s19 = inlined_call_operand.vmem [shape: f32[1,64], index: 19, kind: input, shape index: {}]   ;;  %s4309_s20 = inlined_call_operand.vmem [shape: bf16[64,32], index: 20, kind: input, shape index: {}]   ;;  %s4310_s21 = inlined_call_operand.vmem [shape: f32[1,32], index: 21, kind: input, shape index: {}]   ;;  %s4311_s22 = inlined_call_operand.hbm [shape: f32[2,8,32], index: 22, kind: output, shape index: {}]  }
   0x1   :  { %4334 = sst [smem:[#allocation12_spill]] %s4289_s0 }
   0x2   :  { %4335 = sst [smem:[#allocation13_spill]] %s4290_s1 }
   0x3   :  { %4336 = sst [smem:[#allocation14_spill]] %s4291_s2 }
   0x4   :  { %4337 = sst [smem:[#allocation15_spill]] %s4292_s3 }
   0x5   :  { %4338 = sst [smem:[#allocation16_spill]] %s4293_s4 }
   0x6   :  { %4339 = sst [smem:[#allocation17_spill]] %s4294_s5 }
   0x7   :  { %4340 = sst [smem:[#allocation18_spill]] %s4295_s6 }
   0x8   :  { %4341 = sst [smem:[#allocation19_spill]] %s4296_s7 }
   0x9   :  { %4342 = sst [smem:[#allocation20_spill]] %s4297_s8 }
   0xa   :  { %27 = vsyncpa [#allocation3], 0 }
   0xb   :  { %29 = vsyncpa [#allocation3 + $0x1], 0  ;;  %s3446_s3 = smov 0   ;;  %s3448_s28 = smov 0  }
   0xc   :  { %s3450_s29 = smov 0   ;;  %s3452_s30 = smov 0  }
   0xd LB: > { %4343 = sst [smem:[#allocation5_spill]] %s3274_s3  ;;  %s3467_s4 = sadd.s32 4294967295, %s3286_s30   ;;  %s3286_s30 = sphi %s3452_s30, %s4398_s30   ;;  %s3282_s29 = sphi %s3450_s29, %s4400_s29   ;;  %s3278_s28 = sphi %s3448_s28, %s4402_s28   ;;  %s3274_s3 = sphi %s3446_s3, %s4401_s3  }
   0xe   : > { %4344 = sst [smem:[#allocation6_spill]] %s3282_s29  ;;  %s2890_s0 = sadd.s32 4294967294, %s3286_s30  }
   0xf   : > { %4345 = sst [smem:[#allocation7_spill]] %s3286_s30  ;;  %s3471_s23 = sadd.s32 1, %s3286_s30  }
  0x10   : > { %4346 = sst [smem:[#allocation8_spill]] %s3471_s23  ;;  %s529_s1 = sadd.s32 1, %s3282_s29 }
  0x11   : > { %s526_s5 = ssub.s32 %s3286_s30, %s3471_s23  ;;  %p539_p0 = scmp.ne.s32.totalorder %s3282_s29, %s3278_s28 }
  0x12   : > { %p527_p1 = scmp.eq.s32.totalorder %s526_s5, 0  ;;  %p540_p2 = scmp.eq.s32.totalorder %s3467_s4, 1 }
  0x13   : > { %p545_p3 = scmp.ne.s32.totalorder %s3278_s28, %s3274_s3  ;;  %p546_p4 = scmp.eq.s32.totalorder %s2890_s0, 1 }
  0x14   : > { %s3482_s24 = scalar_select %p527_p1, %s3282_s29, %s529_s1  }
  0x15   : > { %p3484_p5 = por %p540_p2, %p539_p0  ;;  %p3488_p6 = por %p546_p4, %p545_p3 }
  0x16   : > { %4347 = sst [smem:[#allocation9_spill]] %s3482_s24  ;;  %p2893_p7 = scmp.ge.s32.totalorder %s3286_s30, 1 }
  0x17   : > { %s4348_s6 = scalar_select %p3484_p5, 1, 0 }
  0x18   : > { %s4350_s25 = scalar_select %p3488_p6, 1, 0 }
  0x19   : > { %4349 = sst [smem:[#allocation10_spill]] %s4348_s6  ;;  %p650_p8 = scmp.lt.s32.totalorder %s3286_s30, 3 }
  0x1a   : > { %4351 = sst [smem:[#allocation11_spill]] %s4350_s25 }
  0x1b   : > { %p651_p9 = pnand %p2893_p7, %p650_p8 }
  0x1c   : > { %s4352_s27 = sld [smem:[#allocation17_spill]] (!%p651_p9)  ;;  %p727_p10 = scmp.lt.s32.totalorder (!%p651_p9), %s3467_s4, 1 }
  0x1d   : > { %654 = sbr.rel (%p651_p9) target bundleno = 4515 (0x11a3), region = 108  ;;  %s4353_s25 = sld [smem:[#allocation12_spill]] (!%p651_p9) }
  0x1e   : > { %s4354_s30 = sld [smem:[#allocation13_spill]] (!%p651_p9)  ;;  %s3290_s2 = smov (!%p651_p9), 72  }
  0x1f   : > { %s4355_s23 = sld [smem:[#allocation18_spill]] (!%p651_p9)  ;;  %s4325_s0 = smov (!%p651_p9), 104  }
  0x20   : > { %s4328_s29 = smov (!%p651_p9), 112   ;;  %s4357_s7 = sld [smem:[#allocation19_spill]] (!%p651_p9) }
  0x21   : > { %s4358_s8 = sld [smem:[#allocation20_spill]] (!%p651_p9) }
  0x22   : > { %v3001_v0 = vld [vmem:[%s4352_s27 + $0x8] sm:$0xff]  ;;  %v3000_v1 = vld [vmem:[%s4352_s27] sm:$0xff]  ;;  %s3502_s5 = scalar_select %p727_p10, %s3467_s4, 1  ;;  %vm4330_vm0 = vcmask 261120   ;;  %vm4332_vm1 = vcmask 1043456   ;;  %vm4331_vm2 = vcmask 64512  }
  0x23   : > { %817 = vmatpush.bf16.msra.mxu0 %v3001_v0  ;;  %s3291_s27 = smov 80   ;;  %v922_v12 = vld [vmem:[%s4298_s9] sm:$0xf]  ;;  %vm1733_vm7 = vcmask 326944   ;;  %vm1502_vm8 = vcmask 294144  }
  0x24   : > { %s3505_s24 = sshll.u32 %s3502_s5, 3  ;;  %v1005_v14 = vsel %vm4332_vm1, %v922_v12, 0 }
  0x25   : > { %s730_s26 = scalar_lea.vmem %s4353_s25, %s3505_s24  ;;  %s734_s6 = scalar_lea.vmem %s4354_s30, %s3505_s24  ;;  %v3173_v6 = vld [vmem:[%s4355_s23] ss:$0 sm:$0xff] }
  0x26   : > { %v3515_v2 = vld [vmem:[%s730_s26] sm:$0xff]  ;;  %s4356_s25 = sld [smem:[#allocation14_spill]]  ;;  %s4323_s26 = smov 96   ;;  %v3003_v18 = vld [vmem:[%s4357_s7 + $0x8] sm:$0xff] }
  0x27   : > { %818 = vmatpush.bf16.msra.mxu0 %v3000_v1  ;;  %v3517_v3 = vld [vmem:[%s734_s6] sm:$0xff]  ;;  %s3288_s6 = smov 120   ;;  %854 = vmatpush.bf16.msra.mxu1 %v3003_v18  ;;  %v828_v20 = vpack.c.bf16 %v3515_v2, %v3515_v2  ;;  %s4359_s23 = sld [smem:[#allocation15_spill]] }
  0x28   : > { %v785_v4 = vadd.f32 %v3517_v3, %v3515_v2  ;;  %v3002_v19 = vld [vmem:[%s4357_s7] sm:$0xff]  ;;  %s4367_s30 = smov 88  }
  0x29   : > { %v3175_v33 = vld [vmem:[%s4358_s8] ss:$0 sm:$0xff] }
  0x2a   : > { %v790_v5 = vpack.c.bf16 %v785_v4, %v785_v4 }
  0x2b   : > { %855 = vmatpush.bf16.msra.mxu1 %v3002_v19 }
  0x2c   : > { %2908 = vmatmul.msk.bf16.vlgmr.msra.gmra.mxu0 %vm4330_vm0, %v790_v5  ;;  %s737_s1 = scalar_lea.vmem %s4356_s25, %s3502_s5 }
  0x2d   : > { %v3174_v21 = vld [vmem:[%s737_s1] ss:$0 sm:$0xff]  ;;  %s3609_s3 = scalar_lea.vmem %s4359_s23, %s3505_s24  ;;  %s4360_s23 = sld [smem:[#allocation16_spill]] }
  0x2e   : > { %2917 = vmatmul.msk.bf16.vlgmr.msra.gmra.mxu1 %vm4330_vm0, %v828_v20  ;;  %s4382_s1 = smov 104  }
  0xa9   : > { %v820_v7 = vpop.f32.mrf.mxu0 }
  0xaa   : > { %v821_v8 = vadd.f32 %v3173_v6, %v820_v7 }
  0xab   : > { %v857_v29 = vpop.f32.mrf.mxu1 }
  0xac   : > { %v861_v9 = vpack.c.bf16 %v821_v8, %v821_v8  ;;  %v858_v34 = vadd.f32 %v3175_v33, %v857_v29  ;;  %v981_v29 = vld [vmem:[%s4298_s9 + $0x4] sm:$0xf] }
  0xae   : > { %923 = vrot.lane.b32.xlu2 %v861_v9, %s3288_s6  ;;  %867 = vrot.lane.b32.xlu0 %v861_v9, %s4323_s26  ;;  %v3560_v35 = vpack.c.bf16 %v858_v34, %v858_v34  ;;  %s2999_s26 = sshll.u32 %s3502_s5, 8  ;;  %s4361_s5 = smov 112  }
  0xb0   : > { %v906_v36 = vsel %vm4332_vm1, %v3560_v35, 0 }
  0xb1   : > { %v822_v10 = vpop.f32.mrf.mxu0  ;;  %915 = vmatpush.bf16.msra.mxu3 %v906_v36 }
  0xb3   : > { %v859_v32 = vpop.f32.mrf.mxu1 }
  0xb6   : > { %1100 = vrot.lane.b32.xlu2 %v861_v9, %s3290_s2 }
  0xbe   : > { %1022 = vrot.lane.b32.xlu2 %v861_v9, %s3291_s27  ;;  %s4327_s27 = smov 88  }
  0xc6   : > { %1098 = vrot.lane.b32.xlu2 %v861_v9, %s4325_s0 }
  0xce   : > { %1020 = vrot.lane.b32.xlu2 %v861_v9, %s4328_s29 }
 0x108   : > { %v924_v11 = vpop.permute.xlu2 %923 }
 0x110   : > { %v1101_v16 = vpop.permute.xlu2 %1100 }
 0x111   : > { %v1106_v17 = vsel %vm4331_vm2, %v1101_v16, 0 }
 0x118   : > { %v1023_v41 = vpop.permute.xlu2 %1022 }
 0x119   : > { %v1028_v44 = vsel %vm4331_vm2, %v1023_v41, 0 }
 0x120   : > { %v868_v13 = vpop.permute.xlu0 %867  ;;  %v1099_v45 = vpop.permute.xlu2 %1098 }
 0x121   : > { %v874_v15 = vsel %vm4331_vm2, %v868_v13, 0 }
 0x122   : > { %883 = vmatpush.bf16.xpose.msra.mxu2 %v874_v15 }
 0x128   : > { %v1021_v46 = vpop.permute.xlu2 %1020 }
 0x129   : > { %2918 = vmatmul.msk.bf16.vlgmr.msra.gmra.mxu2 %vm4331_vm2, %v861_v9 }
 0x12a   : > { %1014 = vmatpush.bf16.msrb.mxu2 %v1005_v14 }
 0x12e   : > { %1115 = vmatpush.bf16.xpose.msra.mxu2 %v1106_v17 }
 0x1ac   : > { %v885_v22 = vpop.f32.mrf.mxu2 }
 0x1ad   : > { %v886_v23 = vadd.f32 %v3174_v21, %v885_v22 }
 0x1af   : > { %v889_v24 = vsel %vm4331_vm2, %v886_v23, -inf }
 0x1b0   : > { %890 = vmax.xlane.f32.xlu0 %v889_v24 }
 0x1b4   : > { %v887_v25 = vpop.f32.mrf.mxu2 }
 0x223   : > { %v891_v26 = vpop.xlane.xlu0 %890 }
 0x224   : > { %v892_v27 = vsub.f32 %v886_v23, %v891_v26 }
 0x226   : > { %v893_v28 = vmul.f32 1.442695, %v892_v27 }
 0x228   : > { %3182 = vpow2.f32 %v893_v28 }
 0x22e   : > { %v3183_v30 = vpop.eup %3182 }
 0x22f   : > { %v895_v31 = vsel %vm4331_vm2, %v3183_v30, 0.0 }
 0x230   : > { %896 = vadd.xlane.f32.xlu1 %v895_v31  ;;  %v1077_v31 = vld [vmem:[%s4298_s9 + $0x8] sm:$0xf] }
 0x231   : > { %v1082_v32 = vsel %vm4332_vm1, %v1077_v31, 0 }
 0x249   : > { %925 = vrot.lane.b32.xlu1 %v861_v9, %s4327_s27  ;;  %s4362_s27 = smov 96  }
 0x2a3   : > { %v897_v37 = vpop.xlane.xlu1 %896 }
 0x2a4   : > { %3184 = vrcp.f32 %v897_v37 }
 0x2aa   : > { %v3185_v38 = vpop.eup %3184 }
 0x2ab   : > { %v899_v39 = vmul.f32 %v3185_v38, %v3183_v30  ;;  %v986_v30 = vsel %vm4332_vm1, %v981_v29, 0 }
 0x2ac   : > { %995 = vmatpush.bf16.msrb.mxu1 %v986_v30 }
 0x2ad   : > { %v900_v40 = vpack.c.bf16 %v899_v39, %v899_v39 }
 0x2af   : > { %2919 = vmatmul.msk.bf16.vlgmr.msra.gmra.mxu3 %vm4331_vm2, %v900_v40 }
 0x2b0   : > { %1091 = vmatpush.bf16.msra.mxu1 %v1082_v32 }
 0x2bb   : > { %v926_v42 = vpop.permute.xlu1 %925 }
 0x2bc   : > { %v931_v43 = vsel %vm4331_vm2, %v926_v42, 0 }
 0x2bd   : > { %940 = vmatpush.bf16.xpose.msrb.mxu3 %v931_v43 }
 0x2c4   : > { %2920 = vmatmul.msk.bf16.vlgmr.msrb.gmra.mxu3 %vm4331_vm2, %v924_v11 }
 0x2c5   : > { %1037 = vmatpush.bf16.xpose.msra.mxu3 %v1028_v44 }
 0x2d4   : > { %2924 = vmatmul.msk.bf16.vlgmr.msra.gmra.mxu3 %vm4331_vm2, %v1021_v46 }
 0x332   : > { %v917_v47 = vpop.f32.mrf.mxu3 }
 0x333   : > { %v921_v48 = vpack.c.bf16 %v917_v47, %v917_v47  ;;  %v3612_v47 = vld [vmem:[%s3609_s3] sm:$0xff] }
 0x335   : > { %2923 = vmatmul.msk.bf16.vlgmr.msrb.gmra.mxu2 %vm4331_vm2, %v921_v48  ;;  %v3295_v48 = vmov 0  }
 0x336   : > { %3106 = vset.pattern.permute.xlu2 %v3295_v48 }
 0x33a   : > { %v919_v49 = vpop.f32.mrf.mxu3 }
 0x345   : > { %2927 = vmatmul.msk.bf16.vlgmr.msra.gmra.mxu2 %vm4331_vm2, %v1099_v45  ;;  %v1155_v45 = vld [vmem:[%s4298_s9 + $0xc] sm:$0xf] }
 0x346   : > { %v1160_v46 = vsel %vm4332_vm1, %v1155_v45, 0 }
 0x347   : > { %v942_v50 = vpop.f32.mrf.mxu3 }
 0x348   : > { %v943_v51 = vadd.f32 %v3174_v21, %v942_v50 }
 0x34a   : > { %v946_v52 = vsel %vm4331_vm2, %v943_v51, -inf }
 0x34b   : > { %947 = vmax.xlane.f32.xlu1 %v946_v52 }
 0x34f   : > { %v944_v53 = vpop.f32.mrf.mxu3 }
 0x357   : > { %v1039_v54 = vpop.f32.mrf.mxu3 }
 0x358   : > { %v1040_v55 = vadd.f32 %v3174_v21, %v1039_v54 }
 0x35a   : > { %v1043_v56 = vsel %vm4331_vm2, %v1040_v55, -inf }
 0x35b   : > { %1044 = vmax.xlane.f32.xlu0 %v1043_v56 }
 0x35f   : > { %v1041_v57 = vpop.f32.mrf.mxu3 }
 0x3b8   : > { %v3573_v58 = vpop.f32.mrf.mxu2 }
 0x3be   : > { %v948_v59 = vpop.xlane.xlu1 %947 }
 0x3bf   : > { %v949_v60 = vsub.f32 %v943_v51, %v948_v59 }
 0x3c0   : > { %v1018_v61 = vpop.f32.mrf.mxu2 }
 0x3c1   : > { %v950_v62 = vmul.f32 1.442695, %v949_v60  ;;  %v3176_v60 = vld [vmem:[%s4299_s10] ss:$0 sm:$0xff] }
 0x3c3   : > { %3186 = vpow2.f32 %v950_v62 }
 0x3c8   : > { %v1117_v63 = vpop.f32.mrf.mxu2 }
 0x3c9   : > { %v3187_v0 = vpop.eup %3186  ;;  %v1118_v1 = vadd.f32 %v3174_v21, %v1117_v63 }
 0x3ca   : > { %v952_v4 = vsel %vm4331_vm2, %v3187_v0, 0.0 }
 0x3cb   : > { %953 = vadd.xlane.f32.xlu0 %v952_v4  ;;  %v1121_v5 = vsel %vm4331_vm2, %v1118_v1, -inf }
 0x3cc   : > { %1122 = vmax.xlane.f32.xlu2 %v1121_v5  ;;  %v3296_v5 = vmov 32.0  }
 0x3ce   : > { %v1045_v6 = vpop.xlane.xlu0 %1044 }
 0x3cf   : > { %v1046_v7 = vsub.f32 %v1040_v55, %v1045_v6  ;;  %v3004_v6 = vld [vmem:[%s4301_s12] sm:$0xff] }
 0x3d0   : > { %v1119_v8 = vpop.f32.mrf.mxu2 }
 0x3d1   : > { %v1047_v9 = vmul.f32 1.442695, %v1046_v7 }
 0x3d3   : > { %3188 = vpow2.f32 %v1047_v9 }
 0x3d9   : > { %v3189_v10 = vpop.eup %3188 }
 0x3da   : > { %v1049_v11 = vsel %vm4331_vm2, %v3189_v10, 0.0 }
 0x3db   : > { %1050 = vadd.xlane.f32.xlu2 %v1049_v11 }
 0x3df   : > { %959 = vrot.lane.b32.xlu0 %v3560_v35, %s3288_s6 }
 0x3e7   : > { %1055 = vrot.lane.b32.xlu0 %v3560_v35, %s4328_s29  ;;  %s3299_s29 = smov 16  }
 0x3f3   : > { %1183 = vperm.xlu2 %3106, %v3612_v47  }
 0x43e   : > { %v954_v15 = vpop.xlane.xlu0 %953 }
 0x43f   : > { %v1123_v12 = vpop.xlane.xlu2 %1122 }
 0x440   : > { %v1124_v13 = vsub.f32 %v1118_v1, %v1123_v12 }
 0x442   : > { %v1125_v14 = vmul.f32 1.442695, %v1124_v13 }
 0x444   : > { %3190 = vpow2.f32 %v1125_v14 }
 0x445   : > { %3192 = vrcp.f32 %v954_v15 }
 0x44a   : > { %v3191_v16 = vpop.eup %3190 }
 0x44b   : > { %v1127_v17 = vsel %vm4331_vm2, %v3191_v16, 0.0  ;;  %v3193_v18 = vpop.eup %3192 }
 0x44c   : > { %1128 = vadd.xlane.f32.xlu1 %v1127_v17  ;;  %v956_v19 = vmul.f32 %v3193_v18, %v3187_v0 }
 0x44e   : > { %v1051_v22 = vpop.xlane.xlu2 %1050  ;;  %v957_v23 = vpack.c.bf16 %v956_v19, %v956_v19 }
 0x44f   : > { %3194 = vrcp.f32 %v1051_v22 }
 0x451   : > { %v960_v20 = vpop.permute.xlu0 %959 }
 0x452   : > { %v965_v21 = vsel %vm4332_vm1, %v960_v20, 0 }
 0x453   : > { %974 = vmatpush.bf16.msrb.mxu0 %v965_v21 }
 0x455   : > { %v3195_v26 = vpop.eup %3194 }
 0x456   : > { %2921 = vmatmul.msk.bf16.vlgmr.msrb.gmra.mxu0 %vm4331_vm2, %v957_v23  ;;  %v1053_v27 = vmul.f32 %v3195_v26, %v3189_v10  ;;  %v1184_v59 = vpop.permute.xlu2 %1183 }
 0x457   : > { %v1186_v63 = vmul.f32 %v1184_v59, %v3515_v2  ;;  %v3005_v2 = vld [vmem:[%s4301_s12 + $0x8] sm:$0xff] }
 0x458   : > { %v1054_v28 = vpack.c.bf16 %v1053_v27, %v1053_v27  ;;  %3015 = vmatpush.bf16.msrb.mxu2 %v3005_v2 }
 0x459   : > { %v1056_v24 = vpop.permute.xlu0 %1055 }
 0x45a   : > { %v1061_v25 = vsel %vm4332_vm1, %v1056_v24, 0 }
 0x45b   : > { %1070 = vmatpush.bf16.msra.mxu0 %v1061_v25 }
 0x45c   : > { %3018 = vmatpush.bf16.msrb.mxu2 %v3004_v6 }
 0x45f   : > { %1169 = vmatpush.bf16.msrb.mxu0 %v1160_v46 }
 0x465   : > { %1133 = vrot.lane.b32.xlu1 %v3560_v35, %s4325_s0  ;;  %s3627_s0 = scalar_lea.vmem %s4360_s23, %s2999_s26  ;;  %s3302_s26 = smov 92  }
 0x466   : > { %2925 = vmatmul.msk.bf16.vlgmr.msra.gmra.mxu0 %vm4331_vm2, %v1054_v28  ;;  %v758_v7 = vld [vmem:[%s3627_s0 + $0x30] sm:$0xff]  ;;  %v759_v8 = vld [vmem:[%s3627_s0 + $0x38] sm:$0xff]  ;;  %v760_v15 = vld [vmem:[%s3627_s0 + $0x40] sm:$0xff] }
 0x467   : > { %1312 = vmatpush.bf16.msra.mxu0 %v3005_v2  ;;  %v1229_v10 = vpack.c.bf16 %v759_v8, %v758_v7  ;;  %v780_v21 = vld [vmem:[%s3627_s0 + $0xe0] sm:$0xff]  ;;  %v781_v22 = vld [vmem:[%s3627_s0 + $0xe8] sm:$0xff]  ;;  %v762_v27 = vld [vmem:[%s3627_s0 + $0x50] sm:$0xff] }
 0x468   : > { %v1240_v23 = vpack.c.bf16 %v781_v22, %v780_v21  ;;  %v763_v28 = vld [vmem:[%s3627_s0 + $0x58] sm:$0xff]  ;;  %v764_v30 = vld [vmem:[%s3627_s0 + $0x60] sm:$0xff]  ;;  %v765_v31 = vld [vmem:[%s3627_s0 + $0x68] sm:$0xff] }
 0x469   : > { %v1231_v29 = vpack.c.bf16 %v763_v28, %v762_v27  ;;  %v1232_v32 = vpack.c.bf16 %v765_v31, %v764_v30  ;;  %v768_v46 = vld [vmem:[%s3627_s0 + $0x80] sm:$0xff]  ;;  %v753_v7 = vld [vmem:[%s3627_s0 + $0x8] sm:$0xff]  ;;  %v754_v22 = vld [vmem:[%s3627_s0 + $0x10] sm:$0xff] }
 0x46a   : > { %v777_v30 = vld [vmem:[%s3627_s0 + $0xc8] sm:$0xff]  ;;  %v756_v31 = vld [vmem:[%s3627_s0 + $0x20] sm:$0xff] }
 0x46b   : > { %1313 = vmatpush.bf16.msra.mxu0 %v3004_v6 }
 0x4bf   : > { %v1129_v33 = vpop.xlane.xlu1 %1128 }
 0x4c0   : > { %3196 = vrcp.f32 %v1129_v33  ;;  %v766_v33 = vld [vmem:[%s3627_s0 + $0x70] sm:$0xff] }
 0x4c1   : > { %3198 = vrcp.f32 %v3296_v5 }
 0x4c6   : > { %v3197_v34 = vpop.eup %3196 }
 0x4c7   : > { %v1131_v37 = vmul.f32 %v3197_v34, %v3191_v16  ;;  %v3199_v9 = vpop.eup %3198  ;;  %v761_v16 = vld [vmem:[%s3627_s0 + $0x48] sm:$0xff]  ;;  %v767_v34 = vld [vmem:[%s3627_s0 + $0x78] sm:$0xff] }
 0x4c8   : > { %v1192_v11 = vmul.f32 32.0, %v3199_v9  ;;  %vm1196_vm3 = vweird.f32 %v3199_v9  ;;  %v1230_v17 = vpack.c.bf16 %v761_v16, %v760_v15  ;;  %v772_v16 = vld [vmem:[%s3627_s0 + $0xa0] sm:$0xff] }
 0x4c9   : > { %v1132_v40 = vpack.c.bf16 %v1131_v37, %v1131_v37  ;;  %v783_v37 = vld [vmem:[%s3627_s0 + $0xf8] sm:$0xff] }
 0x4ca   : > { %v1193_v12 = vsub.f32 1.0, %v1192_v11 }
 0x4cc   : > { %v1194_v13 = vmul.f32 %v3199_v9, %v1193_v12 }
 0x4ce   : > { %v1195_v14 = vadd.f32 %v3199_v9, %v1194_v13 }
 0x4d0   : > { %v3640_v18 = vsel %vm1196_vm3, %v3199_v9, %v1195_v14 }
 0x4d3   : > { %v976_v35 = vpop.f32.mrf.mxu0 }
 0x4d4   : > { %v980_v36 = vpack.c.bf16 %v976_v35, %v976_v35  ;;  %v1233_v35 = vpack.c.bf16 %v767_v34, %v766_v33 }
 0x4d6   : > { %2922 = vmatmul.msk.bf16.vlgmr.msrb.gmra.mxu1 %vm4331_vm2, %v980_v36  ;;  %v782_v36 = vld [vmem:[%s3627_s0 + $0xf0] sm:$0xff] }
 0x4d7   : > { %v1134_v38 = vpop.permute.xlu1 %1133  ;;  %3014 = vmatpush.bf16.msrb.mxu1 %v3005_v2 }
 0x4d8   : > { %v1139_v39 = vsel %vm4332_vm1, %v1134_v38, 0  ;;  %v1241_v38 = vpack.c.bf16 %v783_v37, %v782_v36 }
 0x4d9   : > { %1148 = vmatpush.bf16.msrb.mxu3 %v1139_v39  ;;  %v778_v39 = vld [vmem:[%s3627_s0 + $0xd0] sm:$0xff] }
 0x4db   : > { %v978_v41 = vpop.f32.mrf.mxu0  ;;  %3017 = vmatpush.bf16.msrb.mxu1 %v3004_v6 }
 0x4dc   : > { %2928 = vmatmul.msk.bf16.vlgmr.msrb.gmra.mxu3 %vm4331_vm2, %v1132_v40  ;;  %v779_v40 = vld [vmem:[%s3627_s0 + $0xd8] sm:$0xff] }
 0x4dd   : > { %3016 = vmatpush.bf16.msra.mxu3 %v3005_v2  ;;  %v1239_v41 = vpack.c.bf16 %v779_v40, %v778_v39 }
 0x4df   : > { %2951 = vmatmul.msk.bf16.vlgmr.msrb.gmra.mxu2 %vm4330_vm0, %v1239_v41 }
 0x4e1   : > { %3019 = vmatpush.bf16.msra.mxu3 %v3004_v6  ;;  %v752_v6 = vld [vmem:[%s3627_s0] sm:$0xff] }
 0x4e2   : > { %v1226_v9 = vpack.c.bf16 %v753_v7, %v752_v6 }
 0x4e3   : > { %v1072_v42 = vpop.f32.mrf.mxu0 }
 0x4e4   : > { %v1076_v43 = vpack.c.bf16 %v1072_v42, %v1072_v42  ;;  %v3007_v42 = vld [vmem:[%s4303_s14 + $0x8] sm:$0xff] }
 0x4e5   : > { %1425 = vmatpush.bf16.msra.mxu2 %v3007_v42 }
 0x4e6   : > { %2926 = vmatmul.msk.bf16.vlgmr.msra.gmra.mxu1 %vm4331_vm2, %v1076_v43  ;;  %v3006_v43 = vld [vmem:[%s4303_s14] sm:$0xff] }
 0x4e9   : > { %1426 = vmatpush.bf16.msra.mxu2 %v3006_v43 }
 0x4eb   : > { %v1074_v44 = vpop.f32.mrf.mxu0 }
 0x4ec   : > { %2952 = vmatmul.msk.bf16.vlgmr.msra.gmra.mxu3 %vm4330_vm0, %v1240_v23  ;;  %v755_v23 = vld [vmem:[%s3627_s0 + $0x18] sm:$0xff] }
 0x4f6   : > { %2941 = vmatmul.msk.bf16.vlgmr.msrb.gmra.mxu1 %vm4330_vm0, %v1229_v10 }
 0x4fc   : > { %2953 = vmatmul.msk.bf16.gmra.mxu3 %vm4330_vm0, %v1241_v38 }
 0x506   : > { %2942 = vmatmul.msk.bf16.gmra.mxu1 %vm4330_vm0, %v1230_v17  ;;  %v773_v17 = vld [vmem:[%s3627_s0 + $0xa8] sm:$0xff] }
 0x507   : > { %v1236_v21 = vpack.c.bf16 %v773_v17, %v772_v16  ;;  %v3178_v16 = vld [vmem:[%s4304_s15] ss:$0 sm:$0xff] }
 0x516   : > { %2943 = vmatmul.msk.bf16.gmra.mxu1 %vm4330_vm0, %v1231_v29  ;;  %v776_v29 = vld [vmem:[%s3627_s0 + $0xc0] sm:$0xff] }
 0x526   : > { %2944 = vmatmul.msk.bf16.gmra.mxu1 %vm4330_vm0, %v1232_v32  ;;  %v757_v32 = vld [vmem:[%s3627_s0 + $0x28] sm:$0xff] }
 0x527   : > { %v1228_v34 = vpack.c.bf16 %v757_v32, %v756_v31 }
 0x536   : > { %2945 = vmatmul.msk.bf16.gmra.mxu1 %vm4330_vm0, %v1233_v35  ;;  %v1238_v35 = vpack.c.bf16 %v777_v30, %v776_v29 }
 0x553   : > { %v997_v49 = vpop.f32.mrf.mxu1 }
 0x554   : > { %v1017_v53 = vadd.f32 %v3573_v58, %v997_v49  ;;  %v769_v49 = vld [vmem:[%s3627_s0 + $0x88] sm:$0xff] }
 0x55b   : > { %v999_v50 = vpop.f32.mrf.mxu1 }
 0x55f   : > { %v1150_v51 = vpop.f32.mrf.mxu3 }
 0x560   : > { %v1154_v52 = vpack.c.bf16 %v1150_v51, %v1150_v51  ;;  %v3297_v51 = vmov 2  }
 0x561   : > { %3108 = vset.pattern.permute.xlu0 %v3297_v51 }
 0x562   : > { %2929 = vmatmul.msk.bf16.vlgmr.msrb.gmra.mxu0 %vm4331_vm2, %v1154_v52  ;;  %v1234_v52 = vpack.c.bf16 %v769_v49, %v768_v46 }
 0x563   : > { %v1093_v54 = vpop.f32.mrf.mxu1 }
 0x564   : > { %v1097_v55 = vadd.f32 %v1093_v54, %v1017_v53  ;;  %v3298_v53 = vmov 3   ;;  %2946 = vmatmul.msk.bf16.gmra.mxu1 %vm4330_vm0, %v1234_v52 }
 0x565   : > { %3107 = vset.pattern.permute.xlu2 %v3298_v53 }
 0x566   : > { %1441 = vperm.xlu2 %3107, %v3612_v47  }
 0x567   : > { %v1152_v56 = vpop.f32.mrf.mxu3 }
 0x56b   : > { %v1095_v57 = vpop.f32.mrf.mxu1 }
 0x56f   : > { %v1385_v37 = vpop.f32.mrf.mxu3 }
 0x572   : > { %2938 = vmatmul.msk.bf16.vlgmr.msra.gmra.mxu0 %vm4330_vm0, %v1226_v9 }
 0x573   : > { %v1330_v50 = vpop.f32.mrf.mxu1 }
 0x577   : > { %v1387_v39 = vpop.f32.mrf.mxu3 }
 0x57b   : > { %v1332_v57 = vpop.f32.mrf.mxu1 }
 0x57f   : > { %v1390_v43 = vpop.f32.mrf.mxu3 }
 0x5df   : > { %v1171_v61 = vpop.f32.mrf.mxu0 }
 0x5e0   : > { %v1175_v62 = vadd.f32 %v1171_v61, %v1097_v55  ;;  %v3684_v55 = vld [vmem:[%s4302_s13] ss:$0 sm:$0xff] }
 0x5e1   : > { %v1331_v56 = vadd.f32 %v3684_v55, %v1330_v50  ;;  %v1333_v59 = vadd.f32 %v3684_v55, %v1332_v57  ;;  %v1386_v52 = vadd.f32 %v3684_v55, %v1385_v37 }
 0x5e2   : > { %v1180_v0 = vadd.f32 %v3176_v60, %v1175_v62 }
 0x5e3   : > { %v3688_v62 = vpack.c.bf16 %v1333_v59, %v1331_v56  ;;  %v1391_v59 = vadd.f32 %v3684_v55, %v1390_v43 }
 0x5e4   : > { %v1187_v1 = vadd.f32 %v1186_v63, %v1180_v0  ;;  %v771_v63 = vld [vmem:[%s3627_s0 + $0x98] sm:$0xff] }
 0x5e6   : > { %v1188_v58 = vsel %vm4330_vm0, %v1187_v1, 0.0 }
 0x5e7   : > { %1189 = vadd.xlane.f32.xlu0 %v1188_v58  ;;  %v1173_v4 = vpop.f32.mrf.mxu0 }
 0x5e8   : > { %v784_v4 = vld [vmem:[%s4300_s11] sm:$0x3f] }
 0x5e9   : > { %v1217_v8 = vperm.slane %v784_v4, 0  ;;  %v1219_v12 = vperm.slane %v784_v4, 1 }
 0x5fb   : > { %1434 = vperm.xlu0 %3108, %v3612_v47   ;;  %v770_v47 = vld [vmem:[%s3627_s0 + $0x90] sm:$0xff] }
 0x5fc   : > { %v1235_v58 = vpack.c.bf16 %v771_v63, %v770_v47 }
 0x5fe   : > { %2947 = vmatmul.msk.bf16.gmra.mxu1 %vm4330_vm0, %v1235_v58 }
 0x60e   : > { %2948 = vmatmul.msk.bf16.gmra.mxu1 %vm4330_vm0, %v1236_v21 }
 0x65a   : > { %v1190_v19 = vpop.xlane.xlu0 %1189 }
 0x65b   : > { %v1198_v20 = vmul.f32 %v3640_v18, %v1190_v19 }
 0x65d   : > { %v3646_v24 = vsub.f32 %v1187_v1, %v1198_v20  ;;  %v1335_v20 = vpop.f32.mrf.mxu1 }
 0x65f   : > { %v1200_v25 = vmul.f32 %v3646_v24, %v3646_v24 }
 0x661   : > { %v1201_v26 = vsel %vm4330_vm0, %v1200_v25, 0.0 }
 0x662   : > { %1202 = vadd.xlane.f32.xlu1 %v1201_v26  ;;  %v775_v26 = vld [vmem:[%s3627_s0 + $0xb8] sm:$0xff] }
 0x665   : > { %v1337_v25 = vpop.f32.mrf.mxu1 }
 0x66d   : > { %v1340_v28 = vpop.f32.mrf.mxu1  ;;  %v1435_v21 = vpop.permute.xlu0 %1434 }
 0x66e   : > { %v1341_v56 = vadd.f32 %v3684_v55, %v1340_v28 }
 0x675   : > { %v1342_v33 = vpop.f32.mrf.mxu1 }
 0x676   : > { %v1343_v57 = vadd.f32 %v3684_v55, %v1342_v33 }
 0x678   : > { %v3742_v58 = vpack.c.bf16 %v1343_v57, %v1341_v56 }
 0x67d   : > { %v1345_v36 = vpop.f32.mrf.mxu1 }
 0x685   : > { %v1347_v38 = vpop.f32.mrf.mxu1 }
 0x68d   : > { %v1350_v40 = vpop.f32.mrf.mxu1 }
 0x68e   : > { %v1351_v41 = vadd.f32 %v3684_v55, %v1350_v40 }
 0x695   : > { %v1352_v42 = vpop.f32.mrf.mxu1 }
 0x696   : > { %v1353_v46 = vadd.f32 %v3684_v55, %v1352_v42 }
 0x698   : > { %v3724_v49 = vpack.c.bf16 %v1353_v46, %v1351_v41 }
 0x69a   : > { %1949 = vrot.lane.b32.xlu1 %v3724_v49, %s3288_s6  ;;  %1705 = vmatpush.bf16.msrb.mxu3 %v3724_v49 }
 0x69d   : > { %v1355_v9 = vpop.f32.mrf.mxu1 }
 0x6d5   : > { %v1203_v44 = vpop.xlane.xlu1 %1202 }
 0x6d6   : > { %v1204_v45 = vmul.f32 %v1203_v44, %v3640_v18  ;;  %v1346_v44 = vadd.f32 %v3684_v55, %v1345_v36 }
 0x6d8   : > { %v1205_v54 = vadd.f32 1e-05, %v1204_v45  ;;  %v1348_v45 = vadd.f32 %v3684_v55, %v1347_v38 }
 0x6da   : > { %3200 = vrsqrt.f32 %v1205_v54  ;;  %vm1212_vm5 = vweird.f32 %v1205_v54  ;;  %v3726_v50 = vpack.c.bf16 %v1348_v45, %v1346_v44 }
 0x6dc   : > { %1706 = vmatpush.bf16.msrb.mxu3 %v3726_v50 }
 0x6e0   : > { %v3201_v60 = vpop.eup %3200  ;;  %1707 = vmatpush.bf16.msrb.mxu3 %v3742_v58 }
 0x6e1   : > { %v1207_v61 = vmul.f32 %v3201_v60, %v1205_v54  ;;  %vm1213_vm4 = vweird.f32 %v3201_v60  ;;  %v1388_v54 = vadd.f32 %v3684_v55, %v1387_v39  ;;  %v1315_v39 = vpop.f32.mrf.mxu0 }
 0x6e2   : > { %vm1214_vm6 = vmor %vm1212_vm5, %vm1213_vm4 }
 0x6e3   : > { %v1208_v0 = vmul.f32 %v3201_v60, %v1207_v61  ;;  %v1392_v61 = vpop.f32.mrf.mxu3  ;;  %v3736_v47 = vpack.c.bf16 %v1388_v54, %v1386_v52 }
 0x6e4   : > { %v1393_v63 = vadd.f32 %v3684_v55, %v1392_v61 }
 0x6e5   : > { %v1209_v1 = vmul.f32 0.5, %v1208_v0  ;;  %v1336_v0 = vadd.f32 %v3684_v55, %v1335_v20  ;;  %1963 = vrot.lane.b32.xlu1 %v3736_v47, %s3288_s6 }
 0x6e6   : > { %v3744_v4 = vpack.c.bf16 %v1393_v63, %v1391_v59 }
 0x6e7   : > { %v1210_v5 = vsub.f32 1.5, %v1209_v1  ;;  %v1338_v1 = vadd.f32 %v3684_v55, %v1337_v25 }
 0x6e8   : > { %1718 = vmatpush.bf16.msrb.mxu0 %v3744_v4 }
 0x6e9   : > { %v1211_v2 = vmul.f32 %v3201_v60, %v1210_v5  ;;  %v3749_v5 = vpack.c.bf16 %v1338_v1, %v1336_v0  ;;  %v1317_v44 = vpop.f32.mrf.mxu0 }
 0x6eb   : > { %v1215_v10 = vsel %vm1214_vm6, %v3201_v60, %v1211_v2  ;;  %v1380_v60 = vpop.f32.mrf.mxu2  ;;  %1708 = vmatpush.bf16.msrb.mxu3 %v3749_v5 }
 0x6ec   : > { %v1216_v11 = vmul.f32 %v1215_v10, %v3646_v24  ;;  %v1227_v24 = vpack.c.bf16 %v755_v23, %v754_v22  ;;  %v1381_v2 = vadd.f32 %v3684_v55, %v1380_v60  ;;  %1719 = vmatpush.bf16.msrb.mxu0 %v3736_v47  ;;  %v1357_v10 = vpop.f32.mrf.mxu1  ;;  %v1442_v22 = vpop.permute.xlu2 %1441 }
 0x6ee   : > { %v1218_v13 = vmul.f32 %v1217_v8, %v1216_v11  ;;  %2939 = vmatmul.msk.bf16.gmra.mxu0 %vm4330_vm0, %v1227_v24 }
 0x6ef   : > { %1709 = vmatpush.bf16.msrb.mxu3 %v3688_v62 }
 0x6f0   : > { %v3700_v14 = vadd.f32 %v1219_v12, %v1218_v13  ;;  %v1356_v12 = vadd.f32 %v3684_v55, %v1355_v9  ;;  %v1358_v13 = vadd.f32 %v3684_v55, %v1357_v10 }
 0x6f2   : > { %v1221_v15 = vadd.f32 %v3700_v14, %v3517_v3  ;;  %v774_v3 = vld [vmem:[%s3627_s0 + $0xb0] sm:$0xff]  ;;  %s3322_s0 = smov 84  }
 0x6f3   : > { %v1237_v27 = vpack.c.bf16 %v775_v26, %v774_v3  ;;  %v1382_v6 = vpop.f32.mrf.mxu2 }
 0x6f4   : > { %v1399_v19 = vpack.c.bf16 %v1221_v15, %v1221_v15  ;;  %v1383_v7 = vadd.f32 %v3684_v55, %v1382_v6  ;;  %v3764_v11 = vpop.f32.mrf.mxu1  ;;  %v3768_v15 = vpack.c.bf16 %v1358_v13, %v1356_v12 }
 0x6f5   : > { %2949 = vmatmul.msk.bf16.gmra.mxu1 %vm4330_vm0, %v1237_v27  ;;  %v1361_v10 = vadd.f32 %v3684_v55, %v3764_v11 }
 0x6f6   : > { %2962 = vmatmul.msk.bf16.vlgmr.msra.gmra.mxu2 %vm4330_vm0, %v1399_v19  ;;  %v3756_v8 = vpack.c.bf16 %v1383_v7, %v1381_v2 }
 0x6f8   : > { %1961 = vrot.lane.b32.xlu1 %v3756_v8, %s3288_s6  ;;  %1720 = vmatpush.bf16.msrb.mxu0 %v3756_v8 }
 0x6fc   : > { %v3773_v17 = vpop.f32.mrf.mxu1 }
 0x6fd   : > { %v1363_v12 = vadd.f32 %v3684_v55, %v3773_v17 }
 0x6fe   : > { %2940 = vmatmul.msk.bf16.gmra.mxu0 %vm4330_vm0, %v1228_v34 }
 0x700   : > { %1943 = vrot.lane.b32.xlu1 %v3749_v5, %s3288_s6 }
 0x704   : > { %v1365_v26 = vpop.f32.mrf.mxu1 }
 0x705   : > { %2950 = vmatmul.msk.bf16.gmra.mxu1 %vm4330_vm0, %v1238_v35  ;;  %v1366_v52 = vadd.f32 %v3684_v55, %v1365_v26 }
 0x70c   : > { %v1367_v35 = vpop.f32.mrf.mxu1 }
 0x70d   : > { %v1368_v54 = vadd.f32 %v3684_v55, %v1367_v35 }
 0x70f   : > { %v3803_v60 = vpack.c.bf16 %v1368_v54, %v1366_v52 }
 0x76b   : > { %v1320_v59 = vpop.f32.mrf.mxu0 }
 0x76c   : > { %v1321_v7 = vadd.f32 %v3684_v55, %v1320_v59 }
 0x772   : > { %v1370_v38 = vpop.f32.mrf.mxu1 }
 0x773   : > { %v1371_v40 = vadd.f32 %v3684_v55, %v1370_v38  ;;  %v1322_v2 = vpop.f32.mrf.mxu0 }
 0x774   : > { %v1323_v9 = vadd.f32 %v3684_v55, %v1322_v2  ;;  %v3309_v2 = vmov 1  }
 0x775   : > { %3118 = vset.pattern.permute.xlu0 %v3309_v2 }
 0x779   : > { %v1428_v19 = vpop.f32.mrf.mxu2 }
 0x77a   : > { %v3775_v20 = vadd.f32 %v3178_v16, %v1428_v19  ;;  %v1372_v42 = vpop.f32.mrf.mxu1  ;;  %v1950_v16 = vpop.permute.xlu1 %1949 }
 0x77b   : > { %v1373_v43 = vadd.f32 %v3684_v55, %v1372_v42  ;;  %v1325_v19 = vpop.f32.mrf.mxu0  ;;  %1983 = vmatpush.bf16.msrb.mxu2 %v1950_v16 }
 0x77c   : > { %v1432_v23 = vmul.f32 0.0625, %v3775_v20  ;;  %v1734_v24 = vsel %vm1733_vm7, %v3775_v20, -inf  ;;  %v1503_v25 = vsel %vm1502_vm8, %v3775_v20, -inf  ;;  %v1326_v11 = vadd.f32 %v3684_v55, %v1325_v19 }
 0x77d   : > { %1735 = vmax.xlane.f32.xlu0 %v1734_v24  ;;  %1504 = vmax.xlane.f32.xlu2 %v1503_v25  ;;  %v3790_v45 = vpack.c.bf16 %v1373_v43, %v1371_v40  ;;  %v1316_v25 = vadd.f32 %v3684_v55, %v1315_v39 }
 0x77e   : > { %v1437_v3 = vadd.f32 %v1435_v21, %v1432_v23  ;;  %v1444_v27 = vadd.f32 %v1442_v22, %v1432_v23  ;;  %v3827_v21 = vpack.c.bf16 %v1323_v9, %v1321_v7  ;;  %v3829_v22 = vpack.c.bf16 %v1363_v12, %v1361_v10 }
 0x77f   : > { %1957 = vrot.lane.b32.xlu1 %v3790_v45, %s3288_s6  ;;  %v3306_v10 = vmov 19  }
 0x780   : > { %v1438_v28 = vmul.f32 16.0, %v1437_v3  ;;  %v1445_v31 = vmul.f32 16.0, %v1444_v27  ;;  %v1318_v3 = vadd.f32 %v3684_v55, %v1317_v44  ;;  %v3300_v27 = vmov 16  }
 0x781   : > { %v1430_v29 = vpop.f32.mrf.mxu2  ;;  %3109 = vset.pattern.permute.xlu1 %v3300_v27 }
 0x782   : > { %v2963_v30 = vadd.f32 -0.5, %v1438_v28  ;;  %v2964_v34 = vadd.f32 -0.5, %v1445_v31  ;;  %v1375_v57 = vpop.f32.mrf.mxu1  ;;  %v3843_v26 = vpack.c.bf16 %v1318_v3, %v1316_v25  ;;  %v3301_v28 = vmov 17   ;;  %v1964_v35 = vpop.permute.xlu1 %1963 }
 0x783   : > { %v1376_v61 = vadd.f32 %v3684_v55, %v1375_v57  ;;  %v1327_v17 = vpop.f32.mrf.mxu0  ;;  %3110 = vset.pattern.permute.xlu2 %v3301_v28 }
 0x784   : > { %v1447_v32 = vfloor.f32 %v2963_v30  ;;  %v1448_v36 = vfloor.f32 %v2964_v34  ;;  %v1328_v23 = vadd.f32 %v3684_v55, %v1327_v17  ;;  %v3308_v17 = vmov 20  }
 0x786   : > { %v3780_v33 = vsub.f32 %v2963_v30, %v1447_v32  ;;  %v1450_v37 = vsub.f32 %v2964_v34, %v1448_v36  ;;  %v3786_v41 = vcvt.f32.s32 %v1447_v32  ;;  %v3796_v46 = vcvt.f32.s32 %v1448_v36 }
 0x787   : > { %1955 = vrot.lane.b32.xlu1 %v3803_v60, %s3288_s6  ;;  %v3838_v24 = vpack.c.bf16 %v1328_v23, %v1326_v11  ;;  %v3307_v11 = vmov 23  }
 0x788   : > { %v1471_v56 = vsub.f32 1.0, %v1450_v37  ;;  %vm1462_vm9 = vcmp.ge.s32.totalorder %v3796_v46, 4294967295  ;;  %vm1463_vm10 = vcmp.le.s32.totalorder %v3796_v46, 14  ;;  %vm1459_vm12 = vcmp.ge.s32.totalorder %v3796_v46, 0 }
 0x789   : > { %vm1464_vm11 = vmand %vm1462_vm9, %vm1463_vm10  ;;  %vm1460_vm13 = vcmp.le.s32.totalorder %v3796_v46, 15  ;;  %1710 = vmatpush.bf16.msrb.mxu3 %v3838_v24  ;;  %v1470_v42 = vsub.f32 1.0, %v3780_v33  ;;  %v1495_v54 = vmul.u32 16, %v3796_v46  ;;  %vm1453_vm15 = vcmp.ge.s32.totalorder %v3786_v41, 0 }
 0x78a   : > { %v1377_v63 = vpop.f32.mrf.mxu1  ;;  %v1481_v0 = vsel %vm1464_vm11, 1, %v3295_v48  ;;  %vm1461_vm14 = vmand %vm1459_vm12, %vm1460_vm13  ;;  %v1962_v39 = vpop.permute.xlu1 %1961  ;;  %vm1454_vm3 = vcmp.le.s32.totalorder %v3786_v41, 15  ;;  %vm1456_vm4 = vcmp.ge.s32.totalorder %v3786_v41, 4294967295  ;;  %vm1457_vm5 = vcmp.le.s32.totalorder %v3786_v41, 14 }
 0x78b   : > { %v1378_v1 = vadd.f32 %v3684_v55, %v1377_v63  ;;  %v1465_v13 = vsel %vm1461_vm14, 1, %v3295_v48  ;;  %vm3870_vm6 = vmand %vm1453_vm15, %vm1454_vm3  ;;  %vm2049_vm11 = vcmask 359744   ;;  %vm4333_vm15 = vcmask 31744  }
 0x78c   : > { %vm3874_vm7 = vmand %vm1456_vm4, %vm1457_vm5 }
 0x78d   : > { %v3813_v6 = vpack.c.bf16 %v1378_v1, %v1376_v61  ;;  %1711 = vmatpush.bf16.msrb.mxu3 %v3827_v21  ;;  %v3304_v1 = vmov 18  }
 0x78f   : > { %1721 = vmatpush.bf16.msrb.mxu0 %v3813_v6 }
 0x791   : > { %1487 = vrot.lane.b32.xlu0 %v1450_v37, %s4361_s5  ;;  %1712 = vmatpush.bf16.msrb.mxu3 %v3843_v26 }
 0x792   : > { %v1944_v23 = vpop.permute.xlu1 %1943 }
 0x793   : > { %1722 = vmatpush.bf16.msrb.mxu0 %v3790_v45 }
 0x795   : > { %1965 = vrot.lane.b32.xlu2 %v3744_v4, %s3288_s6 }
 0x797   : > { %1723 = vmatpush.bf16.msrb.mxu0 %v3803_v60 }
 0x799   : > { %1496 = vrot.lane.b32.xlu0 %v3786_v41, %s3299_s29  ;;  %v3305_v41 = vmov 22  }
 0x79b   : > { %1724 = vmatpush.bf16.msrb.mxu0 %v3829_v22 }
 0x79d   : > { %1947 = vrot.lane.b32.xlu2 %v3726_v50, %s3288_s6 }
 0x79f   : > { %1725 = vmatpush.bf16.msrb.mxu0 %v3768_v15 }
 0x7a1   : > { %1473 = vrot.lane.b32.xlu0 %v1471_v56, %s4361_s5 }
 0x7a5   : > { %1959 = vrot.lane.b32.xlu2 %v3813_v6, %s3288_s6 }
 0x7a9   : > { %1482 = vrot.lane.b32.xlu0 %v1481_v0, %s4361_s5  ;;  %v3303_v0 = vmov 21  }
 0x7ad   : > { %1937 = vrot.lane.b32.xlu2 %v3827_v21, %s3288_s6 }
 0x7b1   : > { %1466 = vrot.lane.b32.xlu0 %v1465_v13, %s4361_s5  ;;  %v2050_v13 = vsel %vm2049_vm11, %v3775_v20, -inf }
 0x7f0   : > { %v1505_v29 = vpop.xlane.xlu2 %1504  ;;  %v1736_v30 = vpop.xlane.xlu0 %1735 }
 0x7f1   : > { %v1506_v31 = vsub.f32 %v3775_v20, %v1505_v29  ;;  %v1737_v32 = vsub.f32 %v3775_v20, %v1736_v30  ;;  %v1958_v3 = vpop.permute.xlu1 %1957 }
 0x7f3   : > { %v1507_v34 = vmul.f32 1.442695, %v1506_v31  ;;  %v1738_v55 = vmul.f32 1.442695, %v1737_v32 }
 0x7f5   : > { %3202 = vpow2.f32 %v1507_v34 }
 0x7f6   : > { %3204 = vpow2.f32 %v1738_v55 }
 0x7f8   : > { %v1966_v36 = vpop.permute.xlu2 %1965 }
 0x7f9   : > { %1996 = vmatpush.bf16.msra.mxu3 %v1966_v36  ;;  %v1956_v27 = vpop.permute.xlu1 %1955 }
 0x7fb   : > { %v3849_v37 = vpop.eup %3202 }
 0x7fc   : > { %v3851_v38 = vpop.eup %3204  ;;  %1510 = vrot.lane.b32.xlu0 %v3849_v37, %s4362_s27 }
 0x7fd   : > { %1741 = vrot.lane.b32.xlu1 %v3851_v38, %s3302_s26  ;;  %1997 = vmatpush.bf16.msra.mxu3 %v1964_v35 }
 0x800   : > { %v1948_v40 = vpop.permute.xlu2 %1947 }
 0x801   : > { %1998 = vmatpush.bf16.msra.mxu3 %v1962_v39  ;;  %1984 = vmatpush.bf16.msrb.mxu2 %v1948_v40 }
 0x803   : > { %v1488_v43 = vpop.permute.xlu0 %1487 }
 0x804   : > { %v1490_v44 = vmul.f32 %v1488_v43, %v1470_v42  ;;  %v1493_v52 = vmul.f32 %v1488_v43, %v3780_v33 }
 0x808   : > { %v1960_v25 = vpop.permute.xlu2 %1959 }
 0x809   : > { %1999 = vmatpush.bf16.msra.mxu3 %v1960_v25  ;;  %v3312_v25 = vmov 6  }
 0x80b   : > { %v1497_v56 = vpop.permute.xlu0 %1496 }
 0x80c   : > { %v3859_v57 = vadd.s32 %v1497_v56, %v1495_v54 }
 0x80d   : > { %2000 = vmatpush.bf16.msra.mxu3 %v1958_v3 }
 0x80e   : > { %1571 = vperm.xlu2 %3110, %v3859_v57   ;;  %1528 = vperm.xlu1 %3109, %v3859_v57  }
 0x810   : > { %v1938_v55 = vpop.permute.xlu2 %1937 }
 0x811   : > { %2001 = vmatpush.bf16.msra.mxu3 %v1956_v27 }
 0x813   : > { %v1474_v59 = vpop.permute.xlu0 %1473 }
 0x814   : > { %v1476_v61 = vmul.f32 %v1474_v59, %v1470_v42  ;;  %v1479_v63 = vmul.f32 %v1474_v59, %v3780_v33 }
 0x816   : > { %3114 = vset.pattern.permute.xlu2 %v3303_v0  ;;  %3111 = vset.pattern.permute.xlu1 %v3304_v1 }
 0x817   : > { %1801 = vperm.xlu2 %3114, %v3859_v57   ;;  %1610 = vperm.xlu1 %3111, %v3859_v57  }
 0x81b   : > { %v1483_v33 = vpop.permute.xlu0 %1482 }
 0x81c   : > { %vm1484_vm8 = vcmp.ne.s32.totalorder %v1483_v33, 0 }
 0x81d   : > { %vm1485_vm9 = vmand %vm3870_vm6, %vm1484_vm8 }
 0x81e   : > { %v3880_v7 = vsel %vm1485_vm9, %v1490_v44, 0.0  ;;  %vm1492_vm10 = vmand %vm3874_vm7, %vm1484_vm8 }
 0x81f   : > { %v3884_v9 = vsel %vm1492_vm10, %v1493_v52, 0.0  ;;  %3115 = vset.pattern.permute.xlu2 %v3305_v41  ;;  %3112 = vset.pattern.permute.xlu1 %v3306_v10 }
 0x820   : > { %1840 = vperm.xlu2 %3115, %v3859_v57   ;;  %1649 = vperm.xlu1 %3112, %v3859_v57  }
 0x823   : > { %v1467_v12 = vpop.permute.xlu0 %1466 }
 0x824   : > { %vm1468_vm12 = vcmp.ne.s32.totalorder %v1467_v12, 0 }
 0x825   : > { %vm1469_vm13 = vmand %vm3870_vm6, %vm1468_vm12 }
 0x826   : > { %v3891_v16 = vsel %vm1469_vm13, %v1476_v61, 0.0  ;;  %vm1478_vm14 = vmand %vm3874_vm7, %vm1468_vm12  ;;  %2051 = vmax.xlane.f32.xlu0 %v2050_v13 }
 0x827   : > { %v3895_v19 = vsel %vm1478_vm14, %v1479_v63, 0.0 }
 0x828   : > { %3116 = vset.pattern.permute.xlu2 %v3307_v11  ;;  %3113 = vset.pattern.permute.xlu1 %v3308_v17  ;;  %v3310_v17 = vmov 4  }
 0x829   : > { %1879 = vperm.xlu2 %3116, %v3859_v57   ;;  %1758 = vperm.xlu1 %3113, %v3859_v57  }
 0x831   : > { %3117 = vset.pattern.permute.xlu2 %v3295_v48  ;;  %3119 = vset.pattern.permute.xlu1 %v3295_v48 }
 0x83a   : > { %1945 = vrot.lane.b32.xlu0 %v3742_v58, %s3288_s6 }
 0x842   : > { %1941 = vrot.lane.b32.xlu0 %v3688_v62, %s3288_s6 }
 0x84a   : > { %1939 = vrot.lane.b32.xlu0 %v3838_v24, %s3288_s6 }
 0x852   : > { %1953 = vrot.lane.b32.xlu0 %v3829_v22, %s3288_s6 }
 0x868   : > { %v3915_v40 = vpop.permute.xlu2 %1571 }
 0x86e   : > { %v1511_v28 = vpop.permute.xlu0 %1510 }
 0x86f   : > { %v1742_v29 = vpop.permute.xlu1 %1741  ;;  %v1514_v30 = vsel %vm4333_vm15, %v1511_v28, 0.0 }
 0x870   : > { %1515 = vadd.xlane.f32.xlu1 %v1514_v30  ;;  %v1744_v31 = vsel %vm4333_vm15, %v1742_v29, 0.0 }
 0x871   : > { %1745 = vadd.xlane.f32.xlu2 %v1744_v31  ;;  %v3919_v44 = vpop.permute.xlu2 %1801 }
 0x87a   : > { %v3923_v54 = vpop.permute.xlu2 %1840 }
 0x880   : > { %v3913_v39 = vpop.permute.xlu1 %1528 }
 0x883   : > { %v3927_v59 = vpop.permute.xlu2 %1879 }
 0x889   : > { %v3917_v43 = vpop.permute.xlu1 %1610 }
 0x892   : > { %v3921_v52 = vpop.permute.xlu1 %1649 }
 0x899   : > { %v3911_v32 = vpop.xlane.xlu0 %2051 }
 0x89a   : > { %v2053_v29 = vsub.f32 %v3775_v20, %v3911_v32 }
 0x89b   : > { %v3925_v56 = vpop.permute.xlu1 %1758 }
 0x89c   : > { %v2054_v31 = vmul.f32 1.442695, %v2053_v29 }
 0x8ac   : > { %v1946_v34 = vpop.permute.xlu0 %1945 }
 0x8ad   : > { %1985 = vmatpush.bf16.msrb.mxu2 %v1946_v34 }
 0x8b1   : > { %1986 = vmatpush.bf16.msrb.mxu2 %v1944_v23 }
 0x8b4   : > { %v1942_v35 = vpop.permute.xlu0 %1941 }
 0x8b5   : > { %1987 = vmatpush.bf16.msrb.mxu2 %v1942_v35 }
 0x8bc   : > { %v1940_v36 = vpop.permute.xlu0 %1939 }
 0x8bd   : > { %1988 = vmatpush.bf16.msrb.mxu2 %v1940_v36 }
 0x8c1   : > { %1989 = vmatpush.bf16.msrb.mxu2 %v1938_v55 }
 0x8c4   : > { %v1954_v42 = vpop.permute.xlu0 %1953 }
 0x8c5   : > { %2002 = vmatpush.bf16.msra.mxu3 %v1954_v42  ;;  %v1499_v42 = vlaneseq }
 0x8e3   : > { %v1516_v61 = vpop.xlane.xlu1 %1515 }
 0x8e4   : > { %v1746_v63 = vpop.xlane.xlu2 %1745  ;;  %3206 = vrcp.f32 %v1516_v61 }
 0x8e5   : > { %3208 = vrcp.f32 %v1746_v63 }
 0x8e6   : > { %3210 = vpow2.f32 %v2054_v31 }
 0x8ea   : > { %v3207_v0 = vpop.eup %3206 }
 0x8eb   : > { %v3209_v1 = vpop.eup %3208  ;;  %v1518_v46 = vmul.f32 %v3207_v0, %v3849_v37  ;;  %v3966_v0 = vand.u32 127, %v1499_v42 }
 0x8ec   : > { %v1748_v33 = vmul.f32 %v3209_v1, %v3851_v38  ;;  %v3960_v36 = vpop.eup %3210 }
 0x8ed   : > { %1520 = vrot.lane.b32.xlu1 %v1518_v46, %s4362_s27  ;;  %v3969_v1 = vadd.s32 128, %v3966_v0 }
 0x8ee   : > { %1750 = vrot.lane.b32.xlu2 %v1748_v33, %s4362_s27 }
 0x948   : > { %v1751_v38 = vpop.permute.xlu2 %1750 }
 0x949   : > { %v1756_v11 = vmul.f32 %v1751_v38, %v3884_v9  ;;  %v1754_v23 = vmul.f32 %v1751_v38, %v3895_v19  ;;  %v1753_v3 = vmul.f32 %v1751_v38, %v3891_v16 }
 0x95f   : > { %v1521_v41 = vpop.permute.xlu1 %1520 }
 0x960   : > { %v1525_v10 = vmul.f32 %v1521_v41, %v3880_v7  ;;  %v1526_v12 = vmul.f32 %v1521_v41, %v3884_v9  ;;  %v1524_v13 = vmul.f32 %v1521_v41, %v3895_v19  ;;  %v1523_v37 = vmul.f32 %v1521_v41, %v3891_v16 }
 0x961   : > { %v1573_v41 = vsub.s32 %v3966_v0, %v3915_v40 }
 0x962   : > { %1584 = vperm.xlu0 %3118, %v1526_v12   ;;  %1542 = vperm.xlu2 %3117, %v1526_v12  }
 0x963   : > { %1549 = vperm.xlu1 %3119, %v1525_v10   ;;  %vm1581_vm3 = vcmp.eq.s32.totalorder %v1573_v41, 17  ;;  %vm4372_vm7 = vcmp.eq.s32.totalorder %v1573_v41, 1 }
 0x96a   : > { %3126 = vset.pattern.permute.xlu0 %v3297_v51  ;;  %3120 = vset.pattern.permute.xlu2 %v3309_v2 }
 0x96b   : > { %3122 = vset.pattern.permute.xlu1 %v3309_v2  ;;  %1629 = vperm.xlu0 %3126, %v1525_v10  }
 0x96c   : > { %1590 = vperm.xlu2 %3120, %v1525_v10   ;;  %1596 = vperm.xlu1 %3122, %v1524_v13  }
 0x973   : > { %3129 = vset.pattern.permute.xlu0 %v3298_v53 }
 0x974   : > { %3121 = vset.pattern.permute.xlu2 %v3295_v48  ;;  %3124 = vset.pattern.permute.xlu1 %v3295_v48  ;;  %v3311_v48 = vmov 5  }
 0x975   : > { %1556 = vperm.xlu2 %3121, %v1524_v13   ;;  %1680 = vperm.xlu0 %3129, %v1523_v37  }
 0x976   : > { %1563 = vperm.xlu1 %3124, %v1523_v37  }
 0x97d   : > { %3123 = vset.pattern.permute.xlu2 %v3297_v51  ;;  %3130 = vset.pattern.permute.xlu0 %v3310_v17 }
 0x97e   : > { %3127 = vset.pattern.permute.xlu1 %v3297_v51  ;;  %1623 = vperm.xlu2 %3123, %v1526_v12   ;;  %v1755_v51 = vmul.f32 %v1751_v38, %v3880_v7  ;;  %v1612_v38 = vsub.s32 %v3966_v0, %v3917_v43 }
 0x97f   : > { %1772 = vperm.xlu0 %3130, %v1756_v11   ;;  %1635 = vperm.xlu1 %3127, %v1524_v13  }
 0x980   : > { %vm1620_vm6 = vcmp.eq.s32.totalorder %v1612_v38, 17  ;;  %vm1618_vm14 = vcmp.eq.s32.totalorder %v1612_v38, 16  ;;  %vm1616_vm2 = vcmp.eq.s32.totalorder %v1612_v38, 1  ;;  %vm1614_vm8 = vcmp.eq.s32.totalorder %v1612_v38, 0 }
 0x986   : > { %3125 = vset.pattern.permute.xlu2 %v3309_v2 }
 0x987   : > { %3133 = vset.pattern.permute.xlu0 %v3311_v48  ;;  %1641 = vperm.xlu1 %3127, %v1523_v37  }
 0x988   : > { %1826 = vperm.xlu0 %3133, %v1754_v23   ;;  %1602 = vperm.xlu2 %3125, %v1523_v37  }
 0x98f   : > { %3131 = vset.pattern.permute.xlu1 %v3311_v48 }
 0x990   : > { %3137 = vset.pattern.permute.xlu0 %v3312_v25  ;;  %3128 = vset.pattern.permute.xlu2 %v3298_v53  ;;  %v3313_v53 = vmov 7  }
 0x991   : > { %1814 = vperm.xlu1 %3131, %v1756_v11   ;;  %1865 = vperm.xlu0 %3137, %v1754_v23  }
 0x992   : > { %1662 = vperm.xlu2 %3128, %v1526_v12   ;;  %v1530_v12 = vsub.s32 %v3966_v0, %v3913_v39 }
 0x994   : > { %vm1538_vm9 = vcmp.eq.s32.totalorder %v1530_v12, 17  ;;  %vm1536_vm11 = vcmp.eq.s32.totalorder %v1530_v12, 16  ;;  %vm1534_vm1 = vcmp.eq.s32.totalorder %v1530_v12, 1 }
 0x999   : > { %1820 = vperm.xlu1 %3131, %v1755_v51   ;;  %1935 = vrot.lane.b32.xlu0 %v3843_v26, %s3288_s6 }
 0x99a   : > { %1668 = vperm.xlu2 %3128, %v1525_v10   ;;  %v1574_v10 = vsub.s32 %v3969_v1, %v3915_v40  ;;  %v1652_v40 = vsub.s32 %v3969_v1, %v3921_v52 }
 0x99c   : > { %vm1582_vm4 = vcmp.eq.s32.totalorder %v1574_v10, 17 }
 0x9a1   : > { %3134 = vset.pattern.permute.xlu1 %v3312_v25 }
 0x9a2   : > { %1674 = vperm.xlu2 %3128, %v1524_v13   ;;  %1853 = vperm.xlu1 %3134, %v1756_v11   ;;  %v1531_v13 = vsub.s32 %v3969_v1, %v3913_v39  ;;  %v1651_v39 = vsub.s32 %v3966_v0, %v3921_v52 }
 0x9a4   : > { %vm1539_vm10 = vcmp.eq.s32.totalorder %v1531_v13, 17  ;;  %vm1537_vm12 = vcmp.eq.s32.totalorder %v1531_v13, 16  ;;  %vm1535_vm15 = vcmp.eq.s32.totalorder %v1531_v13, 1 }
 0x9aa   : > { %3132 = vset.pattern.permute.xlu2 %v3310_v17  ;;  %3135 = vset.pattern.permute.xlu1 %v3311_v48 }
 0x9ab   : > { %1779 = vperm.xlu2 %3132, %v1755_v51   ;;  %1832 = vperm.xlu1 %3135, %v1753_v3  }
 0x9b3   : > { %1786 = vperm.xlu2 %3132, %v1754_v23   ;;  %3138 = vset.pattern.permute.xlu1 %v3313_v53 }
 0x9b4   : > { %1892 = vperm.xlu1 %3138, %v1756_v11   ;;  %v1613_v11 = vsub.s32 %v3969_v1, %v3917_v43 }
 0x9b6   : > { %vm1621_vm13 = vcmp.eq.s32.totalorder %v1613_v11, 17  ;;  %vm1619_vm5 = vcmp.eq.s32.totalorder %v1613_v11, 16  ;;  %vm1617_vm0 = vcmp.eq.s32.totalorder %v1613_v11, 1 }
 0x9bb   : > { %1793 = vperm.xlu2 %3132, %v1753_v3  }
 0x9bc   : > { %1898 = vperm.xlu1 %3138, %v1755_v51   ;;  %v1543_v27 = vpop.permute.xlu2 %1542 }
 0x9bd   : > { %v1545_v43 = vsel %vm1538_vm9, %v1543_v27, 0.0  ;;  %v1546_v17 = vsel %vm1539_vm10, %v1543_v27, 0.0  ;;  %vm1659_vm9 = vcmp.eq.s32.totalorder %v1651_v39, 17  ;;  %vm1660_vm10 = vcmp.eq.s32.totalorder %v1652_v40, 17 }
 0x9c3   : > { %3136 = vset.pattern.permute.xlu2 %v3312_v25 }
 0x9c4   : > { %1859 = vperm.xlu2 %3136, %v1755_v51   ;;  %1904 = vperm.xlu1 %3138, %v1754_v23  }
 0x9c6   : > { %v3954_v28 = vpop.permute.xlu2 %1590 }
 0x9cc   : > { %1871 = vperm.xlu2 %3136, %v1753_v3   ;;  %1951 = vrot.lane.b32.xlu1 %v3768_v15, %s3288_s6 }
 0x9cf   : > { %v1557_v30 = vpop.permute.xlu2 %1556 }
 0x9d4   : > { %3139 = vset.pattern.permute.xlu2 %v3313_v53  ;;  %v1585_v34 = vpop.permute.xlu0 %1584 }
 0x9d5   : > { %1910 = vperm.xlu2 %3139, %v1753_v3   ;;  %v1550_v55 = vpop.permute.xlu1 %1549  ;;  %v1587_v3 = vsel %vm1581_vm3, %v1585_v34, 0.0  ;;  %v1588_v53 = vsel %vm1582_vm4, %v1585_v34, 0.0  ;;  %vm4369_vm3 = vcmp.eq.s32.totalorder %v1574_v10, 16  ;;  %vm4370_vm4 = vcmp.eq.s32.totalorder %v1530_v12, 0 }
 0x9d6   : > { %v1552_v25 = vsel %vm1536_vm11, %v1550_v55, %v1545_v43  ;;  %v1553_v51 = vsel %vm1537_vm12, %v1550_v55, %v1546_v17  ;;  %vm4368_vm11 = vcmp.eq.s32.totalorder %v1573_v41, 16  ;;  %v1594_v55 = vsel %vm4369_vm3, %v3954_v28, %v1588_v53 }
 0x9d7   : > { %v1559_v52 = vsel %vm1534_vm1, %v1557_v30, %v1552_v25  ;;  %v1560_v27 = vsel %vm1535_vm15, %v1557_v30, %v1553_v51  ;;  %v1593_v31 = vsel %vm4368_vm11, %v3954_v28, %v1587_v3  ;;  %vm4371_vm12 = vcmp.eq.s32.totalorder %v1531_v13, 0 }
 0x9d8   : > { %v1624_v35 = vpop.permute.xlu2 %1623  ;;  %vm4373_vm1 = vcmp.eq.s32.totalorder %v1574_v10, 1  ;;  %vm4374_vm15 = vcmp.eq.s32.totalorder %v1573_v41, 0  ;;  %vm4375_vm11 = vcmp.eq.s32.totalorder %v1574_v10, 0 }
 0x9d9   : > { %v1626_v43 = vsel %vm1620_vm6, %v1624_v35, 0.0  ;;  %v1627_v17 = vsel %vm1621_vm13, %v1624_v35, 0.0  ;;  %vm1657_vm6 = vcmp.eq.s32.totalorder %v1651_v39, 16  ;;  %vm4376_vm13 = vcmp.eq.s32.totalorder %v1613_v11, 0 }
 0x9dd   : > { %2057 = vrot.lane.b32.xlu2 %v3960_v36, %s4367_s30  ;;  %v3964_v61 = vpop.permute.xlu0 %1629 }
 0x9de   : > { %v1597_v63 = vpop.permute.xlu1 %1596  ;;  %v1632_v51 = vsel %vm1618_vm14, %v3964_v61, %v1626_v43  ;;  %v1633_v3 = vsel %vm1619_vm5, %v3964_v61, %v1627_v17  ;;  %vm1653_vm5 = vcmp.eq.s32.totalorder %v1651_v39, 0  ;;  %vm1654_vm14 = vcmp.eq.s32.totalorder %v1652_v40, 0 }
 0x9df   : > { %v1599_v25 = vsel %vm4372_vm7, %v1597_v63, %v1593_v31  ;;  %v1600_v30 = vsel %vm4373_vm1, %v1597_v63, %v1594_v55  ;;  %vm1658_vm7 = vcmp.eq.s32.totalorder %v1652_v40, 16 }
 0x9e2   : > { %v1603_v32 = vpop.permute.xlu2 %1602 }
 0x9e3   : > { %v1605_v28 = vsel %vm4374_vm15, %v1603_v32, %v1599_v25  ;;  %v1606_v12 = vsel %vm4375_vm11, %v1603_v32, %v1600_v30 }
 0x9e7   : > { %v3971_v46 = vpop.permute.xlu0 %1680 }
 0x9e8   : > { %v1564_v33 = vpop.permute.xlu1 %1563 }
 0x9e9   : > { %v1566_v34 = vsel %vm4370_vm4, %v1564_v33, %v1559_v52  ;;  %v1567_v42 = vsel %vm4371_vm12, %v1564_v33, %v1560_v27 }
 0x9ea   : > { %v1607_v13 = vadd.f32 %v1605_v28, %v1566_v34  ;;  %v1608_v33 = vadd.f32 %v1606_v12, %v1567_v42 }
 0x9ec   : > { %v3981_v37 = vpop.permute.xlu2 %1662 }
 0x9ed   : > { %v1665_v61 = vsel %vm1659_vm9, %v3981_v37, 0.0  ;;  %v1666_v32 = vsel %vm1660_vm10, %v3981_v37, 0.0 }
 0x9f1   : > { %v3991_v23 = vpop.permute.xlu0 %1772  ;;  %v1636_v48 = vpop.permute.xlu1 %1635 }
 0x9f2   : > { %v1638_v53 = vsel %vm1616_vm2, %v1636_v48, %v1632_v51  ;;  %v1639_v35 = vsel %vm1617_vm0, %v1636_v48, %v1633_v3  ;;  %vm1655_vm0 = vcmp.eq.s32.totalorder %v1651_v39, 1  ;;  %vm1656_vm2 = vcmp.eq.s32.totalorder %v1652_v40, 1 }
 0x9f4   : > { %v1669_v29 = vpop.permute.xlu2 %1668 }
 0x9f5   : > { %v1671_v55 = vsel %vm1657_vm6, %v1669_v29, %v1665_v61  ;;  %v1672_v34 = vsel %vm1658_vm7, %v1669_v29, %v1666_v32 }
 0x9f9   : > { %v1642_v52 = vpop.permute.xlu1 %1641 }
 0x9fa   : > { %v1644_v63 = vsel %vm1614_vm8, %v1642_v52, %v1638_v53  ;;  %v1645_v27 = vsel %vm4376_vm13, %v1642_v52, %v1639_v35  ;;  %v4017_v31 = vpop.permute.xlu0 %1826  ;;  %vm2331_vm8 = vcmask 392544   ;;  %v1843_v53 = vsub.s32 %v3969_v1, %v3923_v54 }
 0x9fb   : > { %v1646_v41 = vadd.f32 %v1644_v63, %v1607_v13  ;;  %v1647_v10 = vadd.f32 %v1645_v27, %v1608_v33  ;;  %v2332_v39 = vsel %vm2331_vm8, %v3775_v20, -inf  ;;  %v1804_v33 = vsub.s32 %v3969_v1, %v3919_v44 }
 0x9fc   : > { %v1675_v48 = vpop.permute.xlu2 %1674  ;;  %v1761_v35 = vsub.s32 %v3969_v1, %v3925_v56  ;;  %vm1851_vm12 = vcmp.eq.s32.totalorder %v1843_v53, 17  ;;  %vm1849_vm15 = vcmp.eq.s32.totalorder %v1843_v53, 16  ;;  %vm1847_vm13 = vcmp.eq.s32.totalorder %v1843_v53, 1 }
 0x9fd   : > { %v1677_v38 = vsel %vm1655_vm0, %v1675_v48, %v1671_v55  ;;  %v1678_v11 = vsel %vm1656_vm2, %v1675_v48, %v1672_v34  ;;  %vm1812_vm9 = vcmp.eq.s32.totalorder %v1804_v33, 17  ;;  %vm1810_vm10 = vcmp.eq.s32.totalorder %v1804_v33, 16 }
 0x9fe   : > { %v1683_v42 = vsel %vm1653_vm5, %v3971_v46, %v1677_v38  ;;  %v1684_v43 = vsel %vm1654_vm14, %v3971_v46, %v1678_v11  ;;  %vm1806_vm3 = vcmp.eq.s32.totalorder %v1804_v33, 0  ;;  %vm1769_vm4 = vcmp.eq.s32.totalorder %v1761_v35, 17 }
 0x9ff   : > { %v1685_v17 = vadd.f32 %v1683_v42, %v1646_v41  ;;  %v1686_v25 = vadd.f32 %v1684_v43, %v1647_v10  ;;  %vm1808_vm1 = vcmp.eq.s32.totalorder %v1804_v33, 1  ;;  %v1776_v32 = vsel %vm1769_vm4, %v3991_v23, 0.0 }
 0xa00   : > { %vm1767_vm11 = vcmp.eq.s32.totalorder %v1761_v35, 16  ;;  %vm1765_vm6 = vcmp.eq.s32.totalorder %v1761_v35, 1  ;;  %vm1763_vm7 = vcmp.eq.s32.totalorder %v1761_v35, 0  ;;  %vm1845_vm0 = vcmp.eq.s32.totalorder %v1843_v53, 0 }
 0xa01   : > { %v1687_v30 = vpack.c.bf16 %v1685_v17, %v1685_v17  ;;  %v1688_v51 = vpack.c.bf16 %v1686_v25, %v1686_v25  ;;  %v1760_v33 = vsub.s32 %v3966_v0, %v3925_v56 }
 0xa03   : > { %1713 = vmatmul.bf16.vlgmr.msrb.gmra.mxu3 %v1687_v30  ;;  %v1815_v37 = vpop.permute.xlu1 %1814  ;;  %1726 = vmatmul.bf16.vlgmr.msrb.gmra.mxu0 %v1688_v51  ;;  %v4025_v29 = vpop.permute.xlu0 %1865  ;;  %v1803_v51 = vsub.s32 %v3966_v0, %v3919_v44  ;;  %vm1766_vm4 = vcmp.eq.s32.totalorder %v1760_v33, 16 }
 0xa04   : > { %v1818_v63 = vsel %vm1812_vm9, %v1815_v37, 0.0 }
 0xa05   : > { %v4027_v3 = vpop.permute.xlu2 %1779  ;;  %vm1811_vm2 = vcmp.eq.s32.totalorder %v1803_v51, 17  ;;  %vm1809_vm5 = vcmp.eq.s32.totalorder %v1803_v51, 16  ;;  %vm1805_vm8 = vcmp.eq.s32.totalorder %v1803_v51, 0 }
 0xa06   : > { %2333 = vmax.xlane.f32.xlu2 %v2332_v39  ;;  %v1783_v55 = vsel %vm1767_vm11, %v4027_v3, %v1776_v32  ;;  %v1817_v35 = vsel %vm1811_vm2, %v1815_v37, 0.0  ;;  %vm1762_vm11 = vcmp.eq.s32.totalorder %v1760_v33, 0 }
 0xa0b   : > { %v1821_v40 = vpop.permute.xlu1 %1820  ;;  %v1936_v28 = vpop.permute.xlu0 %1935 }
 0xa0c   : > { %1990 = vmatpush.bf16.msrb.mxu2 %v1936_v28  ;;  %v1824_v61 = vsel %vm1810_vm10, %v1821_v40, %v1818_v63  ;;  %v1842_v28 = vsub.s32 %v3966_v0, %v3923_v54  ;;  %v1823_v63 = vsel %vm1809_vm5, %v1821_v40, %v1817_v35  ;;  %vm1768_vm10 = vcmp.eq.s32.totalorder %v1760_v33, 17 }
 0xa0d   : > { %v4030_v12 = vpop.permute.xlu2 %1786  ;;  %v1830_v10 = vsel %vm1808_vm1, %v4017_v31, %v1824_v61  ;;  %v1881_v61 = vsub.s32 %v3966_v0, %v3927_v59  ;;  %v1775_v56 = vsel %vm1768_vm10, %v3991_v23, 0.0  ;;  %vm1764_vm1 = vcmp.eq.s32.totalorder %v1760_v33, 1 }
 0xa0e   : > { %v1790_v38 = vsel %vm1765_vm6, %v4030_v12, %v1783_v55  ;;  %vm1850_vm14 = vcmp.eq.s32.totalorder %v1842_v28, 17  ;;  %vm1848_vm9 = vcmp.eq.s32.totalorder %v1842_v28, 16  ;;  %v1782_v40 = vsel %vm1766_vm4, %v4027_v3, %v1775_v56 }
 0xa0f   : > { %vm1889_vm6 = vcmp.eq.s32.totalorder %v1881_v61, 17  ;;  %vm1885_vm2 = vcmp.eq.s32.totalorder %v1881_v61, 1  ;;  %vm4378_vm10 = vcmask 1043456  }
 0xa10   : > { %vm4380_vm4 = vmmov %vm4378_vm10 }
 0xa14   : > { %v1854_v46 = vpop.permute.xlu1 %1853 }
 0xa15   : > { %v4032_v13 = vpop.permute.xlu2 %1793  ;;  %v1857_v41 = vsel %vm1851_vm12, %v1854_v46, 0.0  ;;  %v1856_v32 = vsel %vm1850_vm14, %v1854_v46, 0.0  ;;  %vm1844_vm12 = vcmp.eq.s32.totalorder %v1842_v28, 0  ;;  %v1789_v46 = vsel %vm1764_vm1, %v4030_v12, %v1782_v40 }
 0xa16   : > { %v1797_v11 = vsel %vm1763_vm7, %v4032_v13, %v1790_v38  ;;  %vm1883_vm14 = vcmp.eq.s32.totalorder %v1881_v61, 0 }
 0xa1d   : > { %v1833_v52 = vpop.permute.xlu1 %1832 }
 0xa1e   : > { %2245 = vrot.lane.b32.xlu2 %v3742_v58, %s4361_s5  ;;  %v1860_v27 = vpop.permute.xlu2 %1859  ;;  %v1836_v34 = vsel %vm1806_vm3, %v1833_v52, %v1830_v10  ;;  %vm1807_vm3 = vcmp.eq.s32.totalorder %v1803_v51, 1 }
 0xa1f   : > { %v1863_v48 = vsel %vm1849_vm15, %v1860_v27, %v1857_v41  ;;  %v1838_v42 = vadd.f32 %v1836_v34, %v1797_v11  ;;  %v1882_v41 = vsub.s32 %v3969_v1, %v3927_v59  ;;  %v1862_v54 = vsel %vm1848_vm9, %v1860_v27, %v1856_v32 }
 0xa20   : > { %v1869_v17 = vsel %vm1847_vm13, %v4025_v29, %v1863_v48  ;;  %v1829_v37 = vsel %vm1807_vm3, %v4017_v31, %v1823_v63  ;;  %vm1846_vm15 = vcmp.eq.s32.totalorder %v1842_v28, 1  ;;  %v1796_v59 = vsel %vm1762_vm11, %v4032_v13, %v1789_v46 }
 0xa21   : > { %v1835_v10 = vsel %vm1805_vm8, %v1833_v52, %v1829_v37  ;;  %v1868_v55 = vsel %vm1846_vm15, %v4025_v29, %v1862_v54  ;;  %vm1890_vm7 = vcmp.eq.s32.totalorder %v1882_v41, 17  ;;  %vm1887_vm13 = vcmp.eq.s32.totalorder %v1881_v61, 16 }
 0xa22   : > { %v1837_v23 = vadd.f32 %v1835_v10, %v1796_v59  ;;  %vm1886_vm5 = vcmp.eq.s32.totalorder %v1882_v41, 1  ;;  %vm1884_vm8 = vcmp.eq.s32.totalorder %v1882_v41, 0  ;;  %vm4377_vm9 = vcmask 31744  }
 0xa23   : > { %vm4379_vm3 = vcmask 64512   ;;  %v3314_v46 = vmov 24  }
 0xa24   : > { %3140 = vset.pattern.permute.xlu1 %v3314_v46 }
 0xa26   : > { %2255 = vrot.lane.b32.xlu2 %v3803_v60, %s4361_s5  ;;  %v1872_v43 = vpop.permute.xlu2 %1871  ;;  %v1893_v25 = vpop.permute.xlu1 %1892 }
 0xa27   : > { %v1875_v30 = vsel %vm1845_vm0, %v1872_v43, %v1869_v17  ;;  %v1874_v27 = vsel %vm1844_vm12, %v1872_v43, %v1868_v55  ;;  %v1895_v34 = vsel %vm1889_vm6, %v1893_v25, 0.0  ;;  %v1896_v31 = vsel %vm1890_vm7, %v1893_v25, 0.0  ;;  %vm4381_vm12 = vmmov %vm4379_vm3 }
 0xa28   : > { %v1877_v39 = vadd.f32 %v1875_v30, %v1838_v42  ;;  %vm1888_vm0 = vcmp.eq.s32.totalorder %v1882_v41, 16  ;;  %v1876_v38 = vadd.f32 %v1874_v27, %v1837_v23  ;;  %v2010_v41 = vld [vmem:[%s4305_s16 + $0x4] sm:$0xf] }
 0xa29   : > { %v2015_v54 = vsel %vm4380_vm4, %v2010_v41, 0  ;;  %v3321_v41 = vmov 11  }
 0xa2a   : > { %2024 = vmatpush.bf16.msra.mxu0 %v2015_v54 }
 0xa2e   : > { %v1899_v53 = vpop.permute.xlu1 %1898 }
 0xa2f   : > { %v1911_v44 = vpop.permute.xlu2 %1910  ;;  %v1901_v48 = vsel %vm1887_vm13, %v1899_v53, %v1895_v34  ;;  %v1902_v3 = vsel %vm1888_vm0, %v1899_v53, %v1896_v31  ;;  %v3316_v31 = vmov 26  }
 0xa36   : > { %v1905_v52 = vpop.permute.xlu1 %1904 }
 0xa37   : > { %v1907_v12 = vsel %vm1885_vm2, %v1905_v52, %v1901_v48  ;;  %v1908_v11 = vsel %vm1886_vm5, %v1905_v52, %v1902_v3  ;;  %v2058_v29 = vpop.permute.xlu2 %2057  ;;  %v3317_v48 = vmov 27   ;;  %v3318_v3 = vmov 8  }
 0xa38   : > { %v1913_v42 = vsel %vm1883_vm14, %v1911_v44, %v1907_v12  ;;  %v2060_v13 = vsel %vm4377_vm9, %v2058_v29, 0.0  ;;  %v1914_v43 = vsel %vm1884_vm8, %v1911_v44, %v1908_v11  ;;  %3146 = vset.pattern.permute.xlu0 %v3318_v3  ;;  %3144 = vset.pattern.permute.xlu2 %v3318_v3  ;;  %v3319_v52 = vmov 9  }
 0xa39   : > { %v1915_v17 = vadd.f32 %v1913_v42, %v1876_v38  ;;  %2061 = vadd.xlane.f32.xlu0 %v2060_v13  ;;  %v1916_v25 = vadd.f32 %v1914_v43, %v1877_v39  ;;  %v1732_v39 = vld [vmem:[%s4305_s16] sm:$0xf] }
 0xa3a   : > { %v2034_v33 = vsel %vm4378_vm10, %v1732_v39, 0 }
 0xa3b   : > { %v1917_v30 = vpack.c.bf16 %v1915_v17, %v1915_v17  ;;  %v1918_v28 = vpack.c.bf16 %v1916_v25, %v1916_v25  ;;  %2043 = vmatpush.bf16.msra.mxu2 %v2034_v33 }
 0xa3d   : > { %1991 = vmatmul.bf16.vlgmr.msrb.gmra.mxu2 %v1917_v30 }
 0xa3e   : > { %v1952_v51 = vpop.permute.xlu1 %1951 }
 0xa3f   : > { %2003 = vmatpush.bf16.msra.mxu3 %v1952_v51 }
 0xa42   : > { %2004 = vmatmul.bf16.vlgmr.msra.gmra.mxu3 %v1918_v28  ;;  %v3320_v28 = vmov 10  }
 0xa4d   : > { %2247 = vrot.lane.b32.xlu0 %v3726_v50, %s4361_s5 }
 0xa55   : > { %2257 = vrot.lane.b32.xlu0 %v3790_v45, %s4361_s5 }
 0xa5d   : > { %2243 = vrot.lane.b32.xlu0 %v3749_v5, %s4361_s5 }
 0xa65   : > { %2241 = vrot.lane.b32.xlu0 %v3688_v62, %s4361_s5 }
 0xa6d   : > { %2239 = vrot.lane.b32.xlu0 %v3838_v24, %s4361_s5 }
 0xa79   : > { %v2334_v39 = vpop.xlane.xlu2 %2333 }
 0xa80   : > { %v1727_v35 = vpop.f32.mrf.mxu0 }
 0xa86   : > { %v1714_v63 = vpop.f32.mrf.mxu3 }
 0xa87   : > { %v1728_v53 = vadd.f32 %v1727_v35, %v1714_v63 }
 0xa88   : > { %v1729_v61 = vpop.f32.mrf.mxu0 }
 0xa89   : > { %v1731_v32 = vpack.c.bf16 %v1728_v53, %v1728_v53  ;;  %v2246_v53 = vpop.permute.xlu2 %2245 }
 0xa8b   : > { %2966 = vmatmul.msk.bf16.vlgmr.msra.gmra.mxu2 %vm4379_vm3, %v1731_v32 }
 0xa8e   : > { %v1716_v44 = vpop.f32.mrf.mxu3 }
 0xaac   : > { %v2062_v56 = vpop.xlane.xlu0 %2061 }
 0xaad   : > { %3212 = vrcp.f32 %v2062_v56 }
 0xab3   : > { %v3213_v37 = vpop.eup %3212 }
 0xab4   : > { %v2064_v40 = vmul.f32 %v3213_v37, %v3960_v36  ;;  %v3315_v36 = vmov 25  }
 0xab6   : > { %2066 = vrot.lane.b32.xlu1 %v2064_v40, %s4362_s27  ;;  %v2256_v40 = vpop.permute.xlu2 %2255 }
 0xabe   : > { %2265 = vrot.lane.b32.xlu1 %v3744_v4, %s4361_s5 }
 0xabf   : > { %v2248_v13 = vpop.permute.xlu0 %2247 }
 0xac0   : > { %v1992_v10 = vpop.f32.mrf.mxu2 }
 0xac5   : > { %v2005_v55 = vpop.f32.mrf.mxu3 }
 0xac6   : > { %v2006_v59 = vadd.f32 %v2005_v55, %v1992_v10  ;;  %2263 = vrot.lane.b32.xlu1 %v3736_v47, %s4361_s5  ;;  %v2335_v55 = vsub.f32 %v3775_v20, %v2334_v39 }
 0xac7   : > { %v2258_v30 = vpop.permute.xlu0 %2257 }
 0xac8   : > { %v2009_v27 = vpack.c.bf16 %v2006_v59, %v2006_v59  ;;  %v1994_v23 = vpop.f32.mrf.mxu2  ;;  %v2336_v59 = vmul.f32 1.442695, %v2335_v55 }
 0xaca   : > { %2965 = vmatmul.msk.bf16.vlgmr.msra.gmra.mxu0 %vm4381_vm12, %v2009_v27  ;;  %3214 = vpow2.f32 %v2336_v59 }
 0xacd   : > { %v2007_v34 = vpop.f32.mrf.mxu3 }
 0xace   : > { %2249 = vrot.lane.b32.xlu1 %v3724_v49, %s4361_s5 }
 0xacf   : > { %v2244_v33 = vpop.permute.xlu0 %2243 }
 0xad0   : > { %v4120_v23 = vpop.eup %3214 }
 0xad6   : > { %2261 = vrot.lane.b32.xlu1 %v3756_v8, %s4361_s5 }
 0xad7   : > { %v2242_v44 = vpop.permute.xlu0 %2241 }
 0xade   : > { %2259 = vrot.lane.b32.xlu1 %v3813_v6, %s4361_s5 }
 0xadf   : > { %v2240_v37 = vpop.permute.xlu0 %2239 }
 0xae6   : > { %2074 = vperm.xlu1 %3140, %v3859_v57  }
 0xaee   : > { %3141 = vset.pattern.permute.xlu1 %v3315_v36  ;;  %v3323_v36 = vmov 29  }
 0xaef   : > { %2117 = vperm.xlu1 %3141, %v3859_v57  }
 0xaf7   : > { %3142 = vset.pattern.permute.xlu1 %v3316_v31 }
 0xaf8   : > { %2156 = vperm.xlu1 %3142, %v3859_v57  }
 0xb00   : > { %3143 = vset.pattern.permute.xlu1 %v3317_v48 }
 0xb01   : > { %2195 = vperm.xlu1 %3143, %v3859_v57  }
 0xb09   : > { %2253 = vrot.lane.b32.xlu1 %v3829_v22, %s4361_s5 }
 0xb0a   : > { %3145 = vset.pattern.permute.xlu1 %v3319_v52 }
 0xb0e   : > { %v2045_v38 = vpop.f32.mrf.mxu2 }
 0xb16   : > { %v2047_v12 = vpop.f32.mrf.mxu2 }
 0xb28   : > { %v2067_v11 = vpop.permute.xlu1 %2066 }
 0xb29   : > { %v2071_v29 = vmul.f32 %v2067_v11, %v3880_v7  ;;  %v2072_v42 = vmul.f32 %v2067_v11, %v3884_v9  ;;  %v2070_v17 = vmul.f32 %v2067_v11, %v3895_v19  ;;  %v2069_v51 = vmul.f32 %v2067_v11, %v3891_v16 }
 0xb2b   : > { %2130 = vperm.xlu1 %3145, %v2072_v42   ;;  %2088 = vperm.xlu2 %3144, %v2072_v42  }
 0xb2c   : > { %2095 = vperm.xlu0 %3146, %v2071_v29  }
 0xb30   : > { %v2266_v43 = vpop.permute.xlu1 %2265 }
 0xb31   : > { %2296 = vmatpush.bf16.msrb.mxu2 %v2266_v43 }
 0xb33   : > { %3148 = vset.pattern.permute.xlu1 %v3318_v3  ;;  %3147 = vset.pattern.permute.xlu2 %v3319_v52 }
 0xb34   : > { %3149 = vset.pattern.permute.xlu0 %v3319_v52  ;;  %2136 = vperm.xlu2 %3147, %v2071_v29  }
 0xb35   : > { %2142 = vperm.xlu0 %3149, %v2070_v17   ;;  %2102 = vperm.xlu1 %3148, %v2070_v17  }
 0xb38   : > { %v2264_v25 = vpop.permute.xlu1 %2263 }
 0xb39   : > { %2297 = vmatpush.bf16.msrb.mxu2 %v2264_v25 }
 0xb3c   : > { %3150 = vset.pattern.permute.xlu2 %v3320_v28 }
 0xb3d   : > { %3155 = vset.pattern.permute.xlu0 %v3320_v28  ;;  %2109 = vperm.xlu1 %3148, %v2069_v51  }
 0xb3e   : > { %2169 = vperm.xlu2 %3150, %v2072_v42   ;;  %2187 = vperm.xlu0 %3155, %v2069_v51  }
 0xb40   : > { %v2250_v35 = vpop.permute.xlu1 %2249 }
 0xb41   : > { %2283 = vmatpush.bf16.msrb.mxu0 %v2250_v35 }
 0xb45   : > { %3152 = vset.pattern.permute.xlu1 %v3320_v28  ;;  %2284 = vmatpush.bf16.msrb.mxu0 %v2248_v13 }
 0xb46   : > { %3151 = vset.pattern.permute.xlu2 %v3319_v52  ;;  %2235 = vrot.lane.b32.xlu0 %v3843_v26, %s4361_s5 }
 0xb47   : > { %2175 = vperm.xlu1 %3152, %v2071_v29   ;;  %2148 = vperm.xlu2 %3151, %v2069_v51   ;;  %v2026_v63 = vpop.f32.mrf.mxu0 }
 0xb48   : > { %v4111_v61 = vadd.f32 %v2045_v38, %v2026_v63  ;;  %v2262_v32 = vpop.permute.xlu1 %2261 }
 0xb49   : > { %2285 = vmatpush.bf16.msrb.mxu0 %v2246_v53  ;;  %2298 = vmatpush.bf16.msrb.mxu2 %v2262_v32 }
 0xb4d   : > { %2286 = vmatpush.bf16.msrb.mxu0 %v2244_v33 }
 0xb4f   : > { %3154 = vset.pattern.permute.xlu1 %v3321_v41  ;;  %3153 = vset.pattern.permute.xlu2 %v3320_v28  ;;  %v2028_v54 = vpop.f32.mrf.mxu0 }
 0xb50   : > { %2208 = vperm.xlu1 %3154, %v2072_v42   ;;  %2181 = vperm.xlu2 %3153, %v2070_v17   ;;  %v2260_v56 = vpop.permute.xlu1 %2259 }
 0xb51   : > { %2287 = vmatpush.bf16.msrb.mxu0 %v2242_v44  ;;  %2299 = vmatpush.bf16.msrb.mxu2 %v2260_v56 }
 0xb55   : > { %2288 = vmatpush.bf16.msrb.mxu0 %v2240_v37  ;;  %2300 = vmatpush.bf16.msrb.mxu2 %v2258_v30 }
 0xb58   : > { %2226 = vperm.xlu1 %3154, %v2069_v51   ;;  %3156 = vset.pattern.permute.xlu2 %v3321_v41  ;;  %v2075_v10 = vpop.permute.xlu1 %2074 }
 0xb59   : > { %2214 = vperm.xlu2 %3156, %v2071_v29   ;;  %2301 = vmatpush.bf16.msrb.mxu2 %v2256_v40  ;;  %v2076_v31 = vsub.s32 %v3966_v0, %v2075_v10  ;;  %v3324_v29 = vmov 30   ;;  %v2077_v13 = vsub.s32 %v3969_v1, %v2075_v10  ;;  %v2310_v10 = vld [vmem:[%s4305_s16 + $0x8] sm:$0xf] }
 0xb5b   : > { %vm2084_vm1 = vcmp.eq.s32.totalorder %v2076_v31, 17  ;;  %vm2082_vm15 = vcmp.eq.s32.totalorder %v2076_v31, 16  ;;  %vm2080_vm11 = vcmp.eq.s32.totalorder %v2076_v31, 1  ;;  %vm2085_vm13 = vcmp.eq.s32.totalorder %v2077_v13, 17 }
 0xb5c   : > { %vm2083_vm8 = vcmp.eq.s32.totalorder %v2077_v13, 16  ;;  %vm2081_vm9 = vcmp.eq.s32.totalorder %v2077_v13, 1  ;;  %vm2078_vm10 = vcmp.eq.s32.totalorder %v2076_v31, 0  ;;  %vm2079_vm3 = vcmp.eq.s32.totalorder %v2077_v13, 0 }
 0xb60   : > { %2237 = vrot.lane.b32.xlu1 %v3827_v21, %s4361_s5 }
 0xb61   : > { %2220 = vperm.xlu2 %3156, %v2070_v17   ;;  %v2118_v46 = vpop.permute.xlu1 %2117 }
 0xb62   : > { %v2119_v42 = vsub.s32 %v3966_v0, %v2118_v46 }
 0xb64   : > { %vm2127_vm6 = vcmp.eq.s32.totalorder %v2119_v42, 17  ;;  %vm2125_vm0 = vcmp.eq.s32.totalorder %v2119_v42, 16  ;;  %vm2123_vm5 = vcmp.eq.s32.totalorder %v2119_v42, 1  ;;  %vm2121_vm4 = vcmp.eq.s32.totalorder %v2119_v42, 0 }
 0xb69   : > { %2251 = vrot.lane.b32.xlu2 %v3768_v15, %s4361_s5  ;;  %s724_s5 = sand.u32 1, %s3278_s28  }
 0xb6a   : > { %v4118_v27 = vpop.permute.xlu1 %2156  ;;  %3158 = vset.pattern.permute.xlu2 %v3323_v36  ;;  %s2894_s29 = sshll.u32 %s724_s5, 3 }
 0xb6b   : > { %v2158_v59 = vsub.s32 %v3966_v0, %v4118_v27  ;;  %v2159_v36 = vsub.s32 %v3969_v1, %v4118_v27  ;;  %s726_s2 = scalar_lea.vmem [#allocation2], %s2894_s29  ;;  %s3244_s29 = scalar_lea.hbm %s4311_s22, 16 }
 0xb6c   : > { %s2783_s23 = sshll.u32 %s726_s2, 4  ;;  %s2784_s23 = int_to_ptr.vmem [resolvable:$true] %s2783_s23 }
 0xb71   : > { %2339 = vrot.lane.b32.xlu2 %v4120_v23, %s3322_s0 }
 0xb73   : > { %v4123_v34 = vpop.permute.xlu1 %2195 }
 0xb74   : > { %v2198_v13 = vsub.s32 %v3969_v1, %v4123_v34 }
 0xb79   : > { %2531 = vrot.lane.b32.xlu2 %v3724_v49, %s4382_s1 }
 0xb7b   : > { %v2254_v20 = vpop.permute.xlu1 %2253 }
 0xb7c   : > { %2302 = vmatpush.bf16.msrb.mxu2 %v2254_v20 }
 0xb81   : > { %2547 = vrot.lane.b32.xlu2 %v3744_v4, %s4382_s1 }
 0xb85   : > { %v2089_v48 = vpop.permute.xlu2 %2088 }
 0xb86   : > { %v2091_v3 = vsel %vm2084_vm1, %v2089_v48, 0.0  ;;  %v2092_v33 = vsel %vm2085_vm13, %v2089_v48, 0.0  ;;  %vm4383_vm1 = vcmask 1043456   ;;  %vm2162_vm13 = vcmp.eq.s32.totalorder %v2158_v59, 1 }
 0xb87   : > { %v2315_v55 = vsel %vm4383_vm1, %v2310_v10, 0  ;;  %vm2200_vm1 = vcmp.eq.s32.totalorder %v2198_v13, 0 }
 0xb88   : > { %2324 = vmatpush.bf16.msrb.mxu3 %v2315_v55 }
 0xb89   : > { %2545 = vrot.lane.b32.xlu2 %v3736_v47, %s4382_s1  ;;  %v2120_v47 = vsub.s32 %v3969_v1, %v2118_v46 }
 0xb8b   : > { %vm2128_vm7 = vcmp.eq.s32.totalorder %v2120_v47, 17  ;;  %vm2126_vm2 = vcmp.eq.s32.totalorder %v2120_v47, 16  ;;  %vm2124_vm14 = vcmp.eq.s32.totalorder %v2120_v47, 1  ;;  %vm2122_vm12 = vcmp.eq.s32.totalorder %v2120_v47, 0 }
 0xb8e   : > { %v2137_v52 = vpop.permute.xlu2 %2136 }
 0xb91   : > { %2543 = vrot.lane.b32.xlu2 %v3756_v8, %s4382_s1 }
 0xb98   : > { %v2170_v49 = vpop.permute.xlu2 %2169 }
 0xb99   : > { %2399 = vperm.xlu2 %3158, %v3859_v57  }
 0xb9d   : > { %v2131_v38 = vpop.permute.xlu1 %2130 }
 0xb9e   : > { %v2096_v12 = vpop.permute.xlu0 %2095  ;;  %v2133_v17 = vsel %vm2127_vm6, %v2131_v38, 0.0  ;;  %v2134_v30 = vsel %vm2128_vm7, %v2131_v38, 0.0  ;;  %vm2164_vm6 = vcmp.eq.s32.totalorder %v2158_v59, 16  ;;  %vm2165_vm7 = vcmp.eq.s32.totalorder %v2159_v36, 16 }
 0xb9f   : > { %v2098_v11 = vsel %vm2082_vm15, %v2096_v12, %v2091_v3  ;;  %v2139_v28 = vsel %vm2125_vm0, %v2137_v52, %v2133_v17  ;;  %v2140_v39 = vsel %vm2126_vm2, %v2137_v52, %v2134_v30  ;;  %v2099_v53 = vsel %vm2083_vm8, %v2096_v12, %v2092_v33 }
 0xba0   : > { %vm2166_vm15 = vcmp.eq.s32.totalorder %v2158_v59, 17  ;;  %vm2163_vm0 = vcmp.eq.s32.totalorder %v2159_v36, 1  ;;  %vm2160_vm2 = vcmp.eq.s32.totalorder %v2158_v59, 0  ;;  %vm2206_vm8 = vcmp.eq.s32.totalorder %v2198_v13, 17 }
 0xba1   : > { %3159 = vset.pattern.permute.xlu2 %v3324_v29  ;;  %v2149_v4 = vpop.permute.xlu2 %2148  ;;  %v2172_v20 = vsel %vm2166_vm15, %v2170_v49, 0.0  ;;  %vm4384_vm15 = vcmask 31744  }
 0xba2   : > { %2438 = vperm.xlu2 %3159, %v3859_v57  }
 0xba7   : > { %v2103_v8 = vpop.permute.xlu1 %2102  ;;  %v2143_v25 = vpop.permute.xlu0 %2142 }
 0xba8   : > { %v2105_v43 = vsel %vm2080_vm11, %v2103_v8, %v2098_v11  ;;  %v2145_v35 = vsel %vm2123_vm5, %v2143_v25, %v2139_v28  ;;  %v2146_v63 = vsel %vm2124_vm14, %v2143_v25, %v2140_v39  ;;  %v2106_v32 = vsel %vm2081_vm9, %v2103_v8, %v2099_v53 }
 0xba9   : > { %v2151_v44 = vsel %vm2121_vm4, %v2149_v4, %v2145_v35  ;;  %v2152_v41 = vsel %vm2122_vm12, %v2149_v4, %v2146_v63  ;;  %vm2167_vm11 = vcmp.eq.s32.totalorder %v2159_v36, 17  ;;  %vm2161_vm5 = vcmp.eq.s32.totalorder %v2159_v36, 0 }
 0xbaa   : > { %2519 = vrot.lane.b32.xlu2 %v3827_v21, %s4382_s1  ;;  %v2182_v51 = vpop.permute.xlu2 %2181  ;;  %v2173_v31 = vsel %vm2167_vm11, %v2170_v49, 0.0  ;;  %v2197_v49 = vsub.s32 %v3966_v0, %v4123_v34  ;;  %vm2202_vm4 = vcmp.eq.s32.totalorder %v2198_v13, 1  ;;  %vm4385_vm11 = vcmask 64512  }
 0xbac   : > { %vm2205_vm14 = vcmp.eq.s32.totalorder %v2197_v49, 17  ;;  %vm2203_vm9 = vcmp.eq.s32.totalorder %v2197_v49, 16  ;;  %vm2199_vm12 = vcmp.eq.s32.totalorder %v2197_v49, 0 }
 0xbaf   : > { %v2110_v21 = vpop.permute.xlu1 %2109 }
 0xbb0   : > { %v2112_v54 = vsel %vm2078_vm10, %v2110_v21, %v2105_v43  ;;  %v2113_v56 = vsel %vm2079_vm3, %v2110_v21, %v2106_v32  ;;  %v2188_v38 = vpop.permute.xlu0 %2187  ;;  %vm2204_vm10 = vcmp.eq.s32.totalorder %v2198_v13, 16  ;;  %vm2201_vm3 = vcmp.eq.s32.totalorder %v2197_v49, 1 }
 0xbb1   : > { %v2153_v37 = vadd.f32 %v2151_v44, %v2112_v54  ;;  %v2154_v40 = vadd.f32 %v2152_v41, %v2113_v56  ;;  %v3325_v41 = vmov 31  }
 0xbb2   : > { %3160 = vset.pattern.permute.xlu1 %v3325_v41 }
 0xbb3   : > { %v2215_v46 = vpop.permute.xlu2 %2214 }
 0xbb9   : > { %v2176_v48 = vpop.permute.xlu1 %2175 }
 0xbba   : > { %v2178_v3 = vsel %vm2164_vm6, %v2176_v48, %v2172_v20  ;;  %v2179_v52 = vsel %vm2165_vm7, %v2176_v48, %v2173_v31  ;;  %v3326_v31 = vmov 28  }
 0xbbb   : > { %v2184_v12 = vsel %vm2162_vm13, %v2182_v51, %v2178_v3  ;;  %v2185_v11 = vsel %vm2163_vm0, %v2182_v51, %v2179_v52  ;;  %v2221_v29 = vpop.permute.xlu2 %2220  ;;  %3157 = vset.pattern.permute.xlu0 %v3326_v31 }
 0xbbc   : > { %v2190_v4 = vsel %vm2160_vm2, %v2188_v38, %v2184_v12  ;;  %v2191_v27 = vsel %vm2161_vm5, %v2188_v38, %v2185_v11 }
 0xbbd   : > { %v2192_v42 = vadd.f32 %v2190_v4, %v2153_v37  ;;  %v2193_v47 = vadd.f32 %v2191_v27, %v2154_v40  ;;  %v2236_v37 = vpop.permute.xlu0 %2235 }
 0xbc2   : > { %v2209_v8 = vpop.permute.xlu1 %2208 }
 0xbc3   : > { %v2252_v43 = vpop.permute.xlu2 %2251  ;;  %v2211_v17 = vsel %vm2205_vm14, %v2209_v8, 0.0  ;;  %v2212_v30 = vsel %vm2206_vm8, %v2209_v8, 0.0 }
 0xbc4   : > { %2303 = vmatpush.bf16.msrb.mxu2 %v2252_v43  ;;  %v2217_v25 = vsel %vm2203_vm9, %v2215_v46, %v2211_v17  ;;  %v2218_v51 = vsel %vm2204_vm10, %v2215_v46, %v2212_v30  ;;  %v3222_v17 = vld [vmem:[%s3609_s3] sm:$0xff]  ;;  %s2996_s3 = sshll.u32 %s3467_s4, 3  ;;  %s2771_s4 = scalar_lea.sflag [#allocation3], %s724_s5 }
 0xbc5   : > { %v2223_v28 = vsel %vm2201_vm3, %v2221_v29, %v2217_v25  ;;  %v2224_v39 = vsel %vm2202_vm4, %v2221_v29, %v2218_v51  ;;  %s2781_s30 = scalar_lea.hbm %s4311_s22, %s2996_s3 }
 0xbc6   : > { %s2785_s24 = sshll.u32 %s2781_s30, 4  ;;  %s2786_s24 = int_to_ptr.hbm [resolvable:$true] %s2785_s24 }
 0xbc7   : > { %s3238_s0 = sshra.s32 %s2786_s24, 4  ;;  %s3239_s0 = int_to_ptr.hbm [resolvable:$true] %s3238_s0 }
 0xbc8   : > { %p3245_p0 = scmp.lt.s32.totalorder %s3239_s0, %s4311_s22 }
 0xbca   : > { %v2227_v33 = vpop.permute.xlu1 %2226 }
 0xbcb   : > { %v2229_v35 = vsel %vm2199_vm12, %v2227_v33, %v2223_v28  ;;  %v2230_v34 = vsel %vm2200_vm1, %v2227_v33, %v2224_v39  ;;  %v2340_v63 = vpop.permute.xlu2 %2339 }
 0xbcc   : > { %v2231_v53 = vadd.f32 %v2229_v35, %v2192_v42  ;;  %v2232_v32 = vadd.f32 %v2230_v34, %v2193_v47  ;;  %v2342_v21 = vsel %vm4384_vm15, %v2340_v63, 0.0 }
 0xbcd   : > { %2343 = vadd.xlane.f32.xlu1 %v2342_v21 }
 0xbce   : > { %v2234_v44 = vpack.c.bf16 %v2232_v32, %v2232_v32  ;;  %v2233_v40 = vpack.c.bf16 %v2231_v53, %v2231_v53 }
 0xbd0   : > { %2304 = vmatmul.bf16.vlgmr.msrb.gmra.mxu2 %v2234_v44 }
 0xbd2   : > { %v2238_v54 = vpop.permute.xlu1 %2237 }
 0xbd3   : > { %2289 = vmatpush.bf16.msrb.mxu0 %v2238_v54  ;;  %v2532_v56 = vpop.permute.xlu2 %2531 }
 0xbd4   : > { %2565 = vmatpush.bf16.msra.mxu3 %v2532_v56 }
 0xbd7   : > { %2290 = vmatpush.bf16.msrb.mxu0 %v2236_v37 }
 0xbda   : > { %2291 = vmatmul.bf16.vlgmr.msrb.gmra.mxu0 %v2233_v40 }
 0xbdb   : > { %v2548_v10 = vpop.permute.xlu2 %2547 }
 0xbdc   : > { %2578 = vmatpush.bf16.msra.mxu0 %v2548_v10 }
 0xbe3   : > { %v2546_v46 = vpop.permute.xlu2 %2545 }
 0xbe4   : > { %2579 = vmatpush.bf16.msra.mxu0 %v2546_v46 }
 0xbe6   : > { %2523 = vrot.lane.b32.xlu1 %v3688_v62, %s4382_s1 }
 0xbeb   : > { %v2544_v55 = vpop.permute.xlu2 %2543 }
 0xbec   : > { %2580 = vmatpush.bf16.msra.mxu0 %v2544_v55 }
 0xbee   : > { %2477 = vperm.xlu1 %3160, %v3859_v57  }
 0xbf6   : > { %2539 = vrot.lane.b32.xlu1 %v3790_v45, %s4382_s1 }
 0xc40   : > { %v2344_v59 = vpop.xlane.xlu1 %2343 }
 0xc41   : > { %3216 = vrcp.f32 %v2344_v59 }
 0xc47   : > { %v3217_v36 = vpop.eup %3216 }
 0xc48   : > { %v2346_v20 = vmul.f32 %v3217_v36, %v4120_v23  ;;  %v3328_v23 = vmov 13  }
 0xc49   : > { %3165 = vset.pattern.permute.xlu1 %v3328_v23 }
 0xc4a   : > { %2348 = vrot.lane.b32.xlu0 %v2346_v20, %s4362_s27 }
 0xc52   : > { %2529 = vrot.lane.b32.xlu0 %v3726_v50, %s4382_s1  ;;  %v3327_v50 = vmov 12  }
 0xc53   : > { %v2305_v62 = vpop.f32.mrf.mxu2  ;;  %3161 = vset.pattern.permute.xlu2 %v3327_v50 }
 0xc57   : > { %v2292_v48 = vpop.f32.mrf.mxu0 }
 0xc58   : > { %v2306_v3 = vadd.f32 %v2305_v62, %v2292_v48 }
 0xc5a   : > { %v2309_v52 = vpack.c.bf16 %v2306_v3, %v2306_v3  ;;  %2527 = vrot.lane.b32.xlu0 %v3742_v58, %s4382_s1 }
 0xc5b   : > { %v2307_v45 = vpop.f32.mrf.mxu2 }
 0xc5c   : > { %2967 = vmatmul.msk.bf16.vlgmr.msrb.gmra.mxu3 %vm4385_vm11, %v2309_v52 }
 0xc5f   : > { %v2294_v38 = vpop.f32.mrf.mxu0 }
 0xc62   : > { %2525 = vrot.lane.b32.xlu0 %v3749_v5, %s4382_s1 }
 0xc6a   : > { %2356 = vperm.xlu0 %3157, %v3859_v57  }
 0xc72   : > { %2541 = vrot.lane.b32.xlu0 %v3813_v6, %s4382_s1 }
 0xc73   : > { %3162 = vset.pattern.permute.xlu0 %v3328_v23 }
 0xc7a   : > { %2521 = vrot.lane.b32.xlu0 %v3838_v24, %s4382_s1  ;;  %v3329_v24 = vmov 14  }
 0xcbc   : > { %v2349_v58 = vpop.permute.xlu0 %2348 }
 0xcbd   : > { %v2352_v12 = vmul.f32 %v2349_v58, %v3895_v19  ;;  %v2354_v11 = vmul.f32 %v2349_v58, %v3884_v9  ;;  %v2353_v57 = vmul.f32 %v2349_v58, %v3880_v7  ;;  %v2351_v6 = vmul.f32 %v2349_v58, %v3891_v16  ;;  %v2524_v9 = vpop.permute.xlu1 %2523  ;;  %v2400_v16 = vpop.permute.xlu2 %2399 }
 0xcbe   : > { %v3330_v7 = vmov 15   ;;  %v2401_v25 = vsub.s32 %v3966_v0, %v2400_v16  ;;  %v2402_v51 = vsub.s32 %v3969_v1, %v2400_v16 }
 0xcbf   : > { %2412 = vperm.xlu0 %3162, %v2354_v11   ;;  %2370 = vperm.xlu2 %3161, %v2354_v11  }
 0xcc0   : > { %2424 = vperm.xlu1 %3165, %v2352_v12   ;;  %vm2409_vm6 = vcmp.eq.s32.totalorder %v2401_v25, 17  ;;  %vm2410_vm7 = vcmp.eq.s32.totalorder %v2402_v51, 17  ;;  %vm2405_vm13 = vcmp.eq.s32.totalorder %v2401_v25, 1  ;;  %vm2406_vm0 = vcmp.eq.s32.totalorder %v2402_v51, 1 }
 0xcc1   : > { %vm2407_vm2 = vcmp.eq.s32.totalorder %v2401_v25, 16  ;;  %vm2408_vm5 = vcmp.eq.s32.totalorder %v2402_v51, 16  ;;  %vm2403_vm9 = vcmp.eq.s32.totalorder %v2401_v25, 0  ;;  %vm2404_vm10 = vcmp.eq.s32.totalorder %v2402_v51, 0 }
 0xcc4   : > { %v2530_v5 = vpop.permute.xlu0 %2529 }
 0xcc5   : > { %2566 = vmatpush.bf16.msra.mxu3 %v2530_v5  ;;  %v4177_v27 = vpop.permute.xlu1 %2477  ;;  %v4187_v13 = vpop.permute.xlu2 %2438 }
 0xcc6   : > { %v2440_v3 = vsub.s32 %v3966_v0, %v4187_v13  ;;  %v2441_v52 = vsub.s32 %v3969_v1, %v4187_v13 }
 0xcc7   : > { %3166 = vset.pattern.permute.xlu0 %v3329_v24  ;;  %2377 = vperm.xlu2 %3161, %v2353_v57  }
 0xcc8   : > { %2430 = vperm.xlu1 %3165, %v2351_v6   ;;  %2451 = vperm.xlu0 %3166, %v2354_v11  }
 0xccc   : > { %v2528_v29 = vpop.permute.xlu0 %2527 }
 0xccd   : > { %2567 = vmatpush.bf16.msra.mxu3 %v2528_v29  ;;  %v2540_v43 = vpop.permute.xlu1 %2539 }
 0xccf   : > { %3163 = vset.pattern.permute.xlu2 %v3328_v23 }
 0xcd0   : > { %3169 = vset.pattern.permute.xlu1 %v3329_v24  ;;  %2418 = vperm.xlu2 %3163, %v2353_v57  }
 0xcd1   : > { %2463 = vperm.xlu0 %3166, %v2352_v12   ;;  %2469 = vperm.xlu1 %3169, %v2351_v6  }
 0xcd4   : > { %v2526_v19 = vpop.permute.xlu0 %2525 }
 0xcd5   : > { %2568 = vmatpush.bf16.msra.mxu3 %v2526_v19  ;;  %v2479_v19 = vsub.s32 %v3966_v0, %v4177_v27 }
 0xcd8   : > { %3164 = vset.pattern.permute.xlu2 %v3327_v50 }
 0xcd9   : > { %3170 = vset.pattern.permute.xlu0 %v3330_v7  ;;  %3171 = vset.pattern.permute.xlu1 %v3330_v7 }
 0xcda   : > { %2496 = vperm.xlu0 %3170, %v2353_v57   ;;  %2384 = vperm.xlu2 %3164, %v2352_v12  }
 0xcdb   : > { %2502 = vperm.xlu1 %3171, %v2352_v12   ;;  %2569 = vmatpush.bf16.msra.mxu3 %v2524_v9 }
 0xcdc   : > { %v2357_v4 = vpop.permute.xlu0 %2356 }
 0xcdd   : > { %v2358_v39 = vsub.s32 %v3966_v0, %v2357_v4  ;;  %v2359_v33 = vsub.s32 %v3969_v1, %v2357_v4 }
 0xcdf   : > { %v2326_v42 = vpop.f32.mrf.mxu3  ;;  %vm2366_vm14 = vcmp.eq.s32.totalorder %v2358_v39, 17  ;;  %vm2367_vm8 = vcmp.eq.s32.totalorder %v2359_v33, 17  ;;  %vm2364_vm3 = vcmp.eq.s32.totalorder %v2358_v39, 16  ;;  %vm2365_vm4 = vcmp.eq.s32.totalorder %v2359_v33, 16 }
 0xce0   : > { %v4180_v47 = vadd.f32 %v2326_v42, %v4111_v61  ;;  %v2520_v61 = vpop.permute.xlu2 %2519  ;;  %vm2362_vm12 = vcmp.eq.s32.totalorder %v2358_v39, 1  ;;  %vm2363_vm1 = vcmp.eq.s32.totalorder %v2359_v33, 1  ;;  %vm2360_vm15 = vcmp.eq.s32.totalorder %v2358_v39, 0  ;;  %v2592_v39 = vld [vmem:[%s4305_s16 + $0xc] sm:$0xf] }
 0xce1   : > { %vm2361_vm11 = vcmp.eq.s32.totalorder %v2359_v33, 0 }
 0xce2   : > { %2517 = vrot.lane.b32.xlu0 %v3843_v26, %s4382_s1  ;;  %2391 = vperm.xlu2 %3164, %v2351_v6  }
 0xce3   : > { %2537 = vrot.lane.b32.xlu1 %v3803_v60, %s4382_s1  ;;  %3172 = vset.pattern.permute.xlu0 %v3309_v2 }
 0xce4   : > { %v2542_v49 = vpop.permute.xlu0 %2541 }
 0xce5   : > { %2581 = vmatpush.bf16.msra.mxu0 %v2542_v49 }
 0xce7   : > { %v2328_v8 = vpop.f32.mrf.mxu3 }
 0xce9   : > { %2582 = vmatpush.bf16.msra.mxu0 %v2540_v43 }
 0xcea   : > { %3167 = vset.pattern.permute.xlu2 %v3329_v24  ;;  %2619 = vperm.xlu0 %3172, %v3222_v17  }
 0xceb   : > { %2533 = vrot.lane.b32.xlu1 %v3768_v15, %s4382_s1  ;;  %2457 = vperm.xlu2 %3167, %v2353_v57  }
 0xcec   : > { %v2522_v26 = vpop.permute.xlu0 %2521 }
 0xced   : > { %2570 = vmatpush.bf16.msra.mxu3 %v2522_v26 }
 0xcf1   : > { %2571 = vmatpush.bf16.msra.mxu3 %v2520_v61 }
 0xcf3   : > { %3168 = vset.pattern.permute.xlu2 %v3330_v7  ;;  %v2480_v7 = vsub.s32 %v3969_v1, %v4177_v27 }
 0xcf4   : > { %2490 = vperm.xlu2 %3168, %v2354_v11  }
 0xcfc   : > { %2508 = vperm.xlu2 %3168, %v2351_v6  }
 0xd04   : > { %2535 = vrot.lane.b32.xlu2 %v3829_v22, %s4382_s1  ;;  %s3240_s1 = scalar_lea.hbm %s3239_s0, 8 }
 0xd05   : > { %p3241_p11 = scmp.ne.s32.totalorder %s3239_s0, %s3240_s1  ;;  %p3246_p1 = scmp.lt.s32.totalorder %s3244_s29, %s3240_s1 }
 0xd07   : > { %p3242_p12 = pnand %p3241_p11, %p3484_p5  ;;  %p3247_p2 = por %p3246_p1, %p3245_p0 }
 0xd09   : > { %p3243_p13 = pneg %p3242_p12 }
 0xd0b   : > { %p3248_p3 = pnand %p3247_p2, %p3243_p13 }
 0xd19   : > { %v2371_v60 = vpop.permute.xlu2 %2370 }
 0xd1a   : > { %v2373_v32 = vsel %vm2366_vm14, %v2371_v60, 0.0  ;;  %v2374_v21 = vsel %vm2367_vm8, %v2371_v60, 0.0  ;;  %vm2442_vm14 = vcmp.eq.s32.totalorder %v2440_v3, 0  ;;  %vm2443_vm8 = vcmp.eq.s32.totalorder %v2441_v52, 0 }
 0xd21   : > { %v2378_v2 = vpop.permute.xlu2 %2377 }
 0xd22   : > { %v2380_v54 = vsel %vm2364_vm3, %v2378_v2, %v2373_v32  ;;  %v2381_v56 = vsel %vm2365_vm4, %v2378_v2, %v2374_v21  ;;  %vm2485_vm3 = vcmp.eq.s32.totalorder %v2479_v19, 16  ;;  %vm2486_vm4 = vcmp.eq.s32.totalorder %v2480_v7, 16  ;;  %v3179_v21 = vld [vmem:[%s4306_s17] ss:$0 sm:$0xff] }
 0xd2a   : > { %v2419_v30 = vpop.permute.xlu2 %2418 }
 0xd31   : > { %v2413_v28 = vpop.permute.xlu0 %2412 }
 0xd32   : > { %v2425_v15 = vpop.permute.xlu1 %2424  ;;  %v2415_v34 = vsel %vm2409_vm6, %v2413_v28, 0.0  ;;  %v2416_v63 = vsel %vm2410_vm7, %v2413_v28, 0.0  ;;  %vm2448_vm6 = vcmp.eq.s32.totalorder %v2440_v3, 17  ;;  %vm2449_vm7 = vcmp.eq.s32.totalorder %v2441_v52, 17 }
 0xd33   : > { %v2421_v22 = vsel %vm2407_vm2, %v2419_v30, %v2415_v34  ;;  %v2422_v53 = vsel %vm2408_vm5, %v2419_v30, %v2416_v63  ;;  %vm2444_vm2 = vcmp.eq.s32.totalorder %v2440_v3, 1  ;;  %vm2445_vm5 = vcmp.eq.s32.totalorder %v2441_v52, 1 }
 0xd34   : > { %v2385_v35 = vpop.permute.xlu2 %2384  ;;  %v2427_v37 = vsel %vm2405_vm13, %v2425_v15, %v2421_v22  ;;  %v2428_v40 = vsel %vm2406_vm0, %v2425_v15, %v2422_v53  ;;  %vm2446_vm13 = vcmp.eq.s32.totalorder %v2440_v3, 16  ;;  %vm2447_vm0 = vcmp.eq.s32.totalorder %v2441_v52, 16  ;;  %v3012_v52 = vld [vmem:[%s4309_s20 + $0x10] sm:$0xff] }
 0xd35   : > { %v2387_v10 = vsel %vm2362_vm12, %v2385_v35, %v2380_v54  ;;  %v2388_v46 = vsel %vm2363_vm1, %v2385_v35, %v2381_v56  ;;  %vm2483_vm12 = vcmp.eq.s32.totalorder %v2479_v19, 1  ;;  %vm2484_vm1 = vcmp.eq.s32.totalorder %v2480_v7, 1 }
 0xd3a   : > { %v2431_v44 = vpop.permute.xlu1 %2430  ;;  %v2452_v41 = vpop.permute.xlu0 %2451 }
 0xd3b   : > { %v2433_v59 = vsel %vm2403_vm9, %v2431_v44, %v2427_v37  ;;  %v2434_v36 = vsel %vm2404_vm10, %v2431_v44, %v2428_v40  ;;  %v2454_v50 = vsel %vm2448_vm6, %v2452_v41, 0.0  ;;  %v2455_v23 = vsel %vm2449_vm7, %v2452_v41, 0.0 }
 0xd3c   : > { %v2392_v55 = vpop.permute.xlu2 %2391  ;;  %vm2487_vm9 = vcmp.eq.s32.totalorder %v2479_v19, 17  ;;  %vm2488_vm10 = vcmp.eq.s32.totalorder %v2480_v7, 17  ;;  %vm4386_vm6 = vcmask 1043456   ;;  %vm4387_vm7 = vcmask 64512  }
 0xd3d   : > { %v2394_v20 = vsel %vm2360_vm15, %v2392_v55, %v2387_v10  ;;  %v2395_v31 = vsel %vm2361_vm11, %v2392_v55, %v2388_v46  ;;  %vm2481_vm15 = vcmp.eq.s32.totalorder %v2479_v19, 0  ;;  %vm2482_vm11 = vcmp.eq.s32.totalorder %v2480_v7, 0 }
 0xd3e   : > { %v2435_v62 = vadd.f32 %v2433_v59, %v2394_v20  ;;  %v2436_v48 = vadd.f32 %v2434_v36, %v2395_v31  ;;  %v2597_v33 = vsel %vm4386_vm6, %v2592_v39, 0 }
 0xd3f   : > { %2606 = vmatpush.bf16.msra.mxu2 %v2597_v33 }
 0xd43   : > { %v2464_v45 = vpop.permute.xlu0 %2463  ;;  %v2470_v38 = vpop.permute.xlu1 %2469 }
 0xd45   : > { %v2458_v58 = vpop.permute.xlu2 %2457 }
 0xd46   : > { %v2460_v12 = vsel %vm2446_vm13, %v2458_v58, %v2454_v50  ;;  %v2461_v11 = vsel %vm2447_vm0, %v2458_v58, %v2455_v23  ;;  %vm4388_vm13 = vcmask 261120  }
 0xd47   : > { %v2466_v5 = vsel %vm2444_vm2, %v2464_v45, %v2460_v12  ;;  %v2467_v57 = vsel %vm2445_vm5, %v2464_v45, %v2461_v11  ;;  %vm4389_vm0 = vmmov %vm4388_vm13 }
 0xd48   : > { %v2472_v6 = vsel %vm2442_vm14, %v2470_v38, %v2466_v5  ;;  %v2473_v24 = vsel %vm2443_vm8, %v2470_v38, %v2467_v57  ;;  %v3223_v5 = vld [vmem:[%s4300_s11] sm:$0x3f]  ;;  %vm4390_vm8 = vmmov %vm4389_vm0 }
 0xd49   : > { %v2474_v29 = vadd.f32 %v2472_v6, %v2435_v62  ;;  %v2475_v9 = vadd.f32 %v2473_v24, %v2436_v48  ;;  %v3013_v62 = vld [vmem:[%s4309_s20 + $0x18] sm:$0xff]  ;;  %v2646_v57 = vperm.slane %v3223_v5, 2  ;;  %v2648_v24 = vperm.slane %v3223_v5, 3 }
 0xd4c   : > { %v2497_v16 = vpop.permute.xlu0 %2496 }
 0xd4d   : > { %v2503_v4 = vpop.permute.xlu1 %2502 }
 0xd4e   : > { %v2491_v42 = vpop.permute.xlu2 %2490 }
 0xd4f   : > { %v2493_v49 = vsel %vm2487_vm9, %v2491_v42, 0.0  ;;  %v2494_v13 = vsel %vm2488_vm10, %v2491_v42, 0.0  ;;  %v3180_v42 = vld [vmem:[%s4308_s19] ss:$0 sm:$0xff]  ;;  %vm2725_vm9 = vcmask 523264   ;;  %vm4391_vm10 = vmmov %vm4389_vm0 }
 0xd50   : > { %v2499_v8 = vsel %vm2485_vm3, %v2497_v16, %v2493_v49  ;;  %v2500_v43 = vsel %vm2486_vm4, %v2497_v16, %v2494_v13  ;;  %v3011_v16 = vld [vmem:[%s4309_s20 + $0x8] sm:$0xff]  ;;  %vm4392_vm3 = vmmov %vm4389_vm0 }
 0xd51   : > { %v2505_v1 = vsel %vm2483_vm12, %v2503_v4, %v2499_v8  ;;  %v2506_v27 = vsel %vm2484_vm1, %v2503_v4, %v2500_v43  ;;  %v3010_v4 = vld [vmem:[%s4309_s20] sm:$0xff] }
 0xd54   : > { %v2518_v17 = vpop.permute.xlu0 %2517 }
 0xd55   : > { %v2538_v26 = vpop.permute.xlu1 %2537  ;;  %2572 = vmatpush.bf16.msra.mxu3 %v2518_v17 }
 0xd56   : > { %2583 = vmatpush.bf16.msra.mxu0 %v2538_v26  ;;  %v2509_v0 = vpop.permute.xlu2 %2508  ;;  %v3181_v26 = vld [vmem:[%s4310_s21] ss:$0 sm:$0xff] }
 0xd57   : > { %v2511_v61 = vsel %vm2481_vm15, %v2509_v0, %v2505_v1  ;;  %v2512_v60 = vsel %vm2482_vm11, %v2509_v0, %v2506_v27  ;;  %vm4394_vm15 = vmmov %vm4389_vm0 }
 0xd58   : > { %v2513_v2 = vadd.f32 %v2511_v61, %v2474_v29  ;;  %v2514_v30 = vadd.f32 %v2512_v60, %v2475_v9 }
 0xd59   : > { %2733 = vmatpush.bf16.msrb.mxu3 %v3013_v62 }
 0xd5a   : > { %v2515_v25 = vpack.c.bf16 %v2513_v2, %v2513_v2  ;;  %v2516_v15 = vpack.c.bf16 %v2514_v30, %v2514_v30 }
 0xd5c   : > { %2573 = vmatmul.bf16.vlgmr.msra.gmra.mxu3 %v2515_v25  ;;  %v2620_v54 = vpop.permute.xlu0 %2619 }
 0xd5d   : > { %v2534_v28 = vpop.permute.xlu1 %2533  ;;  %2734 = vmatpush.bf16.msrb.mxu3 %v3012_v52 }
 0xd5e   : > { %v2536_v51 = vpop.permute.xlu2 %2535 }
 0xd5f   : > { %2584 = vmatpush.bf16.msra.mxu0 %v2536_v51 }
 0xd61   : > { %2735 = vmatpush.bf16.msrb.mxu3 %v3011_v16 }
 0xd63   : > { %2585 = vmatpush.bf16.msra.mxu0 %v2534_v28 }
 0xd65   : > { %2736 = vmatpush.bf16.msrb.mxu3 %v3010_v4 }
 0xd66   : > { %2586 = vmatmul.bf16.vlgmr.msra.gmra.mxu0 %v2516_v15 }
 0xddf   : > { %v2574_v35 = vpop.f32.mrf.mxu3 }
 0xde3   : > { %v2587_v34 = vpop.f32.mrf.mxu0 }
 0xde4   : > { %v2588_v63 = vadd.f32 %v2587_v34, %v2574_v35 }
 0xde6   : > { %v2591_v22 = vpack.c.bf16 %v2588_v63, %v2588_v63 }
 0xde7   : > { %v2576_v53 = vpop.f32.mrf.mxu3 }
 0xde8   : > { %2968 = vmatmul.msk.bf16.vlgmr.msra.gmra.mxu2 %vm4387_vm7, %v2591_v22 }
 0xdeb   : > { %v2589_v32 = vpop.f32.mrf.mxu0 }
 0xe6b   : > { %v2608_v44 = vpop.f32.mrf.mxu2 }
 0xe6c   : > { %v2612_v41 = vadd.f32 %v2608_v44, %v4180_v47  ;;  %v3009_v47 = vld [vmem:[%s4307_s18 + $0x8] sm:$0xff] }
 0xe6d   : > { %2680 = vmatpush.bf16.msrb.mxu2 %v3009_v47 }
 0xe6e   : > { %v2617_v56 = vadd.f32 %v3179_v21, %v2612_v41  ;;  %v2765_v21 = vperm.slane %v3223_v5, 4  ;;  %v2767_v41 = vperm.slane %v3223_v5, 5 }
 0xe70   : > { %v2622_v37 = vmul.f32 %v2620_v54, %v2617_v56 }
 0xe72   : > { %v2623_v40 = vadd.f32 %v2622_v37, %v3700_v14  ;;  %v3008_v14 = vld [vmem:[%s4307_s18] sm:$0xff] }
 0xe73   : > { %v2610_v10 = vpop.f32.mrf.mxu2  ;;  %2681 = vmatpush.bf16.msrb.mxu2 %v3008_v14 }
 0xe74   : > { %v2624_v46 = vsel %vm4388_vm13, %v2623_v40, 0.0 }
 0xe75   : > { %2625 = vadd.xlane.f32.xlu2 %v2624_v46 }
 0xee8   : > { %v2626_v55 = vpop.xlane.xlu2 %2625 }
 0xee9   : > { %v2627_v59 = vmul.f32 %v2626_v55, %v3640_v18 }
 0xeeb   : > { %v2628_v36 = vsub.f32 %v2623_v40, %v2627_v59 }
 0xeed   : > { %v2629_v20 = vmul.f32 %v2628_v36, %v2628_v36 }
 0xeef   : > { %v2630_v31 = vsel %vm4389_vm0, %v2629_v20, 0.0 }
 0xef0   : > { %2631 = vadd.xlane.f32.xlu1 %v2630_v31 }
 0xf63   : > { %v2632_v48 = vpop.xlane.xlu1 %2631 }
 0xf64   : > { %v2633_v3 = vmul.f32 %v2632_v48, %v3640_v18 }
 0xf66   : > { %v2634_v45 = vadd.f32 1e-05, %v2633_v3 }
 0xf68   : > { %3218 = vrsqrt.f32 %v2634_v45  ;;  %vm2641_vm5 = vweird.f32 %v2634_v45 }
 0xf6e   : > { %v3219_v38 = vpop.eup %3218 }
 0xf6f   : > { %v2636_v50 = vmul.f32 %v3219_v38, %v2634_v45  ;;  %vm2642_vm2 = vweird.f32 %v3219_v38 }
 0xf70   : > { %vm2643_vm14 = vmor %vm2641_vm5, %vm2642_vm2 }
 0xf71   : > { %v2637_v23 = vmul.f32 %v3219_v38, %v2636_v50 }
 0xf73   : > { %v2638_v58 = vmul.f32 0.5, %v2637_v23 }
 0xf75   : > { %v2639_v12 = vsub.f32 1.5, %v2638_v58 }
 0xf77   : > { %v2640_v11 = vmul.f32 %v3219_v38, %v2639_v12 }
 0xf79   : > { %v2644_v6 = vsel %vm2643_vm14, %v3219_v38, %v2640_v11 }
 0xf7a   : > { %v2645_v29 = vmul.f32 %v2644_v6, %v2628_v36 }
 0xf7c   : > { %v2647_v9 = vmul.f32 %v2646_v57, %v2645_v29 }
 0xf7e   : > { %v2649_v19 = vadd.f32 %v2648_v24, %v2647_v9 }
 0xf80   : > { %v2654_v7 = vpack.c.bf16 %v2649_v19, %v2649_v19 }
 0xf82   : > { %2977 = vmatmul.msk.bf16.vlgmr.msrb.gmra.mxu2 %vm4390_vm8, %v2654_v7 }
0x1005   : > { %v2683_v49 = vpop.f32.mrf.mxu2 }
0x1006   : > { %v2684_v13 = vadd.f32 %v3180_v42, %v2683_v49 }
0x1008   : > { %v2687_v8 = vmax.f32 %v2684_v13, 0.0 }
0x100a   : > { %v2696_v43 = vpack.c.bf16 %v2687_v8, %v2687_v8 }
0x100c   : > { %2994 = vmatmul.msk.bf16.vlgmr.msrb.gmra.mxu3 %vm2725_vm9, %v2696_v43 }
0x100d   : > { %v2685_v17 = vpop.f32.mrf.mxu2 }
0x108f   : > { %v2738_v0 = vpop.f32.mrf.mxu3 }
0x1090   : > { %v2739_v1 = vadd.f32 %v3181_v26, %v2738_v0 }
0x1092   : > { %v2742_v27 = vadd.f32 %v2739_v1, %v2649_v19 }
0x1094   : > { %v2743_v61 = vsel %vm4391_vm10, %v2742_v27, 0.0 }
0x1095   : > { %2744 = vadd.xlane.f32.xlu0 %v2743_v61 }
0x1097   : > { %v2740_v60 = vpop.f32.mrf.mxu3 }
0x1108   : > { %v2745_v2 = vpop.xlane.xlu0 %2744 }
0x1109   : > { %v2746_v30 = vmul.f32 %v2745_v2, %v3640_v18 }
0x110b   : > { %v2747_v25 = vsub.f32 %v2742_v27, %v2746_v30 }
0x110d   : > { %v2748_v51 = vmul.f32 %v2747_v25, %v2747_v25 }
0x110f   : > { %v2749_v28 = vsel %vm4392_vm3, %v2748_v51, 0.0 }
0x1110   : > { %2750 = vadd.xlane.f32.xlu2 %v2749_v28 }
0x1183   : > { %v2751_v15 = vpop.xlane.xlu2 %2750 }
0x1184   : > { %v2752_v39 = vmul.f32 %v2751_v15, %v3640_v18 }
0x1186   : > { %v2753_v33 = vadd.f32 1e-05, %v2752_v39 }
0x1188   : > { %3220 = vrsqrt.f32 %v2753_v33  ;;  %vm2760_vm12 = vweird.f32 %v2753_v33 }
0x118e   : > { %v3221_v35 = vpop.eup %3220 }
0x118f   : > { %v2755_v34 = vmul.f32 %v3221_v35, %v2753_v33  ;;  %vm2761_vm4 = vweird.f32 %v3221_v35 }
0x1190   : > { %vm2762_vm1 = vmor %vm2760_vm12, %vm2761_vm4 }
0x1191   : > { %v2756_v63 = vmul.f32 %v3221_v35, %v2755_v34 }
0x1193   : > { %v2757_v22 = vmul.f32 0.5, %v2756_v63 }
0x1195   : > { %v2758_v53 = vsub.f32 1.5, %v2757_v22 }
0x1197   : > { %v2759_v32 = vmul.f32 %v3221_v35, %v2758_v53 }
0x1199   : > { %v2763_v18 = vsel %vm2762_vm1, %v3221_v35, %v2759_v32 }
0x119a   : > { %v2764_v44 = vmul.f32 %v2763_v18, %v2747_v25 }
0x119c   : > { %v2766_v54 = vmul.f32 %v2765_v21, %v2764_v44 }
0x119e   : > { %v2768_v56 = vadd.f32 %v2767_v41, %v2766_v54 }
0x11a0   : > { %2769 = vst.msk [vmem:[%s726_s2] sm:$0xff] %vm4394_vm15, %v2768_v56 }
0x11a1   : > { %3251 = shalt.err (!%p3248_p3)
}
0x11a2   : > { %3024 = dma.vmem_to_hbm [thread:$0]  (%p3484_p5), %s2784_s23, 128, %s2786_s24, %s2771_s4  }
0x11a3 PF: > { %s4395_s5 = sld [smem:[#allocation7_spill]] }
0x11a4   : > { %s4396_s2 = sld [smem:[#allocation5_spill]] }
0x11a9   : > { %p3030_p4 = scmp.ge.s32.totalorder %s4395_s5, 2 }
0x11aa   : > { %s2797_s8 = sand.u32 1, %s4396_s2  }
0x11ab   : > { %p3027_p7 = pnand %p3030_p4, %p3488_p6  ;;  %s2798_s3 = scalar_lea.sflag [#allocation3], %s2797_s8 }
0x11ad   : > { %p3028_p8 = pneg %p3027_p7 }
0x11af   : > { %3269 = dma.done.wait (%p3028_p8), %s2798_s3, 128  }
0x11b0   : > { %3271 = vsyncadd (%p3028_p8), %s2798_s3, 4294967168  ;;  %s4398_s30 = sld [smem:[#allocation8_spill]]  ;;  %s4401_s3 = smov %s3278_s28 }
0x11b1   : > { %s4399_s0 = sld [smem:[#allocation6_spill]] }
0x11b2   : > { %s4400_s29 = sld [smem:[#allocation9_spill]] }
0x11b6   : > { %p32_p9 = scmp.ge.s32.totalorder %s4398_s30, 4  }
0x11b7   : > { %s4402_s28 = smov %s4399_s0 }
0x11b8   :  { %34 = sbr.rel (!%p32_p9) target bundleno = 13 (0xd), region = 155 }
0x11bd   :  { %2804 = vsyncpa [#allocation3], 1 }
0x11be   :  { %2806 = vsyncpa [#allocation3 + $0x1], 1 }

</bundles_post_ra>
